<compile_context>
chip_gen: v7x
topology: tpu7x:2x2x1
jax: 0.10.0
libtpu: 0.0.40
codegen_flags: <defaults>
</compile_context>

<pallas_src>
import functools

import jax
import jax.numpy as jnp
from jax.experimental import pallas as pl
from jax.experimental.pallas import tpu as pltpu


def _mask_kernel(x_ref, z_ref, w1_ref, w2_ref, o_ref, *, hz, wz, wx):
    """Channel-major depthwise-xcorr + 1x1-conv head for a block of batches.

    x_ref : [BB, C, S]    search features, S = Hx*Wx (lane-dense)
    z_ref : [BB, C, T]    template features, T = Hz*Wz
    w1_ref: [Hd, C + 1]   [w1^T | b1]
    w2_ref: [K,  Hd + 1]  [w2^T | b2]
    o_ref : [BB, K, Sv]   Sv = S - (Hz-1)*Wx - (Wz-1)  (flat valid columns)
    """
    bb_n, c, _ = x_ref.shape
    hd = w1_ref.shape[0]
    sv = o_ref.shape[2]

    # Head weights: loaded once; constant index_map keeps them resident.
    w1 = w1_ref[:, :c]                             # [Hd, C] f32
    b1 = w1_ref[:, c:c + 1]                        # [Hd, 1] f32
    w2 = w2_ref[:, :hd]                            # [K, Hd] f32
    b2 = w2_ref[:, hd:hd + 1]                      # [K, 1]  f32

    for bb in range(bb_n):                         # BB is 1 or B (tiny, static)
        x2 = x_ref[bb].astype(jnp.float32)         # [C, S]  loaded once
        z2 = z_ref[bb].astype(jnp.float32)         # [C, T]  loaded once

        # Depthwise valid cross-correlation accumulated as [C, Sv]:
        #   corr[c, i*Wx + j] = sum_{di,dj} x[c, i+di, j+dj] * z[c, di, dj]
        # Each tap is an in-register lane slice of flat x at offset di*Wx + dj
        # times a per-channel (per-sublane) scalar column of z.
        # TODO(synk): for much larger templates (many taps) switch this static
        # unroll to a lax.fori_loop over di to bound code size / live ranges.
        acc = x2[:, :sv] * z2[:, 0:1]
        for t in range(1, hz * wz):
            off = (t // wz) * wx + (t % wz)
            acc = acc + x2[:, off:off + sv] * z2[:, t:t + 1]

        # 1x1 conv -> ReLU -> 1x1 conv as channel-major MXU matmuls (f32 in,
        # f32 accumulate; tiny contraction dims so f32 MXU cost is negligible).
        h = jnp.dot(w1, acc, preferred_element_type=jnp.float32)
        h = jnp.maximum(h + b1, 0.0)
        y = jnp.dot(w2, h, preferred_element_type=jnp.float32) + b2

        o_ref[bb] = y.astype(o_ref.dtype)          # [K, Sv] lane-dense store


def _tensorcores_per_chip():
    """Best-effort TensorCores-per-chip (2 on v7x, 1 on v5e/v6e)."""
    try:
        kind = jax.devices()[0].device_kind.lower()
    except Exception:
        return 1
    return 2 if ("v7" in kind or "7x" in kind) else 1


def mask_forward(z_f, x_f, w1, b1, w2, b2, *, batch_block=None):
    """z_f, x_f in PyTorch NCHW layout; returns NCHW output [B, K, Ho, Wo]."""
    B, C, Hz, Wz = z_f.shape
    Bx, Cx, Hx, Wx = x_f.shape
    assert B == Bx and C == Cx
    Ho, Wo = Hx - Hz + 1, Wx - Wz + 1
    Hd = w1.shape[1]
    K = w2.shape[1]
    S = Hx * Wx
    T = Hz * Wz
    Sv = S - (Hz - 1) * Wx - (Wz - 1)   # flat columns covering every valid (i, j)

    # NCHW-native: only free reshapes of contiguous trailing dims (no transposes).
    x2d = x_f.reshape(B, C, S).astype(jnp.float32)
    z2d = z_f.reshape(B, C, T).astype(jnp.float32)
    # Pack each 1x1-conv weight with its bias into a single resident block.
    w1tb = jnp.concatenate([w1.T.astype(jnp.float32),
                            b1.reshape(Hd, 1).astype(jnp.float32)], axis=1)
    w2tb = jnp.concatenate([w2.T.astype(jnp.float32),
                            b2.reshape(K, 1).astype(jnp.float32)], axis=1)

    if batch_block is None:
        # v7x: one batch element per grid step -> both TensorCores used.
        # v5e/v6e (single TC): fold the whole batch into a single grid step.
        batch_block = 1 if _tensorcores_per_chip() > 1 else B
    BB = batch_block if (batch_block and B % batch_block == 0) else 1

    kernel = functools.partial(_mask_kernel, hz=Hz, wz=Wz, wx=Wx)

    out_flat = pl.pallas_call(
        kernel,
        out_shape=jax.ShapeDtypeStruct((B, K, Sv), jnp.float32),
        grid_spec=pltpu.PrefetchScalarGridSpec(
            num_scalar_prefetch=0,
            grid=(B // BB,),
            in_specs=[
                pl.BlockSpec((BB, C, S), lambda g: (g, 0, 0)),
                pl.BlockSpec((BB, C, T), lambda g: (g, 0, 0)),
                pl.BlockSpec((Hd, C + 1), lambda g: (0, 0)),
                pl.BlockSpec((K, Hd + 1), lambda g: (0, 0)),
            ],
            out_specs=pl.BlockSpec((BB, K, Sv), lambda g: (g, 0, 0)),
        ),
        compiler_params=pltpu.CompilerParams(
            dimension_semantics=("parallel",),
        ),
    )(x2d, z2d, w1tb, w2tb)

    # Recover [B, K, Ho, Wo]: flat column i*Wx + j holds output position (i, j).
    pad = Ho * Wx - Sv                   # = Wz - 1
    out = jnp.pad(out_flat, ((0, 0), (0, 0), (0, pad)))
    out = out.reshape(B, K, Ho, Wx)[:, :, :, :Wo]
    return out


def _reference(z_f, x_f, w1, b1, w2, b2):
    """Pure-JAX f32 reference (same semantics) for correctness check."""
    B, C, Hz, Wz = z_f.shape
    Hx, Wx = x_f.shape[2], x_f.shape[3]
    Ho, Wo = Hx - Hz + 1, Wx - Wz + 1
    corr = jnp.zeros((B, C, Ho, Wo), jnp.float32)
    for di in range(Hz):
        for dj in range(Wz):
            corr = corr + (x_f[:, :, di:di + Ho, dj:dj + Wo]
                           * z_f[:, :, di:di + 1, dj:dj + 1])
    h = jnp.maximum(jnp.einsum("bchw,cd->bdhw", corr, w1)
                    + b1[None, :, None, None], 0.0)
    y = jnp.einsum("bdhw,dk->bkhw", h, w2) + b2[None, :, None, None]
    return y


if __name__ == "__main__":
    # Small shapes consistent with a SiamMask mask head:
    #   template features z_f: [B, C, 4, 4], search features x_f: [B, C, 16, 16]
    B, C, Hz, Wz, Hx, Wx = 2, 32, 4, 4, 16, 16
    HIDDEN, OSZ = 32, 4
    K = OSZ * OSZ  # mask-head output channels (oSz**2)

    key = jax.random.PRNGKey(0)
    kz, kx, k1, k2, k3, k4 = jax.random.split(key, 6)
    z_f = jax.random.normal(kz, (B, C, Hz, Wz), jnp.float32)
    x_f = jax.random.normal(kx, (B, C, Hx, Wx), jnp.float32)

    # Deterministic synthetic parameters for the 1x1-conv head.
    w1 = jax.random.normal(k1, (C, HIDDEN), jnp.float32) * 0.05
    b1 = jax.random.normal(k2, (HIDDEN,), jnp.float32) * 0.01
    w2 = jax.random.normal(k3, (HIDDEN, K), jnp.float32) * 0.05
    b2 = jax.random.normal(k4, (K,), jnp.float32) * 0.01

    fwd = jax.jit(mask_forward)
    out = fwd(z_f, x_f, w1, b1, w2, b2)
    jax.block_until_ready(out)

    ref = _reference(z_f, x_f, w1, b1, w2, b2)
    assert out.shape == (B, K, Hx - Hz + 1, Wx - Wz + 1), out.shape
    # All-f32 compute -> tight tolerance; an indexing/shift bug would produce
    # O(1) errors.
    assert jnp.allclose(out, ref, atol=1e-3, rtol=1e-3), \
        float(jnp.max(jnp.abs(out - ref)))

    print("KERNEL_OK")
</pallas_src>

<mosaic_0001>
module attributes {stable_mosaic.version = 11 : i64} {
  func.func @_mask_kernel(%arg0: i32, %arg1: memref<2x32x256xf32, #tpu.memory_space<vmem>>, %arg2: memref<2x32x16xf32, #tpu.memory_space<vmem>>, %arg3: memref<32x33xf32, #tpu.memory_space<vmem>>, %arg4: memref<16x33xf32, #tpu.memory_space<vmem>>, %arg5: memref<2x16x205xf32, #tpu.memory_space<vmem>>) attributes {dimension_semantics = [#tpu.dimension_semantics<parallel>], iteration_bounds = array<i64: 1>, scalar_prefetch = 0 : i64, scratch_operands = 0 : i64, tpu.core_type = #tpu.core_type<tc>, window_params = [{transform_indices = @transform_0, window_bounds = array<i64: 2, 32, 256>}, {transform_indices = @transform_1, window_bounds = array<i64: 2, 32, 16>}, {pipeline_mode = #tpu.pipeline_mode<synchronous>, transform_indices = @transform_2, window_bounds = array<i64: 32, 33>}, {pipeline_mode = #tpu.pipeline_mode<synchronous>, transform_indices = @transform_3, window_bounds = array<i64: 16, 33>}, {transform_indices = @transform_4, window_bounds = array<i64: 2, 16, 205>}]} {
    %c0 = arith.constant 0 : index
    %c0_0 = arith.constant 0 : index
    %0 = vector.load %arg3[%c0, %c0_0] : memref<32x33xf32, #tpu.memory_space<vmem>>, vector<32x32xf32>
    %c0_1 = arith.constant 0 : index
    %c32 = arith.constant 32 : index
    %1 = vector.load %arg3[%c0_1, %c32] : memref<32x33xf32, #tpu.memory_space<vmem>>, vector<32x1xf32>
    %c0_2 = arith.constant 0 : index
    %c0_3 = arith.constant 0 : index
    %2 = vector.load %arg4[%c0_2, %c0_3] : memref<16x33xf32, #tpu.memory_space<vmem>>, vector<16x32xf32>
    %c0_4 = arith.constant 0 : index
    %c32_5 = arith.constant 32 : index
    %3 = vector.load %arg4[%c0_4, %c32_5] : memref<16x33xf32, #tpu.memory_space<vmem>>, vector<16x1xf32>
    %c0_6 = arith.constant 0 : index
    %c0_7 = arith.constant 0 : index
    %c0_8 = arith.constant 0 : index
    %4 = vector.load %arg1[%c0_6, %c0_7, %c0_8] : memref<2x32x256xf32, #tpu.memory_space<vmem>>, vector<1x32x256xf32>
    %5 = vector.shape_cast %4 : vector<1x32x256xf32> to vector<32x256xf32>
    %c0_9 = arith.constant 0 : index
    %c0_10 = arith.constant 0 : index
    %c0_11 = arith.constant 0 : index
    %6 = vector.load %arg2[%c0_9, %c0_10, %c0_11] : memref<2x32x16xf32, #tpu.memory_space<vmem>>, vector<1x32x16xf32>
    %7 = vector.shape_cast %6 : vector<1x32x16xf32> to vector<32x16xf32>
    %8 = vector.extract_strided_slice %5 {offsets = [0, 0], sizes = [32, 205], strides = [1, 1]} : vector<32x256xf32> to vector<32x205xf32>
    %9 = vector.extract_strided_slice %7 {offsets = [0, 0], sizes = [32, 1], strides = [1, 1]} : vector<32x16xf32> to vector<32x1xf32>
    %10 = vector.broadcast %9 : vector<32x1xf32> to vector<32x205xf32>
    %11 = arith.mulf %8, %10 : vector<32x205xf32>
    %12 = vector.extract_strided_slice %5 {offsets = [0, 1], sizes = [32, 205], strides = [1, 1]} : vector<32x256xf32> to vector<32x205xf32>
    %13 = vector.extract_strided_slice %7 {offsets = [0, 1], sizes = [32, 1], strides = [1, 1]} : vector<32x16xf32> to vector<32x1xf32>
    %14 = vector.broadcast %13 : vector<32x1xf32> to vector<32x205xf32>
    %15 = arith.mulf %12, %14 : vector<32x205xf32>
    %16 = arith.addf %11, %15 : vector<32x205xf32>
    %17 = vector.extract_strided_slice %5 {offsets = [0, 2], sizes = [32, 205], strides = [1, 1]} : vector<32x256xf32> to vector<32x205xf32>
    %18 = vector.extract_strided_slice %7 {offsets = [0, 2], sizes = [32, 1], strides = [1, 1]} : vector<32x16xf32> to vector<32x1xf32>
    %19 = vector.broadcast %18 : vector<32x1xf32> to vector<32x205xf32>
    %20 = arith.mulf %17, %19 : vector<32x205xf32>
    %21 = arith.addf %16, %20 : vector<32x205xf32>
    %22 = vector.extract_strided_slice %5 {offsets = [0, 3], sizes = [32, 205], strides = [1, 1]} : vector<32x256xf32> to vector<32x205xf32>
    %23 = vector.extract_strided_slice %7 {offsets = [0, 3], sizes = [32, 1], strides = [1, 1]} : vector<32x16xf32> to vector<32x1xf32>
    %24 = vector.broadcast %23 : vector<32x1xf32> to vector<32x205xf32>
    %25 = arith.mulf %22, %24 : vector<32x205xf32>
    %26 = arith.addf %21, %25 : vector<32x205xf32>
    %27 = vector.extract_strided_slice %5 {offsets = [0, 16], sizes = [32, 205], strides = [1, 1]} : vector<32x256xf32> to vector<32x205xf32>
    %28 = vector.extract_strided_slice %7 {offsets = [0, 4], sizes = [32, 1], strides = [1, 1]} : vector<32x16xf32> to vector<32x1xf32>
    %29 = vector.broadcast %28 : vector<32x1xf32> to vector<32x205xf32>
    %30 = arith.mulf %27, %29 : vector<32x205xf32>
    %31 = arith.addf %26, %30 : vector<32x205xf32>
    %32 = vector.extract_strided_slice %5 {offsets = [0, 17], sizes = [32, 205], strides = [1, 1]} : vector<32x256xf32> to vector<32x205xf32>
    %33 = vector.extract_strided_slice %7 {offsets = [0, 5], sizes = [32, 1], strides = [1, 1]} : vector<32x16xf32> to vector<32x1xf32>
    %34 = vector.broadcast %33 : vector<32x1xf32> to vector<32x205xf32>
    %35 = arith.mulf %32, %34 : vector<32x205xf32>
    %36 = arith.addf %31, %35 : vector<32x205xf32>
    %37 = vector.extract_strided_slice %5 {offsets = [0, 18], sizes = [32, 205], strides = [1, 1]} : vector<32x256xf32> to vector<32x205xf32>
    %38 = vector.extract_strided_slice %7 {offsets = [0, 6], sizes = [32, 1], strides = [1, 1]} : vector<32x16xf32> to vector<32x1xf32>
    %39 = vector.broadcast %38 : vector<32x1xf32> to vector<32x205xf32>
    %40 = arith.mulf %37, %39 : vector<32x205xf32>
    %41 = arith.addf %36, %40 : vector<32x205xf32>
    %42 = vector.extract_strided_slice %5 {offsets = [0, 19], sizes = [32, 205], strides = [1, 1]} : vector<32x256xf32> to vector<32x205xf32>
    %43 = vector.extract_strided_slice %7 {offsets = [0, 7], sizes = [32, 1], strides = [1, 1]} : vector<32x16xf32> to vector<32x1xf32>
    %44 = vector.broadcast %43 : vector<32x1xf32> to vector<32x205xf32>
    %45 = arith.mulf %42, %44 : vector<32x205xf32>
    %46 = arith.addf %41, %45 : vector<32x205xf32>
    %47 = vector.extract_strided_slice %5 {offsets = [0, 32], sizes = [32, 205], strides = [1, 1]} : vector<32x256xf32> to vector<32x205xf32>
    %48 = vector.extract_strided_slice %7 {offsets = [0, 8], sizes = [32, 1], strides = [1, 1]} : vector<32x16xf32> to vector<32x1xf32>
    %49 = vector.broadcast %48 : vector<32x1xf32> to vector<32x205xf32>
    %50 = arith.mulf %47, %49 : vector<32x205xf32>
    %51 = arith.addf %46, %50 : vector<32x205xf32>
    %52 = vector.extract_strided_slice %5 {offsets = [0, 33], sizes = [32, 205], strides = [1, 1]} : vector<32x256xf32> to vector<32x205xf32>
    %53 = vector.extract_strided_slice %7 {offsets = [0, 9], sizes = [32, 1], strides = [1, 1]} : vector<32x16xf32> to vector<32x1xf32>
    %54 = vector.broadcast %53 : vector<32x1xf32> to vector<32x205xf32>
    %55 = arith.mulf %52, %54 : vector<32x205xf32>
    %56 = arith.addf %51, %55 : vector<32x205xf32>
    %57 = vector.extract_strided_slice %5 {offsets = [0, 34], sizes = [32, 205], strides = [1, 1]} : vector<32x256xf32> to vector<32x205xf32>
    %58 = vector.extract_strided_slice %7 {offsets = [0, 10], sizes = [32, 1], strides = [1, 1]} : vector<32x16xf32> to vector<32x1xf32>
    %59 = vector.broadcast %58 : vector<32x1xf32> to vector<32x205xf32>
    %60 = arith.mulf %57, %59 : vector<32x205xf32>
    %61 = arith.addf %56, %60 : vector<32x205xf32>
    %62 = vector.extract_strided_slice %5 {offsets = [0, 35], sizes = [32, 205], strides = [1, 1]} : vector<32x256xf32> to vector<32x205xf32>
    %63 = vector.extract_strided_slice %7 {offsets = [0, 11], sizes = [32, 1], strides = [1, 1]} : vector<32x16xf32> to vector<32x1xf32>
    %64 = vector.broadcast %63 : vector<32x1xf32> to vector<32x205xf32>
    %65 = arith.mulf %62, %64 : vector<32x205xf32>
    %66 = arith.addf %61, %65 : vector<32x205xf32>
    %67 = vector.extract_strided_slice %5 {offsets = [0, 48], sizes = [32, 205], strides = [1, 1]} : vector<32x256xf32> to vector<32x205xf32>
    %68 = vector.extract_strided_slice %7 {offsets = [0, 12], sizes = [32, 1], strides = [1, 1]} : vector<32x16xf32> to vector<32x1xf32>
    %69 = vector.broadcast %68 : vector<32x1xf32> to vector<32x205xf32>
    %70 = arith.mulf %67, %69 : vector<32x205xf32>
    %71 = arith.addf %66, %70 : vector<32x205xf32>
    %72 = vector.extract_strided_slice %5 {offsets = [0, 49], sizes = [32, 205], strides = [1, 1]} : vector<32x256xf32> to vector<32x205xf32>
    %73 = vector.extract_strided_slice %7 {offsets = [0, 13], sizes = [32, 1], strides = [1, 1]} : vector<32x16xf32> to vector<32x1xf32>
    %74 = vector.broadcast %73 : vector<32x1xf32> to vector<32x205xf32>
    %75 = arith.mulf %72, %74 : vector<32x205xf32>
    %76 = arith.addf %71, %75 : vector<32x205xf32>
    %77 = vector.extract_strided_slice %5 {offsets = [0, 50], sizes = [32, 205], strides = [1, 1]} : vector<32x256xf32> to vector<32x205xf32>
    %78 = vector.extract_strided_slice %7 {offsets = [0, 14], sizes = [32, 1], strides = [1, 1]} : vector<32x16xf32> to vector<32x1xf32>
    %79 = vector.broadcast %78 : vector<32x1xf32> to vector<32x205xf32>
    %80 = arith.mulf %77, %79 : vector<32x205xf32>
    %81 = arith.addf %76, %80 : vector<32x205xf32>
    %82 = vector.extract_strided_slice %5 {offsets = [0, 51], sizes = [32, 205], strides = [1, 1]} : vector<32x256xf32> to vector<32x205xf32>
    %83 = vector.extract_strided_slice %7 {offsets = [0, 15], sizes = [32, 1], strides = [1, 1]} : vector<32x16xf32> to vector<32x1xf32>
    %84 = vector.broadcast %83 : vector<32x1xf32> to vector<32x205xf32>
    %85 = arith.mulf %82, %84 : vector<32x205xf32>
    %86 = arith.addf %81, %85 : vector<32x205xf32>
    %cst = arith.constant dense<0.000000e+00> : vector<32x205xf32>
    %87 = tpu.matmul %0, %86, %cst {dimension_numbers = #tpu.dot_dimension_numbers<[1], [0], [0], [1], [0, 0, 1, 1], [], []>} : vector<32x32xf32>, vector<32x205xf32>, vector<32x205xf32> -> vector<32x205xf32>
    %88 = vector.broadcast %1 : vector<32x1xf32> to vector<32x205xf32>
    %89 = arith.addf %87, %88 : vector<32x205xf32>
    %cst_12 = arith.constant 0.000000e+00 : f32
    %90 = vector.broadcast %cst_12 : f32 to vector<32x205xf32>
    %91 = arith.maximumf %89, %90 : vector<32x205xf32>
    %cst_13 = arith.constant dense<0.000000e+00> : vector<16x205xf32>
    %92 = tpu.matmul %2, %91, %cst_13 {dimension_numbers = #tpu.dot_dimension_numbers<[1], [0], [0], [1], [0, 0, 1, 1], [], []>} : vector<16x32xf32>, vector<32x205xf32>, vector<16x205xf32> -> vector<16x205xf32>
    %93 = vector.broadcast %3 : vector<16x1xf32> to vector<16x205xf32>
    %94 = arith.addf %92, %93 : vector<16x205xf32>
    %c0_14 = arith.constant 0 : index
    %c0_15 = arith.constant 0 : index
    %c0_16 = arith.constant 0 : index
    %95 = vector.load %arg5[%c0_14, %c0_15, %c0_16] : memref<2x16x205xf32, #tpu.memory_space<vmem>>, vector<1x16x205xf32>
    %96 = vector.shape_cast %95 : vector<1x16x205xf32> to vector<16x205xf32>
    %97 = vector.shape_cast %94 : vector<16x205xf32> to vector<1x16x205xf32>
    tpu.vector_store %arg5[%c0_14, %c0_15, %c0_16], %97 {strides = array<i32>} : memref<2x16x205xf32, #tpu.memory_space<vmem>>, vector<1x16x205xf32>,
    %c1 = arith.constant 1 : index
    %c0_17 = arith.constant 0 : index
    %c0_18 = arith.constant 0 : index
    %98 = vector.load %arg1[%c1, %c0_17, %c0_18] : memref<2x32x256xf32, #tpu.memory_space<vmem>>, vector<1x32x256xf32>
    %99 = vector.shape_cast %98 : vector<1x32x256xf32> to vector<32x256xf32>
    %c1_19 = arith.constant 1 : index
    %c0_20 = arith.constant 0 : index
    %c0_21 = arith.constant 0 : index
    %100 = vector.load %arg2[%c1_19, %c0_20, %c0_21] : memref<2x32x16xf32, #tpu.memory_space<vmem>>, vector<1x32x16xf32>
    %101 = vector.shape_cast %100 : vector<1x32x16xf32> to vector<32x16xf32>
    %102 = vector.extract_strided_slice %99 {offsets = [0, 0], sizes = [32, 205], strides = [1, 1]} : vector<32x256xf32> to vector<32x205xf32>
    %103 = vector.extract_strided_slice %101 {offsets = [0, 0], sizes = [32, 1], strides = [1, 1]} : vector<32x16xf32> to vector<32x1xf32>
    %104 = vector.broadcast %103 : vector<32x1xf32> to vector<32x205xf32>
    %105 = arith.mulf %102, %104 : vector<32x205xf32>
    %106 = vector.extract_strided_slice %99 {offsets = [0, 1], sizes = [32, 205], strides = [1, 1]} : vector<32x256xf32> to vector<32x205xf32>
    %107 = vector.extract_strided_slice %101 {offsets = [0, 1], sizes = [32, 1], strides = [1, 1]} : vector<32x16xf32> to vector<32x1xf32>
    %108 = vector.broadcast %107 : vector<32x1xf32> to vector<32x205xf32>
    %109 = arith.mulf %106, %108 : vector<32x205xf32>
    %110 = arith.addf %105, %109 : vector<32x205xf32>
    %111 = vector.extract_strided_slice %99 {offsets = [0, 2], sizes = [32, 205], strides = [1, 1]} : vector<32x256xf32> to vector<32x205xf32>
    %112 = vector.extract_strided_slice %101 {offsets = [0, 2], sizes = [32, 1], strides = [1, 1]} : vector<32x16xf32> to vector<32x1xf32>
    %113 = vector.broadcast %112 : vector<32x1xf32> to vector<32x205xf32>
    %114 = arith.mulf %111, %113 : vector<32x205xf32>
    %115 = arith.addf %110, %114 : vector<32x205xf32>
    %116 = vector.extract_strided_slice %99 {offsets = [0, 3], sizes = [32, 205], strides = [1, 1]} : vector<32x256xf32> to vector<32x205xf32>
    %117 = vector.extract_strided_slice %101 {offsets = [0, 3], sizes = [32, 1], strides = [1, 1]} : vector<32x16xf32> to vector<32x1xf32>
    %118 = vector.broadcast %117 : vector<32x1xf32> to vector<32x205xf32>
    %119 = arith.mulf %116, %118 : vector<32x205xf32>
    %120 = arith.addf %115, %119 : vector<32x205xf32>
    %121 = vector.extract_strided_slice %99 {offsets = [0, 16], sizes = [32, 205], strides = [1, 1]} : vector<32x256xf32> to vector<32x205xf32>
    %122 = vector.extract_strided_slice %101 {offsets = [0, 4], sizes = [32, 1], strides = [1, 1]} : vector<32x16xf32> to vector<32x1xf32>
    %123 = vector.broadcast %122 : vector<32x1xf32> to vector<32x205xf32>
    %124 = arith.mulf %121, %123 : vector<32x205xf32>
    %125 = arith.addf %120, %124 : vector<32x205xf32>
    %126 = vector.extract_strided_slice %99 {offsets = [0, 17], sizes = [32, 205], strides = [1, 1]} : vector<32x256xf32> to vector<32x205xf32>
    %127 = vector.extract_strided_slice %101 {offsets = [0, 5], sizes = [32, 1], strides = [1, 1]} : vector<32x16xf32> to vector<32x1xf32>
    %128 = vector.broadcast %127 : vector<32x1xf32> to vector<32x205xf32>
    %129 = arith.mulf %126, %128 : vector<32x205xf32>
    %130 = arith.addf %125, %129 : vector<32x205xf32>
    %131 = vector.extract_strided_slice %99 {offsets = [0, 18], sizes = [32, 205], strides = [1, 1]} : vector<32x256xf32> to vector<32x205xf32>
    %132 = vector.extract_strided_slice %101 {offsets = [0, 6], sizes = [32, 1], strides = [1, 1]} : vector<32x16xf32> to vector<32x1xf32>
    %133 = vector.broadcast %132 : vector<32x1xf32> to vector<32x205xf32>
    %134 = arith.mulf %131, %133 : vector<32x205xf32>
    %135 = arith.addf %130, %134 : vector<32x205xf32>
    %136 = vector.extract_strided_slice %99 {offsets = [0, 19], sizes = [32, 205], strides = [1, 1]} : vector<32x256xf32> to vector<32x205xf32>
    %137 = vector.extract_strided_slice %101 {offsets = [0, 7], sizes = [32, 1], strides = [1, 1]} : vector<32x16xf32> to vector<32x1xf32>
    %138 = vector.broadcast %137 : vector<32x1xf32> to vector<32x205xf32>
    %139 = arith.mulf %136, %138 : vector<32x205xf32>
    %140 = arith.addf %135, %139 : vector<32x205xf32>
    %141 = vector.extract_strided_slice %99 {offsets = [0, 32], sizes = [32, 205], strides = [1, 1]} : vector<32x256xf32> to vector<32x205xf32>
    %142 = vector.extract_strided_slice %101 {offsets = [0, 8], sizes = [32, 1], strides = [1, 1]} : vector<32x16xf32> to vector<32x1xf32>
    %143 = vector.broadcast %142 : vector<32x1xf32> to vector<32x205xf32>
    %144 = arith.mulf %141, %143 : vector<32x205xf32>
    %145 = arith.addf %140, %144 : vector<32x205xf32>
    %146 = vector.extract_strided_slice %99 {offsets = [0, 33], sizes = [32, 205], strides = [1, 1]} : vector<32x256xf32> to vector<32x205xf32>
    %147 = vector.extract_strided_slice %101 {offsets = [0, 9], sizes = [32, 1], strides = [1, 1]} : vector<32x16xf32> to vector<32x1xf32>
    %148 = vector.broadcast %147 : vector<32x1xf32> to vector<32x205xf32>
    %149 = arith.mulf %146, %148 : vector<32x205xf32>
    %150 = arith.addf %145, %149 : vector<32x205xf32>
    %151 = vector.extract_strided_slice %99 {offsets = [0, 34], sizes = [32, 205], strides = [1, 1]} : vector<32x256xf32> to vector<32x205xf32>
    %152 = vector.extract_strided_slice %101 {offsets = [0, 10], sizes = [32, 1], strides = [1, 1]} : vector<32x16xf32> to vector<32x1xf32>
    %153 = vector.broadcast %152 : vector<32x1xf32> to vector<32x205xf32>
    %154 = arith.mulf %151, %153 : vector<32x205xf32>
    %155 = arith.addf %150, %154 : vector<32x205xf32>
    %156 = vector.extract_strided_slice %99 {offsets = [0, 35], sizes = [32, 205], strides = [1, 1]} : vector<32x256xf32> to vector<32x205xf32>
    %157 = vector.extract_strided_slice %101 {offsets = [0, 11], sizes = [32, 1], strides = [1, 1]} : vector<32x16xf32> to vector<32x1xf32>
    %158 = vector.broadcast %157 : vector<32x1xf32> to vector<32x205xf32>
    %159 = arith.mulf %156, %158 : vector<32x205xf32>
    %160 = arith.addf %155, %159 : vector<32x205xf32>
    %161 = vector.extract_strided_slice %99 {offsets = [0, 48], sizes = [32, 205], strides = [1, 1]} : vector<32x256xf32> to vector<32x205xf32>
    %162 = vector.extract_strided_slice %101 {offsets = [0, 12], sizes = [32, 1], strides = [1, 1]} : vector<32x16xf32> to vector<32x1xf32>
    %163 = vector.broadcast %162 : vector<32x1xf32> to vector<32x205xf32>
    %164 = arith.mulf %161, %163 : vector<32x205xf32>
    %165 = arith.addf %160, %164 : vector<32x205xf32>
    %166 = vector.extract_strided_slice %99 {offsets = [0, 49], sizes = [32, 205], strides = [1, 1]} : vector<32x256xf32> to vector<32x205xf32>
    %167 = vector.extract_strided_slice %101 {offsets = [0, 13], sizes = [32, 1], strides = [1, 1]} : vector<32x16xf32> to vector<32x1xf32>
    %168 = vector.broadcast %167 : vector<32x1xf32> to vector<32x205xf32>
    %169 = arith.mulf %166, %168 : vector<32x205xf32>
    %170 = arith.addf %165, %169 : vector<32x205xf32>
    %171 = vector.extract_strided_slice %99 {offsets = [0, 50], sizes = [32, 205], strides = [1, 1]} : vector<32x256xf32> to vector<32x205xf32>
    %172 = vector.extract_strided_slice %101 {offsets = [0, 14], sizes = [32, 1], strides = [1, 1]} : vector<32x16xf32> to vector<32x1xf32>
    %173 = vector.broadcast %172 : vector<32x1xf32> to vector<32x205xf32>
    %174 = arith.mulf %171, %173 : vector<32x205xf32>
    %175 = arith.addf %170, %174 : vector<32x205xf32>
    %176 = vector.extract_strided_slice %99 {offsets = [0, 51], sizes = [32, 205], strides = [1, 1]} : vector<32x256xf32> to vector<32x205xf32>
    %177 = vector.extract_strided_slice %101 {offsets = [0, 15], sizes = [32, 1], strides = [1, 1]} : vector<32x16xf32> to vector<32x1xf32>
    %178 = vector.broadcast %177 : vector<32x1xf32> to vector<32x205xf32>
    %179 = arith.mulf %176, %178 : vector<32x205xf32>
    %180 = arith.addf %175, %179 : vector<32x205xf32>
    %cst_22 = arith.constant dense<0.000000e+00> : vector<32x205xf32>
    %181 = tpu.matmul %0, %180, %cst_22 {dimension_numbers = #tpu.dot_dimension_numbers<[1], [0], [0], [1], [0, 0, 1, 1], [], []>} : vector<32x32xf32>, vector<32x205xf32>, vector<32x205xf32> -> vector<32x205xf32>
    %182 = vector.broadcast %1 : vector<32x1xf32> to vector<32x205xf32>
    %183 = arith.addf %181, %182 : vector<32x205xf32>
    %cst_23 = arith.constant 0.000000e+00 : f32
    %184 = vector.broadcast %cst_23 : f32 to vector<32x205xf32>
    %185 = arith.maximumf %183, %184 : vector<32x205xf32>
    %cst_24 = arith.constant dense<0.000000e+00> : vector<16x205xf32>
    %186 = tpu.matmul %2, %185, %cst_24 {dimension_numbers = #tpu.dot_dimension_numbers<[1], [0], [0], [1], [0, 0, 1, 1], [], []>} : vector<16x32xf32>, vector<32x205xf32>, vector<16x205xf32> -> vector<16x205xf32>
    %187 = vector.broadcast %3 : vector<16x1xf32> to vector<16x205xf32>
    %188 = arith.addf %186, %187 : vector<16x205xf32>
    %c1_25 = arith.constant 1 : index
    %c0_26 = arith.constant 0 : index
    %c0_27 = arith.constant 0 : index
    %189 = vector.load %arg5[%c1_25, %c0_26, %c0_27] : memref<2x16x205xf32, #tpu.memory_space<vmem>>, vector<1x16x205xf32>
    %190 = vector.shape_cast %189 : vector<1x16x205xf32> to vector<16x205xf32>
    %191 = vector.shape_cast %188 : vector<16x205xf32> to vector<1x16x205xf32>
    tpu.vector_store %arg5[%c1_25, %c0_26, %c0_27], %191 {strides = array<i32>} : memref<2x16x205xf32, #tpu.memory_space<vmem>>, vector<1x16x205xf32>,
    return
  }
  func.func @transform_0(%arg0: i32) -> (i32, i32, i32) {
    %c0_i32 = arith.constant 0 : i32
    %c0_i32_0 = arith.constant 0 : i32
    %c0_i32_1 = arith.constant 0 : i32
    return %arg0, %c0_i32, %c0_i32_0 : i32, i32, i32
  }
  func.func @transform_1(%arg0: i32) -> (i32, i32, i32) {
    %c0_i32 = arith.constant 0 : i32
    %c0_i32_0 = arith.constant 0 : i32
    %c0_i32_1 = arith.constant 0 : i32
    return %arg0, %c0_i32, %c0_i32_0 : i32, i32, i32
  }
  func.func @transform_2(%arg0: i32) -> (i32, i32) {
    %c0_i32 = arith.constant 0 : i32
    %c0_i32_0 = arith.constant 0 : i32
    %c0_i32_1 = arith.constant 0 : i32
    return %c0_i32, %c0_i32_0 : i32, i32
  }
  func.func @transform_3(%arg0: i32) -> (i32, i32) {
    %c0_i32 = arith.constant 0 : i32
    %c0_i32_0 = arith.constant 0 : i32
    %c0_i32_1 = arith.constant 0 : i32
    return %c0_i32, %c0_i32_0 : i32, i32
  }
  func.func @transform_4(%arg0: i32) -> (i32, i32, i32) {
    %c0_i32 = arith.constant 0 : i32
    %c0_i32_0 = arith.constant 0 : i32
    %c0_i32_1 = arith.constant 0 : i32
    return %arg0, %c0_i32, %c0_i32_0 : i32, i32, i32
  }
}

</mosaic_0001>

<bundles_post_ra>
// kernel: mask_forward.1
= control target key start
LH: loop header
LB: loop body
LE: loop exit
PB: predicated region body
PF: predicated region fallthrough
CT: control target
= control target key end

     0   :  { %v4888_v0 = vmov 0   ;;  %v4910_v5 = vmov 1   ;;  %v4913_v6 = vmov 2   ;;  %v4911_v7 = vmov 3   ;;  %s2764_s5 = smov 127   ;;  %s2765_s14 = smov 126   ;;  %s4879_s1 = inlined_call_operand.vmem [shape: f32[2,32,16], index: 1, kind: input, shape index: {}]   ;;  %s4880_s0 = inlined_call_operand.vmem [shape: f32[2,32,256], index: 0, kind: input, shape index: {}]   ;;  %s4881_s2 = inlined_call_operand.vmem [shape: f32[32,33], index: 2, kind: input, shape index: {}]   ;;  %s4882_s3 = inlined_call_operand.vmem [shape: f32[16,33], index: 3, kind: input, shape index: {}]   ;;  %s4883_s4 = inlined_call_operand.vmem [shape: f32[2,16,205], index: 4, kind: output, shape index: {}]  }
   0x1   :  { %2658 = vset.pattern.permute.xlu1 %v4888_v0  ;;  %2657 = vset.pattern.permute.xlu0 %v4888_v0  ;;  %v2819_v1 = vld [vmem:[%s4879_s1 + $0x10] sm:$0xff]  ;;  %v2824_v2 = vld [vmem:[%s4879_s1] sm:$0xff]  ;;  %v2831_v3 = vld [vmem:[%s4879_s1 + $0x18] sm:$0xff]  ;;  %v4904_v8 = vmov 4   ;;  %v4908_v9 = vmov 5   ;;  %v4906_v10 = vmov 6  }
   0x2   :  { %47 = vperm.xlu1 %2658, %v2819_v1   ;;  %37 = vperm.xlu0 %2657, %v2824_v2   ;;  %v2836_v4 = vld [vmem:[%s4879_s1 + $0x8] sm:$0xff]  ;;  %v4894_v11 = vmov 7   ;;  %v2889_v16 = vld [vmem:[%s4880_s0] sm:$0xff]  ;;  %v2901_v22 = vld [vmem:[%s4880_s0 + $0x10] sm:$0xff]  ;;  %s2766_s15 = smov 125   ;;  %s2767_s16 = smov 112  }
   0x3   :  { %v2894_v17 = vld [vmem:[%s4880_s0 + $0x8] sm:$0xff]  ;;  %v2906_v23 = vld [vmem:[%s4880_s0 + $0x18] sm:$0xff]  ;;  %v2917_v27 = vld [vmem:[%s4880_s0 + $0x20] sm:$0xff]  ;;  %s2768_s17 = smov 111   ;;  %s2777_s18 = smov 110   ;;  %vm111_vm0 = vcmask 1039360  }
   0x4   :  { %v2922_v28 = vld [vmem:[%s4880_s0 + $0x28] sm:$0xff]  ;;  %v2931_v32 = vld [vmem:[%s4880_s0 + $0x30] sm:$0xff]  ;;  %v2936_v33 = vld [vmem:[%s4880_s0 + $0x38] sm:$0xff]  ;;  %s2778_s19 = smov 109   ;;  %s2779_s20 = smov 96   ;;  %vm180_vm1 = vcmask 1031168  }
   0x5   :  { %s2780_s21 = smov 95   ;;  %s2781_s22 = smov 94   ;;  %vm249_vm2 = vcmask 1022976   ;;  %vm318_vm3 = vcmask 916480   ;;  %vm387_vm4 = vcmask 908288   ;;  %vm456_vm5 = vcmask 900096  }
   0x6   :  { %52 = vperm.xlu1 %2658, %v2831_v3   ;;  %42 = vperm.xlu0 %2657, %v2836_v4   ;;  %s2782_s23 = smov 93   ;;  %s2783_s24 = smov 80   ;;  %vm525_vm6 = vcmask 891904   ;;  %vm594_vm7 = vcmask 785408   ;;  %vm663_vm8 = vcmask 777216   ;;  %vm732_vm9 = vcmask 769024  }
   0x7   :  { %s2784_s25 = smov 79   ;;  %s2785_s26 = smov 78   ;;  %vm801_vm10 = vcmask 760832   ;;  %vm870_vm11 = vcmask 654336   ;;  %vm939_vm12 = vcmask 646144   ;;  %vm1008_vm13 = vcmask 637952  }
   0x8   :  { %s2786_s27 = smov 77   ;;  %vm1077_vm14 = vcmask 629760   ;;  %vm1118_vm15 = vcmask 261120  }
   0xa   :  { %2660 = vset.pattern.permute.xlu1 %v4910_v5  ;;  %2659 = vset.pattern.permute.xlu0 %v4910_v5 }
   0xb   :  { %68 = vperm.xlu1 %2660, %v2836_v4   ;;  %64 = vperm.xlu0 %2659, %v2824_v2  }
   0xf   :  { %72 = vperm.xlu1 %2660, %v2819_v1   ;;  %76 = vperm.xlu0 %2659, %v2831_v3  }
  0x13   :  { %2661 = vset.pattern.permute.xlu1 %v4913_v6  ;;  %2662 = vset.pattern.permute.xlu0 %v4913_v6 }
  0x14   :  { %133 = vperm.xlu1 %2661, %v2824_v2   ;;  %137 = vperm.xlu0 %2662, %v2836_v4  }
  0x18   :  { %141 = vperm.xlu1 %2661, %v2819_v1   ;;  %2663 = vset.pattern.permute.xlu0 %v4911_v7 }
  0x19   :  { %202 = vperm.xlu0 %2663, %v2824_v2  }
  0x1c   :  { %145 = vperm.xlu1 %2661, %v2831_v3  }
  0x1d   :  { %214 = vperm.xlu0 %2663, %v2831_v3  }
  0x20   :  { %2664 = vset.pattern.permute.xlu1 %v4911_v7 }
  0x21   :  { %206 = vperm.xlu1 %2664, %v2836_v4   ;;  %2666 = vset.pattern.permute.xlu0 %v4904_v8 }
  0x22   :  { %275 = vperm.xlu0 %2666, %v2836_v4  }
  0x25   :  { %210 = vperm.xlu1 %2664, %v2819_v1  }
  0x26   :  { %2667 = vset.pattern.permute.xlu0 %v4908_v9 }
  0x27   :  { %340 = vperm.xlu0 %2667, %v2824_v2  }
  0x29   :  { %2665 = vset.pattern.permute.xlu1 %v4904_v8 }
  0x2a   :  { %271 = vperm.xlu1 %2665, %v2824_v2  }
  0x2b   :  { %352 = vperm.xlu0 %2667, %v2831_v3  }
  0x2e   :  { %279 = vperm.xlu1 %2665, %v2819_v1  }
  0x2f   :  { %2670 = vset.pattern.permute.xlu0 %v4906_v10 }
  0x30   :  { %413 = vperm.xlu0 %2670, %v2836_v4  }
  0x32   :  { %283 = vperm.xlu1 %2665, %v2831_v3  }
  0x36   :  { %2668 = vset.pattern.permute.xlu1 %v4908_v9 }
  0x37   :  { %344 = vperm.xlu1 %2668, %v2836_v4  }
  0x3b   :  { %348 = vperm.xlu1 %2668, %v2819_v1  }
  0x3f   :  { %2669 = vset.pattern.permute.xlu1 %v4906_v10 }
  0x40   :  { %409 = vperm.xlu1 %2669, %v2824_v2  }
  0x44   :  { %2671 = vset.pattern.permute.xlu1 %v4894_v11 }
  0x45   :  { %478 = vperm.xlu1 %2671, %v2824_v2  }
  0x49   :  { %482 = vperm.xlu1 %2671, %v2836_v4  }
  0x4d   :  { %2672 = vset.pattern.permute.xlu1 %v4906_v10 }
  0x81   :  { %v2878_v12 = vpop.permute.xlu1 %47  ;;  %v2880_v13 = vpop.permute.xlu0 %37 }
  0x85   :  { %v2882_v14 = vpop.permute.xlu1 %52  ;;  %v2884_v15 = vpop.permute.xlu0 %42 }
  0x8a   :  { %v69_v18 = vpop.permute.xlu1 %68  ;;  %v65_v19 = vpop.permute.xlu0 %64 }
  0x8b   :  { %v79_v20 = vmul.f32 %v65_v19, %v2889_v16  ;;  %v80_v21 = vmul.f32 %v65_v19, %v2894_v17  ;;  %v81_v24 = vmul.f32 %v69_v18, %v2901_v22  ;;  %v82_v25 = vmul.f32 %v69_v18, %v2906_v23 }
  0x8d   :  { %97 = vrot.lane.b32.xlu0 %v80_v21, %s2764_s5  ;;  %95 = vrot.lane.b32.xlu1 %v79_v20, %s2764_s5 }
  0x8e   :  { %v73_v26 = vpop.permute.xlu1 %72  ;;  %v77_v31 = vpop.permute.xlu0 %76 }
  0x8f   :  { %v83_v29 = vmul.f32 %v73_v26, %v2917_v27  ;;  %v84_v30 = vmul.f32 %v73_v26, %v2922_v28  ;;  %v85_v34 = vmul.f32 %v77_v31, %v2931_v32  ;;  %v86_v35 = vmul.f32 %v77_v31, %v2936_v33 }
  0x91   :  { %101 = vrot.lane.b32.xlu0 %v82_v25, %s2764_s5  ;;  %99 = vrot.lane.b32.xlu1 %v81_v24, %s2764_s5 }
  0x93   :  { %v134_v36 = vpop.permute.xlu1 %133  ;;  %v138_v39 = vpop.permute.xlu0 %137 }
  0x94   :  { %v148_v37 = vmul.f32 %v134_v36, %v2889_v16  ;;  %v149_v38 = vmul.f32 %v134_v36, %v2894_v17  ;;  %v150_v40 = vmul.f32 %v138_v39, %v2901_v22  ;;  %v151_v41 = vmul.f32 %v138_v39, %v2906_v23 }
  0x95   :  { %105 = vrot.lane.b32.xlu0 %v84_v30, %s2764_s5  ;;  %103 = vrot.lane.b32.xlu1 %v83_v29, %s2764_s5  ;;  %v4900_v36 = vmov 9  }
  0x97   :  { %v142_v42 = vpop.permute.xlu1 %141 }
  0x98   :  { %v152_v43 = vmul.f32 %v142_v42, %v2917_v27  ;;  %v153_v44 = vmul.f32 %v142_v42, %v2922_v28  ;;  %v203_v48 = vpop.permute.xlu0 %202 }
  0x99   :  { %109 = vrot.lane.b32.xlu0 %v86_v35, %s2764_s5  ;;  %107 = vrot.lane.b32.xlu1 %v85_v34, %s2764_s5  ;;  %v217_v49 = vmul.f32 %v203_v48, %v2889_v16  ;;  %v218_v50 = vmul.f32 %v203_v48, %v2894_v17  ;;  %v4902_v35 = vmov 8  }
  0x9b   :  { %v146_v45 = vpop.permute.xlu1 %145 }
  0x9c   :  { %v154_v46 = vmul.f32 %v146_v45, %v2931_v32  ;;  %v155_v47 = vmul.f32 %v146_v45, %v2936_v33  ;;  %v215_v57 = vpop.permute.xlu0 %214 }
  0x9d   :  { %164 = vrot.lane.b32.xlu0 %v148_v37, %s2765_s14  ;;  %166 = vrot.lane.b32.xlu1 %v149_v38, %s2765_s14  ;;  %v223_v58 = vmul.f32 %v215_v57, %v2931_v32  ;;  %v224_v59 = vmul.f32 %v215_v57, %v2936_v33  ;;  %v4884_v38 = vmov 10  }
  0xa0   :  { %v207_v51 = vpop.permute.xlu1 %206 }
  0xa1   :  { %168 = vrot.lane.b32.xlu0 %v150_v40, %s2765_s14  ;;  %170 = vrot.lane.b32.xlu1 %v151_v41, %s2765_s14  ;;  %v219_v52 = vmul.f32 %v207_v51, %v2901_v22  ;;  %v220_v53 = vmul.f32 %v207_v51, %v2906_v23  ;;  %v276_v63 = vpop.permute.xlu0 %275  ;;  %v4898_v40 = vmov 11  }
  0xa2   :  { %v288_v18 = vmul.f32 %v276_v63, %v2901_v22  ;;  %v289_v19 = vmul.f32 %v276_v63, %v2906_v23 }
  0xa4   :  { %v211_v54 = vpop.permute.xlu1 %210 }
  0xa5   :  { %172 = vrot.lane.b32.xlu0 %v152_v43, %s2765_s14  ;;  %174 = vrot.lane.b32.xlu1 %v153_v44, %s2765_s14  ;;  %v221_v55 = vmul.f32 %v211_v54, %v2917_v27  ;;  %v222_v56 = vmul.f32 %v211_v54, %v2922_v28  ;;  %v4886_v44 = vmov 13   ;;  %v4892_v54 = vmov 15  }
  0xa6   :  { %v341_v30 = vpop.permute.xlu0 %340 }
  0xa7   :  { %v355_v31 = vmul.f32 %v341_v30, %v2889_v16  ;;  %v356_v34 = vmul.f32 %v341_v30, %v2894_v17 }
  0xa9   :  { %176 = vrot.lane.b32.xlu0 %v154_v46, %s2765_s14  ;;  %178 = vrot.lane.b32.xlu1 %v155_v47, %s2765_s14  ;;  %v272_v60 = vpop.permute.xlu1 %271  ;;  %v4890_v47 = vmov 14  }
  0xaa   :  { %v286_v61 = vmul.f32 %v272_v60, %v2889_v16  ;;  %v287_v62 = vmul.f32 %v272_v60, %v2894_v17  ;;  %v3028_v43 = vpop.permute.xlu0 %352 }
  0xad   :  { %235 = vrot.lane.b32.xlu0 %v218_v50, %s2766_s15  ;;  %233 = vrot.lane.b32.xlu1 %v217_v49, %s2766_s15  ;;  %v280_v20 = vpop.permute.xlu1 %279 }
  0xae   :  { %v290_v21 = vmul.f32 %v280_v20, %v2917_v27  ;;  %v291_v24 = vmul.f32 %v280_v20, %v2922_v28 }
  0xaf   :  { %v3035_v46 = vpop.permute.xlu0 %413 }
  0xb1   :  { %239 = vrot.lane.b32.xlu0 %v220_v53, %s2766_s15  ;;  %237 = vrot.lane.b32.xlu1 %v219_v52, %s2766_s15  ;;  %v284_v25 = vpop.permute.xlu1 %283  ;;  %v4896_v52 = vmov 12  }
  0xb2   :  { %v292_v26 = vmul.f32 %v284_v25, %v2931_v32  ;;  %v293_v29 = vmul.f32 %v284_v25, %v2936_v33 }
  0xb5   :  { %243 = vrot.lane.b32.xlu0 %v222_v56, %s2766_s15  ;;  %241 = vrot.lane.b32.xlu1 %v221_v55, %s2766_s15 }
  0xb6   :  { %v3007_v37 = vpop.permute.xlu1 %344 }
  0xb9   :  { %247 = vrot.lane.b32.xlu0 %v224_v59, %s2766_s15  ;;  %245 = vrot.lane.b32.xlu1 %v223_v58, %s2766_s15  ;;  %v426_v59 = vmul.f32 %v3035_v46, %v2901_v22 }
  0xba   :  { %v3012_v39 = vpop.permute.xlu1 %348 }
  0xbd   :  { %302 = vrot.lane.b32.xlu0 %v286_v61, %s2767_s16  ;;  %304 = vrot.lane.b32.xlu1 %v287_v62, %s2767_s16  ;;  %v359_v62 = vmul.f32 %v3012_v39, %v2917_v27 }
  0xbf   :  { %v3020_v41 = vpop.permute.xlu1 %409 }
  0xc0   :  { %v424_v56 = vmul.f32 %v3020_v41, %v2889_v16 }
  0xc1   :  { %306 = vrot.lane.b32.xlu0 %v288_v18, %s2767_s16  ;;  %308 = vrot.lane.b32.xlu1 %v289_v19, %s2767_s16  ;;  %v361_v19 = vmul.f32 %v3028_v43, %v2931_v32 }
  0xc4   :  { %v3026_v42 = vpop.permute.xlu1 %478 }
  0xc5   :  { %310 = vrot.lane.b32.xlu0 %v290_v21, %s2767_s16  ;;  %312 = vrot.lane.b32.xlu1 %v291_v24, %s2767_s16  ;;  %v493_v24 = vmul.f32 %v3026_v42, %v2889_v16 }
  0xc8   :  { %v3033_v45 = vpop.permute.xlu1 %482 }
  0xc9   :  { %314 = vrot.lane.b32.xlu0 %v292_v26, %s2767_s16  ;;  %316 = vrot.lane.b32.xlu1 %v293_v29, %s2767_s16  ;;  %v495_v29 = vmul.f32 %v3033_v45, %v2901_v22 }
  0xcd   :  { %373 = vrot.lane.b32.xlu0 %v356_v34, %s2768_s17  ;;  %371 = vrot.lane.b32.xlu1 %v355_v31, %s2768_s17 }
  0xd1   :  { %417 = vperm.xlu0 %2670, %v2819_v1   ;;  %421 = vperm.xlu1 %2672, %v2831_v3  }
  0xd5   :  { %2675 = vset.pattern.permute.xlu0 %v4894_v11  ;;  %2673 = vset.pattern.permute.xlu1 %v4902_v35 }
  0xd6   :  { %490 = vperm.xlu0 %2675, %v2831_v3   ;;  %551 = vperm.xlu1 %2673, %v2836_v4  }
  0xda   :  { %2676 = vset.pattern.permute.xlu0 %v4902_v35  ;;  %2674 = vset.pattern.permute.xlu1 %v4894_v11 }
  0xdb   :  { %547 = vperm.xlu0 %2676, %v2824_v2   ;;  %486 = vperm.xlu1 %2674, %v2819_v1  }
  0xdf   :  { %555 = vperm.xlu0 %2676, %v2819_v1   ;;  %2677 = vset.pattern.permute.xlu1 %v4900_v36 }
  0xe0   :  { %616 = vperm.xlu1 %2677, %v2824_v2  }
  0xe3   :  { %2680 = vset.pattern.permute.xlu0 %v4884_v38 }
  0xe4   :  { %689 = vperm.xlu0 %2680, %v2836_v4   ;;  %620 = vperm.xlu1 %2677, %v2836_v4  }
  0xe8   :  { %697 = vperm.xlu0 %2680, %v2831_v3   ;;  %2678 = vset.pattern.permute.xlu1 %v4902_v35 }
  0xe9   :  { %559 = vperm.xlu1 %2678, %v2831_v3  }
  0xec   :  { %2684 = vset.pattern.permute.xlu0 %v4898_v40 }
  0xed   :  { %754 = vperm.xlu0 %2684, %v2824_v2   ;;  %2679 = vset.pattern.permute.xlu1 %v4884_v38 }
  0xee   :  { %685 = vperm.xlu1 %2679, %v2824_v2  }
  0xf1   :  { %762 = vperm.xlu0 %2684, %v2819_v1  }
  0xf2   :  { %2681 = vset.pattern.permute.xlu1 %v4900_v36 }
  0xf3   :  { %624 = vperm.xlu1 %2681, %v2819_v1  }
  0xf5   :  { %2688 = vset.pattern.permute.xlu0 %v4886_v44 }
  0xf6   :  { %896 = vperm.xlu0 %2688, %v2836_v4  }
  0xf7   :  { %628 = vperm.xlu1 %2681, %v2831_v3  }
  0xfa   :  { %904 = vperm.xlu0 %2688, %v2831_v3  }
  0xfb   :  { %2682 = vset.pattern.permute.xlu1 %v4898_v40 }
  0xfc   :  { %758 = vperm.xlu1 %2682, %v2836_v4  }
  0xfe   :  { %2692 = vset.pattern.permute.xlu0 %v4890_v47 }
  0xff   :  { %v3041_v48 = vpop.permute.xlu0 %97  ;;  %961 = vperm.xlu0 %2692, %v2824_v2   ;;  %v3044_v49 = vpop.permute.xlu1 %95 }
 0x100   :  { %2683 = vset.pattern.permute.xlu1 %v4884_v38 }
 0x101   :  { %693 = vperm.xlu1 %2683, %v2819_v1  }
 0x103   :  { %v3048_v50 = vpop.permute.xlu0 %101  ;;  %969 = vperm.xlu0 %2692, %v2819_v1   ;;  %v3051_v51 = vpop.permute.xlu1 %99 }
 0x105   :  { %2685 = vset.pattern.permute.xlu1 %v4896_v52 }
 0x106   :  { %823 = vperm.xlu1 %2685, %v2824_v2  }
 0x107   :  { %v3055_v53 = vpop.permute.xlu0 %105  ;;  %2696 = vset.pattern.permute.xlu0 %v4892_v54  ;;  %v3058_v55 = vpop.permute.xlu1 %103 }
 0x108   :  { %1042 = vperm.xlu0 %2696, %v2831_v3  }
 0x10a   :  { %827 = vperm.xlu1 %2685, %v2836_v4  }
 0x10b   :  { %v3064_v57 = vpop.permute.xlu0 %109  ;;  %v3066_v58 = vpop.permute.xlu1 %107 }
 0x10c   :  { %440 = vrot.lane.b32.xlu0 %v424_v56, %s2777_s18 }
 0x10d   :  { %2697 = vset.pattern.permute.xlu0 %v4910_v5 }
 0x10e   :  { %2686 = vset.pattern.permute.xlu1 %v4898_v40 }
 0x10f   :  { %v3073_v60 = vpop.permute.xlu0 %164  ;;  %766 = vperm.xlu1 %2686, %v2831_v3   ;;  %v3076_v61 = vpop.permute.xlu1 %166 }
 0x110   :  { %444 = vrot.lane.b32.xlu0 %v426_v59, %s2777_s18 }
 0x113   :  { %v3081_v63 = vpop.permute.xlu0 %168  ;;  %2687 = vset.pattern.permute.xlu1 %v4886_v44  ;;  %v3084_v18 = vpop.permute.xlu1 %170 }
 0x114   :  { %379 = vrot.lane.b32.xlu0 %v359_v62, %s2768_s17  ;;  %892 = vperm.xlu1 %2687, %v2824_v2  }
 0x117   :  { %v3090_v20 = vpop.permute.xlu0 %172  ;;  %v3092_v21 = vpop.permute.xlu1 %174 }
 0x118   :  { %383 = vrot.lane.b32.xlu0 %v361_v19, %s2768_s17  ;;  %2689 = vset.pattern.permute.xlu1 %v4896_v52 }
 0x119   :  { %831 = vperm.xlu1 %2689, %v2819_v1  }
 0x11b   :  { %v3099_v25 = vpop.permute.xlu0 %176  ;;  %v3101_v26 = vpop.permute.xlu1 %178 }
 0x11c   :  { %509 = vrot.lane.b32.xlu0 %v493_v24, %s2778_s19 }
 0x11d   :  { %835 = vperm.xlu1 %2689, %v2831_v3  }
 0x11f   :  { %v3107_v30 = vpop.permute.xlu0 %235  ;;  %v3109_v31 = vpop.permute.xlu1 %233 }
 0x120   :  { %513 = vrot.lane.b32.xlu0 %v495_v29, %s2778_s19 }
 0x121   :  { %2690 = vset.pattern.permute.xlu1 %v4890_v47 }
 0x122   :  { %965 = vperm.xlu1 %2690, %v2836_v4  }
 0x123   :  { %v3114_v34 = vpop.permute.xlu0 %239  ;;  %v3116_v56 = vpop.permute.xlu1 %237 }
 0x126   :  { %2691 = vset.pattern.permute.xlu1 %v4886_v44 }
 0x127   :  { %900 = vperm.xlu1 %2691, %v2819_v1   ;;  %v3120_v59 = vpop.permute.xlu0 %243  ;;  %v3122_v62 = vpop.permute.xlu1 %241 }
 0x12b   :  { %2693 = vset.pattern.permute.xlu1 %v4892_v54  ;;  %v3126_v19 = vpop.permute.xlu0 %247  ;;  %v3128_v24 = vpop.permute.xlu1 %245 }
 0x12c   :  { %1030 = vperm.xlu1 %2693, %v2824_v2   ;;  %v357_v2 = vmul.f32 %v3007_v37, %v2901_v22 }
 0x12f   :  { %v3131_v29 = vpop.permute.xlu0 %302  ;;  %v3133_v38 = vpop.permute.xlu1 %304 }
 0x130   :  { %1034 = vperm.xlu1 %2693, %v2836_v4   ;;  %v358_v4 = vmul.f32 %v3007_v37, %v2906_v23  ;;  %v360_v37 = vmul.f32 %v3012_v39, %v2922_v28  ;;  %v494_v39 = vmul.f32 %v3026_v42, %v2894_v17 }
 0x133   :  { %v3138_v44 = vpop.permute.xlu0 %306  ;;  %v3140_v0 = vpop.permute.xlu1 %308 }
 0x134   :  { %2694 = vset.pattern.permute.xlu1 %v4890_v47 }
 0x135   :  { %973 = vperm.xlu1 %2694, %v2831_v3  }
 0x137   :  { %v3149_v47 = vpop.permute.xlu0 %310  ;;  %v3151_v3 = vpop.permute.xlu1 %312 }
 0x139   :  { %2695 = vset.pattern.permute.xlu1 %v4892_v54  ;;  %v425_v54 = vmul.f32 %v3020_v41, %v2894_v17  ;;  %v362_v41 = vmul.f32 %v3028_v43, %v2936_v33  ;;  %v496_v43 = vmul.f32 %v3033_v45, %v2906_v23 }
 0x13a   :  { %1038 = vperm.xlu1 %2695, %v2819_v1  }
 0x13b   :  { %v3156_v1 = vpop.permute.xlu0 %314  ;;  %v3158_v11 = vpop.permute.xlu1 %316 }
 0x13c   :  { %4964 = vst [vmem:[#allocation2_spill] sm:$0xff] %v3156_v1  ;;  %4965 = vst [vmem:[#allocation3_spill] sm:$0xff] %v3158_v11 }
 0x13e   :  { %375 = vrot.lane.b32.xlu1 %v357_v2, %s2768_s17  ;;  %v427_v2 = vmul.f32 %v3035_v46, %v2906_v23 }
 0x13f   :  { %2698 = vset.pattern.permute.xlu1 %v4910_v5  ;;  %v3166_v52 = vpop.permute.xlu0 %373 }
 0x140   :  { %4966 = vst [vmem:[#allocation4_spill] sm:$0xff] %v3166_v52 }
 0x142   :  { %377 = vrot.lane.b32.xlu1 %v358_v4, %s2768_s17  ;;  %v3168_v4 = vpop.permute.xlu1 %371 }
 0x143   :  { %4967 = vst [vmem:[#allocation5_spill] sm:$0xff] %v3168_v4 }
 0x146   :  { %442 = vrot.lane.b32.xlu1 %v425_v54, %s2777_s18 }
 0x14a   :  { %446 = vrot.lane.b32.xlu1 %v427_v2, %s2777_s18 }
 0x14e   :  { %381 = vrot.lane.b32.xlu1 %v360_v37, %s2768_s17 }
 0x150   :  { %v418_v40 = vpop.permute.xlu0 %417  ;;  %v422_v36 = vpop.permute.xlu1 %421 }
 0x151   :  { %v428_v54 = vmul.f32 %v418_v40, %v2917_v27  ;;  %v430_v46 = vmul.f32 %v422_v36, %v2931_v32  ;;  %v429_v8 = vmul.f32 %v418_v40, %v2922_v28 }
 0x152   :  { %385 = vrot.lane.b32.xlu1 %v362_v41, %s2768_s17 }
 0x153   :  { %448 = vrot.lane.b32.xlu0 %v428_v54, %s2777_s18 }
 0x155   :  { %v552_v2 = vpop.permute.xlu1 %551  ;;  %v491_v35 = vpop.permute.xlu0 %490 }
 0x156   :  { %511 = vrot.lane.b32.xlu1 %v494_v39, %s2778_s19  ;;  %v564_v42 = vmul.f32 %v552_v2, %v2901_v22 }
 0x157   :  { %452 = vrot.lane.b32.xlu0 %v430_v46, %s2777_s18  ;;  %v431_v46 = vmul.f32 %v422_v36, %v2936_v33 }
 0x15a   :  { %v548_v37 = vpop.permute.xlu0 %547  ;;  %515 = vrot.lane.b32.xlu1 %v496_v43, %s2778_s19  ;;  %v487_v41 = vpop.permute.xlu1 %486 }
 0x15b   :  { %v562_v54 = vmul.f32 %v548_v37, %v2889_v16  ;;  %v563_v45 = vmul.f32 %v548_v37, %v2894_v17  ;;  %v497_v43 = vmul.f32 %v487_v41, %v2917_v27  ;;  %v498_v37 = vmul.f32 %v487_v41, %v2922_v28 }
 0x15d   :  { %578 = vrot.lane.b32.xlu0 %v562_v54, %s2779_s20  ;;  %v565_v54 = vmul.f32 %v552_v2, %v2906_v23  ;;  %v500_v2 = vmul.f32 %v491_v35, %v2936_v33 }
 0x15e   :  { %450 = vrot.lane.b32.xlu1 %v429_v8, %s2777_s18  ;;  %v499_v8 = vmul.f32 %v491_v35, %v2931_v32  ;;  %v556_v40 = vpop.permute.xlu0 %555 }
 0x15f   :  { %v617_v39 = vpop.permute.xlu1 %616  ;;  %v567_v7 = vmul.f32 %v556_v40, %v2922_v28 }
 0x160   :  { %v631_v36 = vmul.f32 %v617_v39, %v2889_v16  ;;  %v632_v41 = vmul.f32 %v617_v39, %v2894_v17 }
 0x161   :  { %582 = vrot.lane.b32.xlu0 %v564_v42, %s2779_s20 }
 0x162   :  { %454 = vrot.lane.b32.xlu1 %v431_v46, %s2777_s18 }
 0x163   :  { %v621_v10 = vpop.permute.xlu1 %620  ;;  %v690_v42 = vpop.permute.xlu0 %689 }
 0x164   :  { %v634_v35 = vmul.f32 %v621_v10, %v2906_v23  ;;  %v702_v39 = vmul.f32 %v690_v42, %v2901_v22 }
 0x165   :  { %517 = vrot.lane.b32.xlu0 %v497_v43, %s2778_s19 }
 0x166   :  { %580 = vrot.lane.b32.xlu1 %v563_v45, %s2779_s20  ;;  %v633_v45 = vmul.f32 %v621_v10, %v2901_v22 }
 0x168   :  { %v560_v9 = vpop.permute.xlu1 %559 }
 0x169   :  { %521 = vrot.lane.b32.xlu0 %v499_v8, %s2778_s19  ;;  %v566_v8 = vmul.f32 %v556_v40, %v2917_v27  ;;  %v569_v10 = vmul.f32 %v560_v9, %v2936_v33 }
 0x16a   :  { %584 = vrot.lane.b32.xlu1 %v565_v54, %s2779_s20  ;;  %v3209_v54 = vpop.permute.xlu0 %697 }
 0x16d   :  { %647 = vrot.lane.b32.xlu0 %v631_v36, %s2780_s21  ;;  %v686_v46 = vpop.permute.xlu1 %685 }
 0x16e   :  { %519 = vrot.lane.b32.xlu1 %v498_v37, %s2778_s19  ;;  %v568_v37 = vmul.f32 %v560_v9, %v2931_v32  ;;  %v755_v5 = vpop.permute.xlu0 %754  ;;  %v701_v40 = vmul.f32 %v686_v46, %v2894_v17 }
 0x16f   :  { %v769_v6 = vmul.f32 %v755_v5, %v2889_v16 }
 0x171   :  { %651 = vrot.lane.b32.xlu0 %v633_v45, %s2780_s21  ;;  %v700_v45 = vmul.f32 %v686_v46, %v2889_v16 }
 0x172   :  { %523 = vrot.lane.b32.xlu1 %v500_v2, %s2778_s19  ;;  %v625_v43 = vpop.permute.xlu1 %624 }
 0x173   :  { %v636_v46 = vmul.f32 %v625_v43, %v2922_v28 }
 0x175   :  { %586 = vrot.lane.b32.xlu0 %v566_v8, %s2779_s20  ;;  %v3223_v8 = vpop.permute.xlu0 %762 }
 0x176   :  { %649 = vrot.lane.b32.xlu1 %v632_v41, %s2780_s21  ;;  %v629_v36 = vpop.permute.xlu1 %628 }
 0x177   :  { %v637_v9 = vmul.f32 %v629_v36, %v2931_v32 }
 0x179   :  { %590 = vrot.lane.b32.xlu0 %v568_v37, %s2779_s20  ;;  %v635_v37 = vmul.f32 %v625_v43, %v2917_v27 }
 0x17a   :  { %653 = vrot.lane.b32.xlu1 %v634_v35, %s2780_s21  ;;  %v3230_v35 = vpop.permute.xlu0 %896 }
 0x17b   :  { %v759_v2 = vpop.permute.xlu1 %758 }
 0x17d   :  { %716 = vrot.lane.b32.xlu0 %v700_v45, %s2781_s22 }
 0x17e   :  { %588 = vrot.lane.b32.xlu1 %v567_v7, %s2779_s20  ;;  %v703_v7 = vmul.f32 %v690_v42, %v2906_v23 }
 0x180   :  { %v694_v41 = vpop.permute.xlu1 %693 }
 0x181   :  { %720 = vrot.lane.b32.xlu0 %v702_v39, %s2781_s22  ;;  %v704_v43 = vmul.f32 %v694_v41, %v2917_v27 }
 0x182   :  { %592 = vrot.lane.b32.xlu1 %v569_v10, %s2779_s20  ;;  %v3239_v10 = vpop.permute.xlu0 %904 }
 0x185   :  { %655 = vrot.lane.b32.xlu0 %v635_v37, %s2780_s21  ;;  %v824_v45 = vpop.permute.xlu1 %823  ;;  %v771_v37 = vmul.f32 %v759_v2, %v2901_v22 }
 0x186   :  { %718 = vrot.lane.b32.xlu1 %v701_v40, %s2781_s22  ;;  %v638_v40 = vmul.f32 %v629_v36, %v2936_v33  ;;  %v3246_v4 = vpop.permute.xlu0 %961  ;;  %v772_v36 = vmul.f32 %v759_v2, %v2906_v23  ;;  %v707_v2 = vmul.f32 %v3209_v54, %v2936_v33  ;;  %v839_v1 = vmul.f32 %v824_v45, %v2894_v17 }
 0x189   :  { %659 = vrot.lane.b32.xlu0 %v637_v9, %s2780_s21  ;;  %v828_v39 = vpop.permute.xlu1 %827 }
 0x18a   :  { %722 = vrot.lane.b32.xlu1 %v703_v7, %s2781_s22  ;;  %v770_v7 = vmul.f32 %v755_v5, %v2894_v17  ;;  %v838_v5 = vmul.f32 %v824_v45, %v2889_v16  ;;  %v774_v45 = vmul.f32 %v3223_v8, %v2922_v28 }
 0x18d   :  { %785 = vrot.lane.b32.xlu0 %v769_v6, %s2782_s23  ;;  %v706_v6 = vmul.f32 %v3209_v54, %v2931_v32  ;;  %v841_v54 = vmul.f32 %v828_v39, %v2906_v23 }
 0x18e   :  { %657 = vrot.lane.b32.xlu1 %v636_v46, %s2780_s21  ;;  %v767_v42 = vpop.permute.xlu1 %766  ;;  %v3256_v46 = vpop.permute.xlu0 %969 }
 0x191   :  { %789 = vrot.lane.b32.xlu0 %v771_v37, %s2782_s23  ;;  %v705_v37 = vmul.f32 %v694_v41, %v2922_v28  ;;  %v773_v41 = vmul.f32 %v3223_v8, %v2917_v27 }
 0x192   :  { %661 = vrot.lane.b32.xlu1 %v638_v40, %s2780_s21 }
 0x193   :  { %v893_v9 = vpop.permute.xlu1 %892 }
 0x194   :  { %v908_v8 = vmul.f32 %v893_v9, %v2894_v17 }
 0x195   :  { %724 = vrot.lane.b32.xlu0 %v704_v43, %s2781_s22  ;;  %v3263_v43 = vpop.permute.xlu0 %1042 }
 0x196   :  { %787 = vrot.lane.b32.xlu1 %v770_v7, %s2782_s23  ;;  %v840_v7 = vmul.f32 %v828_v39, %v2901_v22 }
 0x198   :  { %v832_v52 = vpop.permute.xlu1 %831 }
 0x199   :  { %728 = vrot.lane.b32.xlu0 %v706_v6, %s2781_s22 }
 0x19a   :  { %791 = vrot.lane.b32.xlu1 %v772_v36, %s2782_s23  ;;  %v3274_v36 = vpop.permute.xlu0 %440 }
 0x19b   :  { %4968 = vst [vmem:[#allocation6_spill] sm:$0xff] %v3274_v36 }
 0x19c   :  { %v836_v40 = vpop.permute.xlu1 %835 }
 0x19d   :  { %854 = vrot.lane.b32.xlu0 %v838_v5, %s2783_s24 }
 0x19e   :  { %726 = vrot.lane.b32.xlu1 %v705_v37, %s2781_s22  ;;  %v775_v37 = vmul.f32 %v767_v42, %v2931_v32 }
 0x1a1   :  { %858 = vrot.lane.b32.xlu0 %v840_v7, %s2783_s24  ;;  %v966_v6 = vpop.permute.xlu1 %965  ;;  %v3281_v7 = vpop.permute.xlu0 %444 }
 0x1a2   :  { %730 = vrot.lane.b32.xlu1 %v707_v2, %s2781_s22  ;;  %4969 = vst [vmem:[#allocation7_spill] sm:$0xff] %v3281_v7  ;;  %v907_v2 = vmul.f32 %v893_v9, %v2889_v16 }
 0x1a5   :  { %793 = vrot.lane.b32.xlu0 %v773_v41, %s2782_s23  ;;  %v3292_v39 = vpop.permute.xlu0 %379 }
 0x1a6   :  { %856 = vrot.lane.b32.xlu1 %v839_v1, %s2783_s24  ;;  %v901_v5 = vpop.permute.xlu1 %900  ;;  %v909_v1 = vmul.f32 %v3230_v35, %v2901_v22 }
 0x1a9   :  { %797 = vrot.lane.b32.xlu0 %v775_v37, %s2782_s23  ;;  %v776_v37 = vmul.f32 %v767_v42, %v2936_v33  ;;  %v3301_v11 = vpop.permute.xlu0 %383  ;;  %v844_v42 = vmul.f32 %v836_v40, %v2931_v32 }
 0x1aa   :  { %860 = vrot.lane.b32.xlu1 %v841_v54, %s2783_s24  ;;  %v842_v54 = vmul.f32 %v832_v52, %v2917_v27  ;;  %4970 = vst [vmem:[#allocation8_spill] sm:$0xff] %v3301_v11 }
 0x1ab   :  { %v1031_v36 = vpop.permute.xlu1 %1030 }
 0x1ad   :  { %923 = vrot.lane.b32.xlu0 %v907_v2, %s2784_s25  ;;  %v910_v2 = vmul.f32 %v3230_v35, %v2906_v23  ;;  %v3314_v9 = vpop.permute.xlu0 %509 }
 0x1ae   :  { %795 = vrot.lane.b32.xlu1 %v774_v45, %s2782_s23  ;;  %v976_v45 = vmul.f32 %v3246_v4, %v2889_v16 }
 0x1af   :  { %v1035_v41 = vpop.permute.xlu1 %1034 }
 0x1b1   :  { %927 = vrot.lane.b32.xlu0 %v909_v1, %s2784_s25 }
 0x1b2   :  { %799 = vrot.lane.b32.xlu1 %v776_v37, %s2782_s23  ;;  %v843_v37 = vmul.f32 %v832_v52, %v2922_v28  ;;  %v977_v52 = vmul.f32 %v3246_v4, %v2894_v17 }
 0x1b4   :  { %v3299_v7 = vpop.permute.xlu1 %973 }
 0x1b5   :  { %862 = vrot.lane.b32.xlu0 %v842_v54, %s2783_s24  ;;  %v978_v54 = vmul.f32 %v966_v6, %v2901_v22 }
 0x1b6   :  { %925 = vrot.lane.b32.xlu1 %v908_v8, %s2784_s25  ;;  %v845_v8 = vmul.f32 %v836_v40, %v2936_v33  ;;  %v913_v40 = vmul.f32 %v3239_v10, %v2931_v32 }
 0x1b9   :  { %866 = vrot.lane.b32.xlu0 %v844_v42, %s2783_s24  ;;  %v3311_v1 = vpop.permute.xlu1 %1038  ;;  %v3323_v42 = vpop.permute.xlu0 %513 }
 0x1ba   :  { %929 = vrot.lane.b32.xlu1 %v910_v2, %s2784_s25 }
 0x1bd   :  { %992 = vrot.lane.b32.xlu0 %v976_v45, %s2785_s26  ;;  %v3318_v35 = vpop.permute.xlu1 %375  ;;  %v911_v45 = vmul.f32 %v901_v5, %v2917_v27 }
 0x1be   :  { %864 = vrot.lane.b32.xlu1 %v843_v37, %s2783_s24 }
 0x1c1   :  { %996 = vrot.lane.b32.xlu0 %v978_v54, %s2785_s26  ;;  %v3326_v2 = vpop.permute.xlu1 %377  ;;  %v979_v54 = vmul.f32 %v966_v6, %v2906_v23  ;;  %v1047_v6 = vmul.f32 %v1035_v41, %v2901_v22 }
 0x1c2   :  { %868 = vrot.lane.b32.xlu1 %v845_v8, %s2783_s24  ;;  %v1045_v8 = vmul.f32 %v1031_v36, %v2889_v16 }
 0x1c5   :  { %v3332_v11 = vpop.permute.xlu0 %448  ;;  %931 = vrot.lane.b32.xlu0 %v911_v45, %s2784_s25  ;;  %v3335_v37 = vpop.permute.xlu1 %442  ;;  %v912_v45 = vmul.f32 %v901_v5, %v2922_v28  ;;  %v980_v5 = vmul.f32 %v3256_v46, %v2917_v27 }
 0x1c6   :  { %4971 = vst [vmem:[#allocation9_spill] sm:$0xff] %v3332_v11  ;;  %994 = vrot.lane.b32.xlu1 %v977_v52, %s2785_s26 }
 0x1c9   :  { %935 = vrot.lane.b32.xlu0 %v913_v40, %s2784_s25  ;;  %v3342_v4 = vpop.permute.xlu1 %446  ;;  %v3346_v11 = vpop.permute.xlu0 %452 }
 0x1ca   :  { %998 = vrot.lane.b32.xlu1 %v979_v54, %s2785_s26  ;;  %4972 = vst [vmem:[#allocation10_spill] sm:$0xff] %v3346_v11  ;;  %v914_v54 = vmul.f32 %v3239_v10, %v2936_v33  ;;  %v982_v10 = vmul.f32 %v3299_v7, %v2931_v32 }
 0x1cd   :  { %1061 = vrot.lane.b32.xlu0 %v1045_v8, %s2786_s27  ;;  %v3350_v52 = vpop.permute.xlu1 %381 }
 0x1ce   :  { %933 = vrot.lane.b32.xlu1 %v912_v45, %s2784_s25  ;;  %v1046_v45 = vmul.f32 %v1031_v36, %v2894_v17  ;;  %v1049_v17 = vmul.f32 %v3311_v1, %v2917_v27 }
 0x1cf   :  { %v3354_v40 = vpop.permute.xlu0 %578 }
 0x1d0   :  { %4973 = vst [vmem:[#allocation11_spill] sm:$0xff] %v3354_v40  ;;  %v5034_v40 = vmov 14  }
 0x1d1   :  { %1065 = vrot.lane.b32.xlu0 %v1047_v6, %s2786_s27  ;;  %v3359_v16 = vpop.permute.xlu1 %385 }
 0x1d2   :  { %937 = vrot.lane.b32.xlu1 %v914_v54, %s2784_s25  ;;  %v1048_v54 = vmul.f32 %v1035_v41, %v2906_v23 }
 0x1d3   :  { %v3364_v8 = vpop.permute.xlu0 %582 }
 0x1d4   :  { %4974 = vst [vmem:[#allocation12_spill] sm:$0xff] %v3364_v8 }
 0x1d5   :  { %1000 = vrot.lane.b32.xlu0 %v980_v5, %s2785_s26  ;;  %v3368_v22 = vpop.permute.xlu1 %511  ;;  %v981_v5 = vmul.f32 %v3256_v46, %v2922_v28 }
 0x1d6   :  { %1063 = vrot.lane.b32.xlu1 %v1046_v45, %s2786_s27  ;;  %v1051_v45 = vmul.f32 %v3263_v43, %v2931_v32  ;;  %v3403_v32 = vld [vmem:[%s4879_s1 + $0x20] sm:$0xff] }
 0x1d7   :  { %v3373_v6 = vpop.permute.xlu0 %517 }
 0x1d8   :  { %4975 = vst [vmem:[#allocation13_spill] sm:$0xff] %v3373_v6  ;;  %v3453_v6 = vld [vmem:[%s4879_s1 + $0x30] sm:$0xff] }
 0x1d9   :  { %1004 = vrot.lane.b32.xlu0 %v982_v10, %s2785_s26  ;;  %v3377_v11 = vpop.permute.xlu1 %515  ;;  %v983_v10 = vmul.f32 %v3299_v7, %v2936_v33  ;;  %v1052_v7 = vmul.f32 %v3263_v43, %v2936_v33  ;;  %v3434_v43 = vld [vmem:[%s4879_s1 + $0x38] sm:$0xff] }
 0x1da   :  { %1067 = vrot.lane.b32.xlu1 %v1048_v54, %s2786_s27  ;;  %v1050_v54 = vmul.f32 %v3311_v1, %v2922_v28 }
 0x1db   :  { %v3382_v36 = vpop.permute.xlu0 %521 }
 0x1dc   :  { %4976 = vst [vmem:[#allocation14_spill] sm:$0xff] %v3382_v36  ;;  %v4984_v36 = vmov 2  }
 0x1dd   :  { %1069 = vrot.lane.b32.xlu0 %v1049_v17, %s2786_s27  ;;  %v3389_v23 = vpop.permute.xlu1 %450 }
 0x1de   :  { %4977 = vst [vmem:[#allocation15_spill] sm:$0xff] %v3389_v23  ;;  %1002 = vrot.lane.b32.xlu1 %v981_v5, %s2785_s26 }
 0x1df   :  { %v3392_v41 = vpop.permute.xlu0 %647 }
 0x1e0   :  { %4978 = vst [vmem:[#allocation16_spill] sm:$0xff] %v3392_v41  ;;  %v5005_v41 = vmov 4  }
 0x1e1   :  { %v3396_v27 = vpop.permute.xlu1 %454  ;;  %1073 = vrot.lane.b32.xlu0 %v1051_v45, %s2786_s27 }
 0x1e2   :  { %4979 = vst [vmem:[#allocation17_spill] sm:$0xff] %v3396_v27  ;;  %1006 = vrot.lane.b32.xlu1 %v983_v10, %s2785_s26  ;;  %v3422_v10 = vld [vmem:[%s4879_s1 + $0x28] sm:$0xff] }
 0x1e3   :  { %v3405_v46 = vpop.permute.xlu0 %651 }
 0x1e4   :  { %4980 = vst [vmem:[#allocation18_spill] sm:$0xff] %v3405_v46 }
 0x1e5   :  { %v3409_v17 = vpop.permute.xlu1 %580  ;;  %1362 = vperm.xlu0 %2697, %v3403_v32  }
 0x1e6   :  { %4981 = vst [vmem:[#allocation19_spill] sm:$0xff] %v3409_v17  ;;  %1071 = vrot.lane.b32.xlu1 %v1050_v54, %s2786_s27 }
 0x1e7   :  { %v3415_v5 = vpop.permute.xlu0 %586 }
 0x1e8   :  { %4982 = vst [vmem:[#allocation20_spill] sm:$0xff] %v3415_v5 }
 0x1e9   :  { %v3417_v45 = vpop.permute.xlu1 %584  ;;  %2700 = vset.pattern.permute.xlu0 %v4984_v36 }
 0x1ea   :  { %4983 = vst [vmem:[#allocation21_spill] sm:$0xff] %v3417_v45  ;;  %1075 = vrot.lane.b32.xlu1 %v1052_v7, %s2786_s27  ;;  %1434 = vperm.xlu0 %2700, %v3422_v10   ;;  %v4989_v7 = vmov 3  }
 0x1eb   :  { %v3427_v28 = vpop.permute.xlu0 %590 }
 0x1ec   :  { %4985 = vst [vmem:[#allocation22_spill] sm:$0xff] %v3427_v28 }
 0x1ed   :  { %v3429_v33 = vpop.permute.xlu1 %519 }
 0x1ee   :  { %4986 = vst [vmem:[#allocation23_spill] sm:$0xff] %v3429_v33  ;;  %1366 = vperm.xlu1 %2698, %v3422_v10   ;;  %1442 = vperm.xlu0 %2700, %v3434_v43  }
 0x1ef   :  { %v3438_v1 = vpop.permute.xlu0 %716 }
 0x1f0   :  { %4987 = vst [vmem:[#allocation24_spill] sm:$0xff] %v3438_v1 }
 0x1f1   :  { %v3440_v54 = vpop.permute.xlu1 %523 }
 0x1f2   :  { %4988 = vst [vmem:[#allocation25_spill] sm:$0xff] %v3440_v54  ;;  %2699 = vset.pattern.permute.xlu1 %v4984_v36  ;;  %2704 = vset.pattern.permute.xlu0 %v4989_v7  ;;  %v4993_v54 = vmov 1  }
 0x1f3   :  { %v3444_v28 = vpop.permute.xlu0 %720  ;;  %1430 = vperm.xlu1 %2699, %v3403_v32   ;;  %1498 = vperm.xlu0 %2704, %v3403_v32  }
 0x1f4   :  { %4990 = vst [vmem:[#allocation26_spill] sm:$0xff] %v3444_v28  ;;  %v4996_v28 = vmov 5  }
 0x1f5   :  { %v3448_v5 = vpop.permute.xlu1 %649 }
 0x1f6   :  { %4991 = vst [vmem:[#allocation27_spill] sm:$0xff] %v3448_v5 }
 0x1f7   :  { %v3455_v33 = vpop.permute.xlu0 %655  ;;  %2701 = vset.pattern.permute.xlu1 %v4993_v54  ;;  %1506 = vperm.xlu0 %2704, %v3453_v6  }
 0x1f8   :  { %4992 = vst [vmem:[#allocation28_spill] sm:$0xff] %v3455_v33  ;;  %1370 = vperm.xlu1 %2701, %v3453_v6  }
 0x1f9   :  { %v3460_v27 = vpop.permute.xlu1 %653 }
 0x1fa   :  { %4994 = vst [vmem:[#allocation29_spill] sm:$0xff] %v3460_v27 }
 0x1fb   :  { %v3462_v23 = vpop.permute.xlu0 %659  ;;  %2708 = vset.pattern.permute.xlu0 %v4996_v28 }
 0x1fc   :  { %4995 = vst [vmem:[#allocation30_spill] sm:$0xff] %v3462_v23  ;;  %1374 = vperm.xlu1 %2701, %v3434_v43   ;;  %1638 = vperm.xlu0 %2708, %v3422_v10   ;;  %v5001_v23 = vmov 6  }
 0x1fd   :  { %v3467_v1 = vpop.permute.xlu1 %588 }
 0x1fe   :  { %4997 = vst [vmem:[#allocation31_spill] sm:$0xff] %v3467_v1 }
 0x1ff   :  { %v3469_v46 = vpop.permute.xlu0 %785 }
 0x200   :  { %4998 = vst [vmem:[#allocation32_spill] sm:$0xff] %v3469_v46  ;;  %2702 = vset.pattern.permute.xlu1 %v4989_v7  ;;  %1646 = vperm.xlu0 %2708, %v3434_v43  }
 0x201   :  { %1502 = vperm.xlu1 %2702, %v3422_v10   ;;  %v3474_v54 = vpop.permute.xlu1 %592 }
 0x202   :  { %4999 = vst [vmem:[#allocation33_spill] sm:$0xff] %v3474_v54 }
 0x203   :  { %v3476_v33 = vpop.permute.xlu0 %789 }
 0x204   :  { %5000 = vst [vmem:[#allocation34_spill] sm:$0xff] %v3476_v33  ;;  %2712 = vset.pattern.permute.xlu0 %v5001_v23 }
 0x205   :  { %2703 = vset.pattern.permute.xlu1 %v4984_v36  ;;  %v3480_v27 = vpop.permute.xlu1 %718  ;;  %1702 = vperm.xlu0 %2712, %v3403_v32   ;;  %v5008_v36 = vmov 8  }
 0x206   :  { %5002 = vst [vmem:[#allocation35_spill] sm:$0xff] %v3480_v27  ;;  %1438 = vperm.xlu1 %2703, %v3453_v6  }
 0x207   :  { %v3484_v1 = vpop.permute.xlu0 %724 }
 0x208   :  { %5003 = vst [vmem:[#allocation36_spill] sm:$0xff] %v3484_v1 }
 0x209   :  { %v3486_v46 = vpop.permute.xlu1 %722  ;;  %1710 = vperm.xlu0 %2712, %v3453_v6  }
 0x20a   :  { %5004 = vst [vmem:[#allocation37_spill] sm:$0xff] %v3486_v46  ;;  %2705 = vset.pattern.permute.xlu1 %v5005_v41 }
 0x20b   :  { %v3490_v54 = vpop.permute.xlu0 %728  ;;  %1566 = vperm.xlu1 %2705, %v3403_v32  }
 0x20c   :  { %5006 = vst [vmem:[#allocation38_spill] sm:$0xff] %v3490_v54 }
 0x20d   :  { %v3493_v33 = vpop.permute.xlu1 %657  ;;  %2716 = vset.pattern.permute.xlu0 %v5008_v36 }
 0x20e   :  { %5007 = vst [vmem:[#allocation39_spill] sm:$0xff] %v3493_v33  ;;  %1842 = vperm.xlu0 %2716, %v3422_v10   ;;  %v5013_v33 = vmov 9  }
 0x20f   :  { %v3497_v27 = vpop.permute.xlu0 %854  ;;  %1570 = vperm.xlu1 %2705, %v3422_v10  }
 0x210   :  { %5009 = vst [vmem:[#allocation40_spill] sm:$0xff] %v3497_v27 }
 0x211   :  { %v3500_v1 = vpop.permute.xlu1 %661 }
 0x212   :  { %5010 = vst [vmem:[#allocation41_spill] sm:$0xff] %v3500_v1  ;;  %1850 = vperm.xlu0 %2716, %v3434_v43  }
 0x213   :  { %v3503_v46 = vpop.permute.xlu0 %858  ;;  %2706 = vset.pattern.permute.xlu1 %v4989_v7 }
 0x214   :  { %5011 = vst [vmem:[#allocation42_spill] sm:$0xff] %v3503_v46  ;;  %1510 = vperm.xlu1 %2706, %v3434_v43  }
 0x215   :  { %v3507_v54 = vpop.permute.xlu1 %787 }
 0x216   :  { %5012 = vst [vmem:[#allocation43_spill] sm:$0xff] %v3507_v54  ;;  %2720 = vset.pattern.permute.xlu0 %v5013_v33 }
 0x217   :  { %v3510_v5 = vpop.permute.xlu0 %793  ;;  %1906 = vperm.xlu0 %2720, %v3403_v32  }
 0x218   :  { %5014 = vst [vmem:[#allocation44_spill] sm:$0xff] %v3510_v5  ;;  %2707 = vset.pattern.permute.xlu1 %v4996_v28  ;;  %v5019_v5 = vmov 11  }
 0x219   :  { %1634 = vperm.xlu1 %2707, %v3403_v32   ;;  %v3515_v1 = vpop.permute.xlu1 %791 }
 0x21a   :  { %5015 = vst [vmem:[#allocation45_spill] sm:$0xff] %v3515_v1 }
 0x21b   :  { %v3517_v27 = vpop.permute.xlu0 %797  ;;  %1914 = vperm.xlu0 %2720, %v3453_v6  }
 0x21c   :  { %5016 = vst [vmem:[#allocation46_spill] sm:$0xff] %v3517_v27 }
 0x21d   :  { %2709 = vset.pattern.permute.xlu1 %v5005_v41  ;;  %v3521_v7 = vpop.permute.xlu1 %726 }
 0x21e   :  { %5017 = vst [vmem:[#allocation47_spill] sm:$0xff] %v3521_v7  ;;  %1574 = vperm.xlu1 %2709, %v3453_v6   ;;  %v5024_v7 = vmov 12  }
 0x21f   :  { %v3524_v46 = vpop.permute.xlu0 %923  ;;  %2724 = vset.pattern.permute.xlu0 %v5019_v5 }
 0x220   :  { %5018 = vst [vmem:[#allocation48_spill] sm:$0xff] %v3524_v46  ;;  %2046 = vperm.xlu0 %2724, %v3422_v10   ;;  %v5029_v46 = vmov 7  }
 0x221   :  { %v3528_v54 = vpop.permute.xlu1 %730 }
 0x222   :  { %5020 = vst [vmem:[#allocation49_spill] sm:$0xff] %v3528_v54  ;;  %1578 = vperm.xlu1 %2709, %v3434_v43   ;;  %v4935_v54 = vmov 0.0  }
 0x223   :  { %v3531_v1 = vpop.permute.xlu0 %927  ;;  %1191 = vmatprep.mubr.f32.mxu0 %v4935_v54  ;;  %1302 = vmatprep.mubr.f32.mxu1 %v4935_v54  ;;  %v2743_v54 = vld [vmem:[%s4880_s0 + $0x20] sm:$0xff] }
 0x224   :  { %5021 = vst [vmem:[#allocation50_spill] sm:$0xff] %v3531_v1  ;;  %2054 = vperm.xlu0 %2724, %v3434_v43  }
 0x225   :  { %v3534_v27 = vpop.permute.xlu1 %856 }
 0x226   :  { %5022 = vst [vmem:[#allocation51_spill] sm:$0xff] %v3534_v27  ;;  %2710 = vset.pattern.permute.xlu1 %v5001_v23  ;;  %v5031_v27 = vmov 15  }
 0x227   :  { %v3537_v41 = vpop.permute.xlu0 %862  ;;  %1706 = vperm.xlu1 %2710, %v3422_v10  }
 0x228   :  { %5023 = vst [vmem:[#allocation52_spill] sm:$0xff] %v3537_v41  ;;  %2728 = vset.pattern.permute.xlu0 %v5024_v7 }
 0x229   :  { %v3541_v5 = vpop.permute.xlu1 %860  ;;  %2110 = vperm.xlu0 %2728, %v3403_v32  }
 0x22a   :  { %5025 = vst [vmem:[#allocation53_spill] sm:$0xff] %v3541_v5 }
 0x22b   :  { %v3546_v1 = vpop.permute.xlu0 %866  ;;  %2711 = vset.pattern.permute.xlu1 %v4996_v28 }
 0x22c   :  { %5026 = vst [vmem:[#allocation54_spill] sm:$0xff] %v3546_v1  ;;  %1642 = vperm.xlu1 %2711, %v3453_v6   ;;  %v59_v1 = vmul.f32 %v2743_v54, %v2878_v12  ;;  %v2747_v54 = vld [vmem:[%s4880_s0 + $0x30] sm:$0xff] }
 0x22d   :  { %v3550_v41 = vpop.permute.xlu1 %795  ;;  %2118 = vperm.xlu0 %2728, %v3453_v6   ;;  %v61_v8 = vmul.f32 %v2747_v54, %v2882_v14 }
 0x22e   :  { %5027 = vst [vmem:[#allocation55_spill] sm:$0xff] %v3550_v41  ;;  %v2744_v41 = vld [vmem:[%s4880_s0 + $0x28] sm:$0xff] }
 0x22f   :  { %v3553_v7 = vpop.permute.xlu0 %992 }
 0x230   :  { %5028 = vst [vmem:[#allocation56_spill] sm:$0xff] %v3553_v7  ;;  %2713 = vset.pattern.permute.xlu1 %v5029_v46  ;;  %v60_v7 = vmul.f32 %v2744_v41, %v2878_v12  ;;  %v112_v12 = vsel %vm111_vm0, %v3044_v49, %v3041_v48  ;;  %v2748_v41 = vld [vmem:[%s4880_s0 + $0x38] sm:$0xff] }
 0x231   :  { %1770 = vperm.xlu1 %2713, %v3403_v32   ;;  %v3557_v5 = vpop.permute.xlu1 %799  ;;  %2733 = vset.pattern.permute.xlu0 %v5031_v27  ;;  %v2745_v27 = vld [vmem:[%s4880_s0] sm:$0xff]  ;;  %v2750_v49 = vld [vmem:[%s4880_s0 + $0x18] sm:$0xff] }
 0x232   :  { %5030 = vst [vmem:[#allocation57_spill] sm:$0xff] %v3557_v5  ;;  %2314 = vperm.xlu0 %2733, %v3403_v32   ;;  %v55_v5 = vmul.f32 %v2745_v27, %v2880_v13  ;;  %v58_v45 = vmul.f32 %v2750_v49, %v2884_v15  ;;  %v129_v17 = vadd.f32 %v3055_v53, %v60_v7 }
 0x233   :  { %v3561_v28 = vpop.permute.xlu0 %996 }
 0x234   :  { %5032 = vst [vmem:[#allocation58_spill] sm:$0xff] %v3561_v28  ;;  %v2746_v28 = vld [vmem:[%s4880_s0 + $0x8] sm:$0xff] }
 0x235   :  { %v56_v33 = vmul.f32 %v2746_v28, %v2880_v13  ;;  %1774 = vperm.xlu1 %2713, %v3422_v10   ;;  %v3587_v27 = vpop.permute.xlu1 %925  ;;  %v62_v13 = vmul.f32 %v2748_v41, %v2882_v14  ;;  %v2749_v28 = vld [vmem:[%s4880_s0 + $0x10] sm:$0xff]  ;;  %v114_v14 = vsel %vm111_vm0, %v3058_v55, %v3055_v53  ;;  %v127_v55 = vadd.f32 %v3048_v50, %v58_v45 }
 0x236   :  { %5033 = vst [vmem:[#allocation59_spill] sm:$0xff] %v3587_v27  ;;  %v57_v54 = vmul.f32 %v2749_v28, %v2884_v15  ;;  %v113_v27 = vsel %vm111_vm0, %v3051_v51, %v3048_v50  ;;  %2734 = vset.pattern.permute.xlu0 %v5034_v40  ;;  %v124_v28 = vadd.f32 %v112_v12, %v55_v5 }
 0x237   :  { %2250 = vperm.xlu0 %2734, %v3422_v10   ;;  %v125_v41 = vadd.f32 %v3041_v48, %v56_v33  ;;  %v115_v15 = vsel %vm111_vm0, %v3066_v58, %v3064_v57  ;;  %v181_v51 = vsel %vm180_vm1, %v3073_v60, %v3076_v61  ;;  %v3616_v49 = vpop.permute.xlu0 %931  ;;  %v182_v48 = vsel %vm180_vm1, %v3081_v63, %v3084_v18 }
 0x238   :  { %v126_v40 = vadd.f32 %v113_v27, %v57_v54  ;;  %v128_v58 = vadd.f32 %v114_v14, %v59_v1  ;;  %v131_v33 = vadd.f32 %v3064_v57, %v62_v13  ;;  %v183_v60 = vsel %vm180_vm1, %v3090_v20, %v3092_v21  ;;  %v5036_v54 = vld [vmem:[#allocation3_spill] sm:$0xff]  ;;  %v5037_v14 = vld [vmem:[#allocation2_spill] sm:$0xff] }
 0x239   :  { %2714 = vset.pattern.permute.xlu1 %v5001_v23  ;;  %v3624_v5 = vpop.permute.xlu1 %929  ;;  %v184_v50 = vsel %vm180_vm1, %v3099_v25, %v3101_v26  ;;  %v130_v53 = vadd.f32 %v115_v15, %v61_v8  ;;  %v193_v45 = vadd.f32 %v181_v51, %v124_v28  ;;  %v194_v63 = vadd.f32 %v3076_v61, %v125_v41  ;;  %v5038_v15 = vld [vmem:[#allocation4_spill] sm:$0xff]  ;;  %v5039_v51 = vld [vmem:[#allocation5_spill] sm:$0xff] }
 0x23a   :  { %1714 = vperm.xlu1 %2714, %v3434_v43   ;;  %v250_v23 = vsel %vm249_vm2, %v3109_v31, %v3107_v30  ;;  %v195_v57 = vadd.f32 %v182_v48, %v126_v40  ;;  %v196_v1 = vadd.f32 %v3084_v18, %v127_v55  ;;  %v198_v20 = vadd.f32 %v3092_v21, %v129_v17 }
 0x23b   :  { %2258 = vperm.xlu0 %2734, %v3434_v43   ;;  %v251_v25 = vsel %vm249_vm2, %v3116_v56, %v3114_v34  ;;  %v197_v7 = vadd.f32 %v183_v60, %v128_v58  ;;  %v199_v8 = vadd.f32 %v184_v50, %v130_v53  ;;  %v200_v12 = vadd.f32 %v3101_v26, %v131_v33  ;;  %v3655_v56 = vpop.permute.xlu0 %935 }
 0x23c   :  { %v252_v61 = vsel %vm249_vm2, %v3122_v62, %v3120_v59  ;;  %v263_v40 = vadd.f32 %v3107_v30, %v194_v63  ;;  %v262_v27 = vadd.f32 %v250_v23, %v193_v45  ;;  %v265_v18 = vadd.f32 %v3114_v34, %v196_v1 }
 0x23d   :  { %v3648_v31 = vpop.permute.xlu1 %864  ;;  %v253_v21 = vsel %vm249_vm2, %v3128_v24, %v3126_v19  ;;  %v264_v26 = vadd.f32 %v251_v25, %v195_v57  ;;  %v319_v62 = vsel %vm318_vm3, %v3131_v29, %v3133_v38  ;;  %v320_v30 = vsel %vm318_vm3, %v3138_v44, %v3140_v0  ;;  %v5041_v57 = vld [vmem:[#allocation7_spill] sm:$0xff] }
 0x23e   :  { %2715 = vset.pattern.permute.xlu1 %v5008_v36  ;;  %v5035_v34 = vmov 0   ;;  %v267_v17 = vadd.f32 %v3120_v59, %v198_v20  ;;  %v266_v24 = vadd.f32 %v252_v61, %v197_v7  ;;  %v321_v13 = vsel %vm318_vm3, %v3149_v47, %v3151_v3  ;;  %v5042_v61 = vld [vmem:[#allocation8_spill] sm:$0xff] }
 0x23f   :  { %1838 = vperm.xlu1 %2715, %v3403_v32   ;;  %2738 = vset.pattern.permute.xlu0 %v5035_v34  ;;  %v322_v41 = vsel %vm318_vm3, %v5037_v14, %v5036_v54  ;;  %v269_v29 = vadd.f32 %v3126_v19, %v200_v12  ;;  %v268_v44 = vadd.f32 %v253_v21, %v199_v8  ;;  %v3689_v63 = vpop.permute.xlu0 %1061  ;;  %v2788_v12 = vmov 32  }
 0x240   :  { %1335 = vperm.xlu0 %2738, %v3403_v32   ;;  %v332_v28 = vadd.f32 %v3133_v38, %v263_v40  ;;  %v388_v59 = vsel %vm387_vm4, %v5039_v51, %v5038_v15  ;;  %v331_v48 = vadd.f32 %v319_v62, %v262_v27  ;;  %v333_v58 = vadd.f32 %v320_v30, %v264_v26  ;;  %v5045_v26 = vld [vmem:[#allocation21_spill] sm:$0xff]  ;;  %v5046_v62 = vld [vmem:[#allocation12_spill] sm:$0xff] }
 0x241   :  { %v3679_v55 = vpop.permute.xlu1 %868  ;;  %v334_v47 = vadd.f32 %v3140_v0, %v265_v18  ;;  %v336_v33 = vadd.f32 %v3151_v3, %v267_v17  ;;  %v335_v60 = vadd.f32 %v321_v13, %v266_v24  ;;  %v337_v50 = vadd.f32 %v322_v41, %v268_v44  ;;  %v5044_v18 = vld [vmem:[#allocation11_spill] sm:$0xff] }
 0x242   :  { %v338_v53 = vadd.f32 %v5036_v54, %v269_v29  ;;  %v401_v38 = vadd.f32 %v5038_v15, %v332_v28  ;;  %v400_v19 = vadd.f32 %v388_v59, %v331_v48  ;;  %v389_v45 = vsel %vm387_vm4, %v3318_v35, %v3326_v2  ;;  %v5047_v41 = vld [vmem:[#allocation27_spill] sm:$0xff]  ;;  %v5048_v29 = vld [vmem:[#allocation16_spill] sm:$0xff]  ;;  %v5049_v28 = vld [vmem:[#allocation29_spill] sm:$0xff] }
 0x243   :  { %2717 = vset.pattern.permute.xlu1 %v5029_v46  ;;  %v403_v0 = vadd.f32 %v3326_v2, %v334_v47  ;;  %v5040_v46 = vld [vmem:[#allocation6_spill] sm:$0xff]  ;;  %v458_v35 = vsel %vm456_vm5, %v5041_v57, %v3342_v4  ;;  %v402_v1 = vadd.f32 %v389_v45, %v333_v58  ;;  %v390_v2 = vsel %vm387_vm4, %v3292_v39, %v3350_v52  ;;  %v3728_v17 = vpop.permute.xlu0 %1065  ;;  %v5053_v45 = vld [vmem:[#allocation24_spill] sm:$0xff]  ;;  %v5056_v57 = vld [vmem:[#allocation15_spill] sm:$0xff] }
 0x244   :  { %1778 = vperm.xlu1 %2717, %v3453_v6   ;;  %1350 = vperm.xlu0 %2738, %v3434_v43   ;;  %v457_v23 = vsel %vm456_vm5, %v5040_v46, %v3335_v37  ;;  %v470_v20 = vadd.f32 %v3335_v37, %v401_v38  ;;  %v526_v7 = vsel %vm525_vm6, %v3314_v9, %v3368_v22  ;;  %v5050_v15 = vld [vmem:[#allocation18_spill] sm:$0xff]  ;;  %v5051_v59 = vmov 9   ;;  %v5054_v46 = vld [vmem:[#allocation37_spill] sm:$0xff] }
 0x245   :  { %v3694_v3 = vpop.permute.xlu1 %994  ;;  %v472_v25 = vadd.f32 %v3342_v4, %v403_v0  ;;  %v527_v8 = vsel %vm525_vm6, %v3323_v42, %v3377_v11  ;;  %v469_v37 = vadd.f32 %v457_v23, %v400_v19  ;;  %v471_v4 = vadd.f32 %v458_v35, %v402_v1  ;;  %v5043_v42 = vld [vmem:[#allocation19_spill] sm:$0xff]  ;;  %v5055_v23 = vld [vmem:[#allocation26_spill] sm:$0xff] }
 0x246   :  { %v391_v39 = vsel %vm387_vm4, %v5042_v61, %v3359_v16  ;;  %v539_v9 = vadd.f32 %v3368_v22, %v470_v20  ;;  %v595_v21 = vsel %vm594_vm7, %v5044_v18, %v5043_v42  ;;  %v596_v30 = vsel %vm594_vm7, %v5046_v62, %v5045_v26  ;;  %v5052_v19 = vld [vmem:[#allocation35_spill] sm:$0xff] }
 0x247   :  { %v541_v27 = vadd.f32 %v3377_v11, %v472_v25  ;;  %v404_v24 = vadd.f32 %v390_v2, %v335_v60  ;;  %v405_v13 = vadd.f32 %v3350_v52, %v336_v33  ;;  %v538_v54 = vadd.f32 %v526_v7, %v469_v37  ;;  %v5058_v2 = vld [vmem:[#allocation43_spill] sm:$0xff]  ;;  %v5059_v7 = vld [vmem:[#allocation32_spill] sm:$0xff]  ;;  %v5060_v37 = vld [vmem:[#allocation45_spill] sm:$0xff] }
 0x248   :  { %1782 = vperm.xlu1 %2717, %v3434_v43   ;;  %2741 = vset.pattern.permute.xlu0 %v2788_v12  ;;  %v540_v14 = vadd.f32 %v527_v8, %v471_v4  ;;  %v608_v22 = vadd.f32 %v5043_v42, %v539_v9  ;;  %v664_v44 = vsel %vm663_vm8, %v5048_v29, %v5047_v41  ;;  %v5061_v4 = vld [vmem:[#allocation34_spill] sm:$0xff] }
 0x249   :  { %v3718_v40 = vpop.permute.xlu1 %998  ;;  %v610_v11 = vadd.f32 %v5045_v26, %v541_v27  ;;  %v665_v51 = vsel %vm663_vm8, %v5050_v15, %v5049_v28  ;;  %v406_v48 = vadd.f32 %v391_v39, %v337_v50  ;;  %v407_v52 = vadd.f32 %v3359_v16, %v338_v53  ;;  %v5057_v16 = vld [vmem:[#allocation9_spill] sm:$0xff]  ;;  %v3763_v39 = vpop.permute.xlu0 %1000  ;;  %v5063_v42 = vld [vmem:[#allocation10_spill] sm:$0xff] }
 0x24a   :  { %v607_v58 = vadd.f32 %v595_v21, %v538_v54  ;;  %v609_v47 = vadd.f32 %v596_v30, %v540_v14  ;;  %v677_v60 = vadd.f32 %v5047_v41, %v608_v22  ;;  %v733_v0 = vsel %vm732_vm9, %v5053_v45, %v5052_v19  ;;  %v5062_v27 = vld [vmem:[#allocation17_spill] sm:$0xff]  ;;  %v5064_v14 = vld [vmem:[#allocation51_spill] sm:$0xff]  ;;  %v5065_v22 = vld [vmem:[#allocation40_spill] sm:$0xff] }
 0x24b   :  { %v679_v38 = vadd.f32 %v5049_v28, %v610_v11  ;;  %v734_v50 = vsel %vm732_vm9, %v5055_v23, %v5054_v46  ;;  %v459_v53 = vsel %vm456_vm5, %v5057_v16, %v5056_v57  ;;  %v802_v8 = vsel %vm801_vm10, %v5059_v7, %v5058_v2  ;;  %v5066_v41 = vld [vmem:[#allocation53_spill] sm:$0xff]  ;;  %v5068_v28 = vld [vmem:[#allocation23_spill] sm:$0xff] }
 0x24c   :  { %2718 = vset.pattern.permute.xlu1 %v5051_v59  ;;  %v676_v35 = vadd.f32 %v664_v44, %v607_v58  ;;  %v678_v1 = vadd.f32 %v665_v51, %v609_v47  ;;  %v746_v20 = vadd.f32 %v5052_v19, %v677_v60  ;;  %v803_v61 = vsel %vm801_vm10, %v5061_v4, %v5060_v37  ;;  %v5069_v15 = vld [vmem:[#allocation13_spill] sm:$0xff]  ;;  %v5071_v19 = vld [vmem:[#allocation48_spill] sm:$0xff] }
 0x24d   :  { %1910 = vperm.xlu1 %2718, %v3422_v10   ;;  %v3742_v33 = vpop.permute.xlu1 %933  ;;  %v748_v25 = vadd.f32 %v5054_v46, %v679_v38  ;;  %v474_v9 = vadd.f32 %v5056_v57, %v405_v13  ;;  %v460_v18 = vsel %vm456_vm5, %v5063_v42, %v5062_v27  ;;  %v871_v11 = vsel %vm870_vm11, %v5065_v22, %v5064_v14  ;;  %v5067_v13 = vld [vmem:[#allocation42_spill] sm:$0xff]  ;;  %v5070_v38 = vld [vmem:[#allocation59_spill] sm:$0xff]  ;;  %v3801_v7 = vpop.permute.xlu0 %1004 }
 0x24e   :  { %v745_v21 = vadd.f32 %v733_v0, %v676_v35  ;;  %v747_v26 = vadd.f32 %v734_v50, %v678_v1  ;;  %v815_v30 = vadd.f32 %v5058_v2, %v746_v20  ;;  %v872_v29 = vsel %vm870_vm11, %v5067_v13, %v5066_v41  ;;  %v5072_v0 = vld [vmem:[#allocation50_spill] sm:$0xff]  ;;  %v5073_v1 = vld [vmem:[#allocation56_spill] sm:$0xff] }
 0x24f   :  { %v817_v54 = vadd.f32 %v5060_v37, %v748_v25  ;;  %v473_v44 = vadd.f32 %v459_v53, %v404_v24  ;;  %v940_v45 = vsel %vm939_vm12, %v5071_v19, %v5070_v38  ;;  %v941_v46 = vsel %vm939_vm12, %v5072_v0, %v3624_v5  ;;  %v5074_v25 = vld [vmem:[#allocation58_spill] sm:$0xff] }
 0x250   :  { %v814_v51 = vadd.f32 %v802_v8, %v745_v21  ;;  %v816_v58 = vadd.f32 %v803_v61, %v747_v26  ;;  %v884_v47 = vadd.f32 %v5064_v14, %v815_v30  ;;  %v475_v23 = vadd.f32 %v460_v18, %v406_v48  ;;  %v5077_v61 = vld [vmem:[#allocation14_spill] sm:$0xff]  ;;  %v5078_v30 = vld [vmem:[#allocation31_spill] sm:$0xff] }
 0x251   :  { %2719 = vset.pattern.permute.xlu1 %v5008_v36  ;;  %v3770_v62 = vpop.permute.xlu1 %937  ;;  %v528_v36 = vsel %vm525_vm6, %v5069_v15, %v5068_v28  ;;  %v886_v60 = vadd.f32 %v5066_v41, %v817_v54  ;;  %v476_v24 = vadd.f32 %v5062_v27, %v407_v52  ;;  %v1009_v20 = vsel %vm1008_vm13, %v5073_v1, %v3694_v3  ;;  %v5079_v54 = vld [vmem:[#allocation20_spill] sm:$0xff]  ;;  %v5080_v41 = vld [vmem:[#allocation33_spill] sm:$0xff]  ;;  %v5081_v13 = vld [vmem:[#allocation22_spill] sm:$0xff] }
 0x252   :  { %1846 = vperm.xlu1 %2719, %v3453_v6   ;;  %v883_v50 = vadd.f32 %v871_v11, %v814_v51  ;;  %v885_v57 = vadd.f32 %v872_v29, %v816_v58  ;;  %v953_v53 = vadd.f32 %v5070_v38, %v884_v47  ;;  %v1010_v2 = vsel %vm1008_vm13, %v5074_v25, %v3718_v40  ;;  %v5082_v58 = vld [vmem:[#allocation39_spill] sm:$0xff]  ;;  %v5083_v47 = vld [vmem:[#allocation28_spill] sm:$0xff]  ;;  %v5084_v38 = vld [vmem:[#allocation41_spill] sm:$0xff] }
 0x253   :  { %v955_v35 = vadd.f32 %v3624_v5, %v886_v60  ;;  %v5075_v48 = vmov 10   ;;  %v542_v52 = vadd.f32 %v528_v36, %v473_v44  ;;  %v543_v8 = vadd.f32 %v5068_v28, %v474_v9  ;;  %v5076_v5 = vld [vmem:[#allocation25_spill] sm:$0xff]  ;;  %v5085_v19 = vld [vmem:[#allocation30_spill] sm:$0xff] }
 0x254   :  { %v952_v37 = vadd.f32 %v940_v45, %v883_v50  ;;  %v954_v4 = vadd.f32 %v941_v46, %v885_v57  ;;  %v529_v27 = vsel %vm525_vm6, %v5077_v61, %v5076_v5  ;;  %v1022_v42 = vadd.f32 %v3694_v3, %v953_v53  ;;  %v5086_v53 = vld [vmem:[#allocation47_spill] sm:$0xff]  ;;  %v5089_v25 = vld [vmem:[#allocation38_spill] sm:$0xff]  ;;  %v5091_v61 = vld [vmem:[#allocation44_spill] sm:$0xff] }
 0x255   :  { %v1064_v16 = vpop.permute.xlu1 %1063  ;;  %v1024_v18 = vadd.f32 %v3718_v40, %v955_v35  ;;  %v545_v26 = vadd.f32 %v5076_v5, %v476_v24  ;;  %v597_v9 = vsel %vm594_vm7, %v5079_v54, %v5078_v30  ;;  %v598_v29 = vsel %vm594_vm7, %v5081_v13, %v5080_v41  ;;  %v5087_v35 = vld [vmem:[#allocation36_spill] sm:$0xff]  ;;  %v5090_v5 = vld [vmem:[#allocation55_spill] sm:$0xff] }
 0x256   :  { %2721 = vset.pattern.permute.xlu1 %v5075_v48  ;;  %v1078_v21 = vsel %vm1077_vm14, %v3689_v63, %v1064_v16  ;;  %v1021_v14 = vadd.f32 %v1009_v20, %v952_v37  ;;  %v1023_v22 = vadd.f32 %v1010_v2, %v954_v4  ;;  %v1091_v40 = vadd.f32 %v1064_v16, %v1022_v42  ;;  %v5088_v20 = vld [vmem:[#allocation49_spill] sm:$0xff] }
 0x257   :  { %1974 = vperm.xlu1 %2721, %v3403_v32   ;;  %v544_v28 = vadd.f32 %v529_v27, %v475_v23  ;;  %v612_v63 = vadd.f32 %v5078_v30, %v543_v8  ;;  %v614_v51 = vadd.f32 %v5080_v41, %v545_v26  ;;  %v666_v60 = vsel %vm663_vm8, %v5083_v47, %v5082_v58  ;;  %v5092_v42 = vld [vmem:[#allocation57_spill] sm:$0xff]  ;;  %v5095_v41 = vld [vmem:[#allocation54_spill] sm:$0xff] }
 0x258   :  { %v1090_v15 = vadd.f32 %v1078_v21, %v1021_v14  ;;  %v667_v45 = vsel %vm663_vm8, %v5085_v19, %v5084_v38  ;;  %v611_v46 = vadd.f32 %v597_v9, %v542_v52  ;;  %v735_v1 = vsel %vm732_vm9, %v5087_v35, %v5086_v53 }
 0x259   :  { %v1068_v11 = vpop.permute.xlu1 %1067  ;;  %v613_v23 = vadd.f32 %v598_v29, %v544_v28  ;;  %v681_v57 = vadd.f32 %v5082_v58, %v612_v63  ;;  %v683_v16 = vadd.f32 %v5084_v38, %v614_v51  ;;  %v736_v2 = vsel %vm732_vm9, %v5089_v25, %v5088_v20  ;;  %v3860_v29 = vld [vmem:[%s4880_s0 + $0x48] sm:$0xff] }
 0x25a   :  { %v1079_v3 = vsel %vm1077_vm14, %v3728_v17, %v1068_v11  ;;  %v1093_v44 = vadd.f32 %v1068_v11, %v1024_v18  ;;  %v1070_v17 = vpop.permute.xlu0 %1069  ;;  %v680_v8 = vadd.f32 %v666_v60, %v611_v46  ;;  %v804_v27 = vsel %vm801_vm10, %v5091_v61, %v5090_v5  ;;  %v5093_v18 = vld [vmem:[#allocation46_spill] sm:$0xff] }
 0x25b   :  { %1978 = vperm.xlu1 %2721, %v3422_v10   ;;  %v1092_v36 = vadd.f32 %v1079_v3, %v1023_v22  ;;  %v682_v37 = vadd.f32 %v667_v45, %v613_v23  ;;  %v750_v52 = vadd.f32 %v5086_v53, %v681_v57  ;;  %v752_v4 = vadd.f32 %v5088_v20, %v683_v16  ;;  %v5094_v22 = vld [vmem:[#allocation52_spill] sm:$0xff] }
 0x25c   :  { %v2592_v0 = vpack.c.bf16 %v1093_v44, %v1091_v40  ;;  %v805_v21 = vsel %vm801_vm10, %v5093_v18, %v5092_v42  ;;  %v749_v30 = vadd.f32 %v735_v1, %v680_v8  ;;  %v873_v11 = vsel %vm870_vm11, %v5094_v22, %v3648_v31 }
 0x25d   :  { %v1003_v24 = vpop.permute.xlu1 %1002  ;;  %v2594_v50 = vpack.c.bf16 %v1092_v36, %v1090_v15  ;;  %v751_v54 = vadd.f32 %v736_v2, %v682_v37  ;;  %v821_v14 = vadd.f32 %v5092_v42, %v752_v4  ;;  %v874_v13 = vsel %vm870_vm11, %v5095_v41, %v3679_v55  ;;  %v3904_v2 = vld [vmem:[%s4881_s2] sm:$0xff] }
 0x25e   :  { %2593 = vmatprep.subr.bf16.mxu0 %v2592_v0  ;;  %v1074_v26 = vpop.permute.xlu0 %1073  ;;  %v818_v3 = vadd.f32 %v804_v27, %v749_v30  ;;  %v942_v63 = vsel %vm939_vm12, %v3616_v49, %v3742_v33  ;;  %v943_v15 = vsel %vm939_vm12, %v3655_v56, %v3770_v62  ;;  %v5096_v36 = vmov 11  }
 0x25f   :  { %2722 = vset.pattern.permute.xlu1 %v5051_v59  ;;  %2595 = vmatpush1.bf16.msra.mxu0 %v2594_v50  ;;  %v819_v59 = vadd.f32 %v5090_v5, %v750_v52  ;;  %v820_v40 = vadd.f32 %v805_v21, %v751_v54  ;;  %v890_v28 = vadd.f32 %v3679_v55, %v821_v14  ;;  %v5097_v8 = vmov 12   ;;  %v3920_v5 = vld [vmem:[%s4881_s2 + $0x8] sm:$0xff]  ;;  %v3937_v21 = vld [vmem:[%s4881_s2 + $0x10] sm:$0xff]  ;;  %v3963_v14 = vld [vmem:[%s4880_s0 + $0x78] sm:$0xff] }
 0x260   :  { %1918 = vperm.xlu1 %2722, %v3434_v43   ;;  %v887_v58 = vadd.f32 %v873_v11, %v818_v3  ;;  %v1011_v38 = vsel %vm1008_vm13, %v3763_v39, %v1003_v24  ;;  %v5098_v61 = vmov 0.0   ;;  %v5099_v22 = vmov 13  }
 0x261   :  { %v1007_v9 = vpop.permute.xlu1 %1006  ;;  %v888_v44 = vadd.f32 %v3648_v31, %v819_v59  ;;  %v889_v47 = vadd.f32 %v874_v13, %v820_v40  ;;  %v959_v49 = vadd.f32 %v3770_v62, %v890_v28  ;;  %v3958_v59 = vld [vmem:[%s4881_s2 + $0x18] sm:$0xff] }
 0x262   :  { %v1012_v56 = vsel %vm1008_vm13, %v3801_v7, %v1007_v9  ;;  %v956_v19 = vadd.f32 %v942_v63, %v887_v58 }
 0x263   :  { %v957_v55 = vadd.f32 %v3742_v33, %v888_v44  ;;  %v958_v45 = vadd.f32 %v943_v15, %v889_v47  ;;  %v1028_v46 = vadd.f32 %v1007_v9, %v959_v49  ;;  %v5100_v15 = vmov 14  }
 0x264   :  { %2723 = vset.pattern.permute.xlu1 %v5096_v36  ;;  %v3871_v51 = vpop.permute.xlu0 %1362  ;;  %v1025_v50 = vadd.f32 %v1011_v38, %v956_v19 }
 0x265   :  { %2042 = vperm.xlu1 %2723, %v3403_v32   ;;  %v1072_v60 = vpop.permute.xlu1 %1071  ;;  %v1378_v31 = vmul.f32 %v3860_v29, %v3871_v51  ;;  %v1026_v0 = vadd.f32 %v1003_v24, %v957_v55  ;;  %v1027_v57 = vadd.f32 %v1012_v56, %v958_v45  ;;  %v3892_v24 = vld [vmem:[%s4880_s0 + $0x58] sm:$0xff]  ;;  %v5101_v56 = vmov 15  }
 0x266   :  { %v1080_v23 = vsel %vm1077_vm14, %v1070_v17, %v1072_v60 }
 0x267   :  { %1395 = vrot.lane.b32.xlu0 %v1378_v31, %s2764_s5  ;;  %v1095_v16 = vadd.f32 %v1072_v60, %v1026_v0  ;;  %v1094_v7 = vadd.f32 %v1080_v23, %v1025_v50 }
 0x269   :  { %2725 = vset.pattern.permute.xlu1 %v5075_v48  ;;  %v1076_v33 = vpop.permute.xlu1 %1075  ;;  %v3885_v62 = vpop.permute.xlu0 %1434 }
 0x26a   :  { %v1081_v39 = vsel %vm1077_vm14, %v1074_v26, %v1076_v33  ;;  %v1097_v53 = vadd.f32 %v1076_v33, %v1028_v46  ;;  %1982 = vperm.xlu1 %2725, %v3453_v6   ;;  %v1448_v27 = vmul.f32 %v3892_v24, %v3885_v62  ;;  %v3942_v26 = vld [vmem:[%s4880_s0 + $0x68] sm:$0xff] }
 0x26b   :  { %v1096_v35 = vadd.f32 %v1081_v39, %v1027_v57 }
 0x26c   :  { %v2596_v17 = vpack.c.bf16 %v1097_v53, %v1095_v16 }
 0x26d   :  { %v3894_v1 = vpop.permute.xlu1 %1366  ;;  %v2598_v48 = vpack.c.bf16 %v1096_v35, %v1094_v7  ;;  %v3896_v20 = vpop.permute.xlu0 %1442 }
 0x26e   :  { %v1380_v25 = vmul.f32 %v3892_v24, %v3894_v1  ;;  %1986 = vperm.xlu1 %2725, %v3434_v43   ;;  %2597 = vmatprep.subr.bf16.mxu0 %v2596_v17  ;;  %v1452_v47 = vmul.f32 %v3963_v14, %v3896_v20 }
 0x26f   :  { %2599 = vmatpush1.bf16.msra.mxu0 %v2598_v48  ;;  %v4065_v48 = vld [vmem:[%s4880_s0 + $0x40] sm:$0xff] }
 0x270   :  { %1399 = vrot.lane.b32.xlu0 %v1380_v25, %s2764_s5  ;;  %v1377_v25 = vmul.f32 %v4065_v48, %v3871_v51 }
 0x272   :  { %2726 = vset.pattern.permute.xlu1 %v5097_v8  ;;  %v3908_v37 = vpop.permute.xlu1 %1430  ;;  %v3910_v52 = vpop.permute.xlu0 %1498  ;;  %2564 = vmatmul.mubr.msk.f32.vlgmr.msra.gmra.mrb[0].mxu0 %vm1118_vm15, %v3904_v2 }
 0x273   :  { %v1446_v4 = vmul.f32 %v3860_v29, %v3908_v37  ;;  %2114 = vperm.xlu1 %2726, %v3422_v10   ;;  %1197 = vmatprep.mubr.f32.mxu0 %v5098_v61  ;;  %v1514_v3 = vmul.f32 %v3860_v29, %v3910_v52 }
 0x275   :  { %1463 = vrot.lane.b32.xlu0 %v1446_v4, %s2765_s14  ;;  %v4082_v4 = vld [vmem:[%s4880_s0 + $0x50] sm:$0xff] }
 0x276   :  { %v3926_v42 = vpop.permute.xlu0 %1506  ;;  %2565 = vmatmul.mubr.msk.f32.gmra.mrb[2].mxu0 %vm1118_vm15, %v3920_v5 }
 0x277   :  { %2727 = vset.pattern.permute.xlu1 %v5096_v36  ;;  %v3931_v18 = vpop.permute.xlu1 %1370  ;;  %1203 = vmatprep.mubr.f32.mxu0 %v5098_v61  ;;  %v1518_v45 = vmul.f32 %v3942_v26, %v3926_v42 }
 0x278   :  { %2050 = vperm.xlu1 %2727, %v3453_v6   ;;  %v1382_v30 = vmul.f32 %v3942_v26, %v3931_v18 }
 0x279   :  { %1467 = vrot.lane.b32.xlu0 %v1448_v27, %s2765_s14 }
 0x27a   :  { %2566 = vmatmul.mubr.msk.f32.gmra.mrb[4].mxu0 %vm1118_vm15, %v3937_v21 }
 0x27b   :  { %v3950_v54 = vpop.permute.xlu1 %1374  ;;  %v3952_v9 = vpop.permute.xlu0 %1638  ;;  %1209 = vmatprep.mubr.f32.mxu0 %v5098_v61 }
 0x27c   :  { %2729 = vset.pattern.permute.xlu1 %v5099_v22  ;;  %v1384_v11 = vmul.f32 %v3963_v14, %v3950_v54  ;;  %v1652_v16 = vmul.f32 %v3892_v24, %v3952_v9 }
 0x27d   :  { %2178 = vperm.xlu1 %2729, %v3403_v32   ;;  %1403 = vrot.lane.b32.xlu0 %v1382_v30, %s2764_s5 }
 0x27e   :  { %2567 = vmatmul.mubr.msk.f32.gmra.mrb[6].mxu0 %vm1118_vm15, %v3958_v59 }
 0x27f   :  { %v3972_v41 = vpop.permute.xlu0 %1646  ;;  %2542 = vmatprep.mubr.f32.mxu0 %v5098_v61 }
 0x280   :  { %v3975_v13 = vpop.permute.xlu1 %1502 }
 0x281   :  { %2182 = vperm.xlu1 %2729, %v3422_v10   ;;  %1407 = vrot.lane.b32.xlu0 %v1384_v11, %s2764_s5  ;;  %v1516_v28 = vmul.f32 %v3892_v24, %v3975_v13  ;;  %v1445_v11 = vmul.f32 %v4065_v48, %v3908_v37 }
 0x284   :  { %v3981_v40 = vpop.permute.xlu0 %1702 }
 0x285   :  { %2730 = vset.pattern.permute.xlu1 %v5097_v8  ;;  %1531 = vrot.lane.b32.xlu0 %v1514_v3, %s2766_s15  ;;  %v3985_v44 = vpop.permute.xlu1 %1438 }
 0x286   :  { %2122 = vperm.xlu1 %2730, %v3434_v43   ;;  %v1450_v58 = vmul.f32 %v3942_v26, %v3985_v44 }
 0x288   :  { %v3990_v63 = vpop.permute.xlu0 %1710 }
 0x289   :  { %1535 = vrot.lane.b32.xlu0 %v1516_v28, %s2766_s15 }
 0x28a   :  { %2731 = vset.pattern.permute.xlu1 %v5100_v15  ;;  %v3994_v36 = vpop.permute.xlu1 %1566 }
 0x28b   :  { %2246 = vperm.xlu1 %2731, %v3403_v32   ;;  %v1582_v55 = vmul.f32 %v3860_v29, %v3994_v36 }
 0x28d   :  { %1471 = vrot.lane.b32.xlu0 %v1450_v58, %s2765_s14  ;;  %v4004_v31 = vpop.permute.xlu0 %1842 }
 0x28e   :  { %v4002_v60 = vpop.permute.xlu1 %1570 }
 0x28f   :  { %2732 = vset.pattern.permute.xlu1 %v5099_v22  ;;  %v1584_v38 = vmul.f32 %v3892_v24, %v4002_v60 }
 0x290   :  { %2186 = vperm.xlu1 %2732, %v3453_v6  }
 0x291   :  { %1475 = vrot.lane.b32.xlu0 %v1452_v47, %s2765_s14  ;;  %v4014_v32 = vpop.permute.xlu0 %1850 }
 0x293   :  { %v4011_v49 = vpop.permute.xlu1 %1510 }
 0x294   :  { %2190 = vperm.xlu1 %2732, %v3434_v43   ;;  %v1520_v23 = vmul.f32 %v3963_v14, %v4011_v49 }
 0x295   :  { %1599 = vrot.lane.b32.xlu0 %v1582_v55, %s2767_s16 }
 0x296   :  { %v4026_v0 = vpop.permute.xlu0 %1906 }
 0x298   :  { %2735 = vset.pattern.permute.xlu1 %v5101_v56  ;;  %v4020_v19 = vpop.permute.xlu1 %1634 }
 0x299   :  { %2318 = vperm.xlu1 %2735, %v3422_v10   ;;  %1603 = vrot.lane.b32.xlu0 %v1584_v38, %s2767_s16  ;;  %v1650_v33 = vmul.f32 %v3860_v29, %v4020_v19 }
 0x29a   :  { %v4035_v50 = vpop.permute.xlu0 %1914 }
 0x29d   :  { %2736 = vset.pattern.permute.xlu1 %v5100_v15  ;;  %1539 = vrot.lane.b32.xlu0 %v1518_v45, %s2766_s15  ;;  %v4030_v46 = vpop.permute.xlu1 %1574 }
 0x29e   :  { %2254 = vperm.xlu1 %2736, %v3453_v6   ;;  %v1586_v7 = vmul.f32 %v3942_v26, %v4030_v46 }
 0x29f   :  { %v4049_v53 = vpop.permute.xlu0 %2046 }
 0x2a1   :  { %1543 = vrot.lane.b32.xlu0 %v1520_v23, %s2766_s15  ;;  %v4038_v57 = vpop.permute.xlu1 %1578 }
 0x2a2   :  { %2737 = vset.pattern.permute.xlu1 %v5101_v56 }
 0x2a3   :  { %2322 = vperm.xlu1 %2737, %v3453_v6   ;;  %v4059_v17 = vpop.permute.xlu0 %2054 }
 0x2a5   :  { %1667 = vrot.lane.b32.xlu0 %v1650_v33, %s2768_s17 }
 0x2a6   :  { %v4047_v39 = vpop.permute.xlu1 %1706 }
 0x2a7   :  { %2326 = vperm.xlu1 %2737, %v3434_v43   ;;  %v1588_v43 = vmul.f32 %v3963_v14, %v4038_v57  ;;  %v1720_v51 = vmul.f32 %v3892_v24, %v4047_v39 }
 0x2a8   :  { %v4077_v8 = vpop.permute.xlu0 %2110 }
 0x2a9   :  { %1671 = vrot.lane.b32.xlu0 %v1652_v16, %s2768_s17  ;;  %v1515_v16 = vmul.f32 %v4082_v4, %v3975_v13  ;;  %v1855_v13 = vmul.f32 %v4082_v4, %v4004_v31 }
 0x2ab   :  { %2739 = vset.pattern.permute.xlu1 %v5035_v34  ;;  %v4056_v35 = vpop.permute.xlu1 %1642 }
 0x2ac   :  { %1340 = vperm.xlu1 %2739, %v3422_v10   ;;  %v1718_v10 = vmul.f32 %v3860_v29, %v3981_v40  ;;  %v4094_v30 = vpop.permute.xlu0 %2118 }
 0x2ad   :  { %1607 = vrot.lane.b32.xlu0 %v1586_v7, %s2767_s16 }
 0x2b0   :  { %1345 = vperm.xlu1 %2739, %v3453_v6   ;;  %v4072_v34 = vpop.permute.xlu1 %1770  ;;  %v1379_v6 = vmul.f32 %v4082_v4, %v3894_v1  ;;  %v4106_v1 = vld [vmem:[%s4880_s0 + $0x70] sm:$0xff] }
 0x2b1   :  { %1611 = vrot.lane.b32.xlu0 %v1588_v43, %s2767_s16  ;;  %v1655_v3 = vmul.f32 %v4106_v1, %v3972_v41  ;;  %v4114_v15 = vpop.permute.xlu0 %2314  ;;  %v1785_v58 = vmul.f32 %v4065_v48, %v4072_v34  ;;  %v1383_v55 = vmul.f32 %v4106_v1, %v3950_v54 }
 0x2b2   :  { %5102 = vst [vmem:[#allocation3_spill] sm:$0xff] %v4114_v15 }
 0x2b4   :  { %1393 = vrot.lane.b32.xlu1 %v1377_v25, %s2764_s5  ;;  %v4085_v27 = vpop.permute.xlu1 %1774 }
 0x2b5   :  { %1735 = vrot.lane.b32.xlu0 %v1718_v10, %s2777_s18  ;;  %2740 = vset.pattern.permute.xlu1 %v2788_v12  ;;  %v1447_v12 = vmul.f32 %v4082_v4, %v3885_v62  ;;  %v4119_v62 = vld [vmem:[%s4880_s0 + $0x60] sm:$0xff]  ;;  %v1787_v38 = vmul.f32 %v4082_v4, %v4085_v27 }
 0x2b6   :  { %v1381_v37 = vmul.f32 %v4119_v62, %v3931_v18  ;;  %v4130_v47 = vpop.permute.xlu0 %2250  ;;  %v1513_v18 = vmul.f32 %v4065_v48, %v3910_v52  ;;  %v1721_v23 = vmul.f32 %v4119_v62, %v3990_v63  ;;  %v1449_v25 = vmul.f32 %v4119_v62, %v3985_v44 }
 0x2b7   :  { %5103 = vst [vmem:[#allocation2_spill] sm:$0xff] %v4130_v47  ;;  %v1581_v44 = vmul.f32 %v4065_v48, %v3994_v36  ;;  %v1517_v36 = vmul.f32 %v4119_v62, %v3926_v42 }
 0x2b8   :  { %1397 = vrot.lane.b32.xlu1 %v1379_v6, %s2764_s5  ;;  %v1451_v6 = vmul.f32 %v4106_v1, %v3896_v20  ;;  %v1583_v20 = vmul.f32 %v4082_v4, %v4002_v60 }
 0x2b9   :  { %1739 = vrot.lane.b32.xlu0 %v1720_v51, %s2777_s18  ;;  %v4097_v22 = vpop.permute.xlu1 %1714 }
 0x2ba   :  { %v4145_v33 = vpop.permute.xlu0 %2258  ;;  %v1723_v52 = vmul.f32 %v4106_v1, %v4097_v22 }
 0x2bb   :  { %5104 = vst [vmem:[#allocation4_spill] sm:$0xff] %v4145_v33 }
 0x2bc   :  { %1461 = vrot.lane.b32.xlu1 %v1445_v11, %s2765_s14 }
 0x2bd   :  { %1105 = vperm.xlu0 %2741, %v3920_v5  }
 0x2be   :  { %v4112_v28 = vpop.permute.xlu1 %1838 }
 0x2bf   :  { %v4156_v7 = vpop.permute.xlu0 %1335  ;;  %v1853_v10 = vmul.f32 %v4065_v48, %v4112_v28 }
 0x2c0   :  { %1465 = vrot.lane.b32.xlu1 %v1447_v12, %s2765_s14 }
 0x2c1   :  { %1677 = vrot.lane.b32.xlu0 %v1655_v3, %s2768_s17 }
 0x2c3   :  { %v4127_v5 = vpop.permute.xlu1 %1778  ;;  %v4173_v11 = vpop.permute.xlu0 %1350 }
 0x2c4   :  { %1401 = vrot.lane.b32.xlu1 %v1381_v37, %s2764_s5  ;;  %v1789_v37 = vmul.f32 %v4119_v62, %v4127_v5 }
 0x2c5   :  { %1801 = vrot.lane.b32.xlu0 %v1785_v58, %s2778_s19 }
 0x2c7   :  { %v4137_v45 = vpop.permute.xlu1 %1782 }
 0x2c8   :  { %1405 = vrot.lane.b32.xlu1 %v1383_v55, %s2764_s5 }
 0x2c9   :  { %1805 = vrot.lane.b32.xlu0 %v1787_v38, %s2778_s19  ;;  %v1921_v38 = vmul.f32 %v4065_v48, %v4026_v0 }
 0x2cc   :  { %1529 = vrot.lane.b32.xlu1 %v1513_v18, %s2766_s15  ;;  %v4148_v54 = vpop.permute.xlu1 %1910  ;;  %v1519_v18 = vmul.f32 %v4106_v1, %v4011_v49 }
 0x2cd   :  { %1741 = vrot.lane.b32.xlu0 %v1721_v23, %s2777_s18 }
 0x2d0   :  { %1533 = vrot.lane.b32.xlu1 %v1515_v16, %s2766_s15  ;;  %v1649_v16 = vmul.f32 %v4065_v48, %v4020_v19  ;;  %v1859_v19 = vmul.f32 %v4106_v1, %v4014_v32 }
 0x2d1   :  { %1745 = vrot.lane.b32.xlu0 %v1723_v52, %s2777_s18  ;;  %v4159_v43 = vpop.permute.xlu1 %1846  ;;  %v1923_v52 = vmul.f32 %v4082_v4, %v4148_v54 }
 0x2d4   :  { %1469 = vrot.lane.b32.xlu1 %v1449_v25, %s2765_s14 }
 0x2d5   :  { %1869 = vrot.lane.b32.xlu0 %v1853_v10, %s2779_s20  ;;  %v1651_v10 = vmul.f32 %v4082_v4, %v3952_v9  ;;  %v1585_v9 = vmul.f32 %v4119_v62, %v4030_v46  ;;  %v1717_v46 = vmul.f32 %v4065_v48, %v3981_v40  ;;  %v1719_v40 = vmul.f32 %v4082_v4, %v4047_v39 }
 0x2d6   :  { %v4171_v51 = vpop.permute.xlu1 %1974  ;;  %v1653_v39 = vmul.f32 %v4119_v62, %v4056_v35 }
 0x2d8   :  { %1473 = vrot.lane.b32.xlu1 %v1451_v6, %s2765_s14 }
 0x2d9   :  { %1873 = vrot.lane.b32.xlu0 %v1855_v13, %s2779_s20  ;;  %v4182_v3 = vpop.permute.xlu0 %1395  ;;  %v1857_v13 = vmul.f32 %v4119_v62, %v4159_v43 }
 0x2da   :  { %v4179_v12 = vpop.permute.xlu1 %1978 }
 0x2dc   :  { %1597 = vrot.lane.b32.xlu1 %v1581_v44, %s2767_s16 }
 0x2dd   :  { %1110 = vperm.xlu0 %2741, %v3937_v21   ;;  %v1791_v21 = vmul.f32 %v4106_v1, %v4137_v45 }
 0x2df   :  { %v4189_v58 = vpop.permute.xlu1 %1918 }
 0x2e0   :  { %1601 = vrot.lane.b32.xlu1 %v1583_v20, %s2767_s16 }
 0x2e1   :  { %1809 = vrot.lane.b32.xlu0 %v1789_v37, %s2778_s19  ;;  %v1587_v37 = vmul.f32 %v4106_v1, %v4038_v57 }
 0x2e2   :  { %v4195_v55 = vpop.permute.xlu0 %1399 }
 0x2e4   :  { %1537 = vrot.lane.b32.xlu1 %v1517_v36, %s2766_s15  ;;  %v4200_v60 = vpop.permute.xlu1 %2042  ;;  %v1989_v36 = vmul.f32 %v4065_v48, %v4171_v51 }
 0x2e5   :  { %1813 = vrot.lane.b32.xlu0 %v1791_v21, %s2778_s19 }
 0x2e7   :  { %v4207_v23 = vpop.permute.xlu0 %1463 }
 0x2e8   :  { %1541 = vrot.lane.b32.xlu1 %v1519_v18, %s2766_s15  ;;  %v1991_v18 = vmul.f32 %v4082_v4, %v4179_v12 }
 0x2e9   :  { %1937 = vrot.lane.b32.xlu0 %v1921_v38, %s2780_s21  ;;  %v4211_v42 = vpop.permute.xlu1 %1982 }
 0x2eb   :  { %v4217_v25 = vpop.permute.xlu0 %1467 }
 0x2ec   :  { %1665 = vrot.lane.b32.xlu1 %v1649_v16, %s2768_s17 }
 0x2ed   :  { %1941 = vrot.lane.b32.xlu0 %v1923_v52, %s2780_s21  ;;  %v4223_v49 = vpop.permute.xlu1 %1986  ;;  %v1925_v52 = vmul.f32 %v4119_v62, %v4035_v50 }
 0x2ef   :  { %v4227_v6 = vpop.permute.xlu0 %1403 }
 0x2f0   :  { %1669 = vrot.lane.b32.xlu1 %v1651_v10, %s2768_s17 }
 0x2f1   :  { %1877 = vrot.lane.b32.xlu0 %v1857_v13, %s2779_s20 }
 0x2f2   :  { %v4235_v44 = vpop.permute.xlu1 %2114 }
 0x2f3   :  { %v4237_v20 = vpop.permute.xlu0 %1407 }
 0x2f4   :  { %1605 = vrot.lane.b32.xlu1 %v1585_v9, %s2767_s16 }
 0x2f5   :  { %1881 = vrot.lane.b32.xlu0 %v1859_v19, %s2779_s20  ;;  %v1927_v19 = vmul.f32 %v4106_v1, %v4189_v58 }
 0x2f7   :  { %v4245_v21 = vpop.permute.xlu0 %1531  ;;  %v4247_v38 = vpop.permute.xlu1 %2050 }
 0x2f8   :  { %5105 = vst [vmem:[#allocation5_spill] sm:$0xff] %v4245_v21  ;;  %1609 = vrot.lane.b32.xlu1 %v1587_v37, %s2767_s16  ;;  %v2129_v21 = vmul.f32 %v4119_v62, %v4094_v30 }
 0x2f9   :  { %2005 = vrot.lane.b32.xlu0 %v1989_v36, %s2781_s22  ;;  %v2057_v36 = vmul.f32 %v4065_v48, %v4200_v60 }
 0x2fb   :  { %v4255_v16 = vpop.permute.xlu0 %1535 }
 0x2fc   :  { %1733 = vrot.lane.b32.xlu1 %v1717_v46, %s2777_s18  ;;  %v4258_v57 = vpop.permute.xlu1 %2178 }
 0x2fd   :  { %2009 = vrot.lane.b32.xlu0 %v1991_v18, %s2781_s22  ;;  %v2059_v18 = vmul.f32 %v4082_v4, %v4049_v53 }
 0x2ff   :  { %v4265_v10 = vpop.permute.xlu0 %1471 }
 0x300   :  { %1737 = vrot.lane.b32.xlu1 %v1719_v40, %s2777_s18  ;;  %v4268_v13 = vpop.permute.xlu1 %2182 }
 0x301   :  { %1945 = vrot.lane.b32.xlu0 %v1925_v52, %s2780_s21 }
 0x303   :  { %v4273_v9 = vpop.permute.xlu0 %1475 }
 0x304   :  { %5106 = vst [vmem:[#allocation6_spill] sm:$0xff] %v4273_v9  ;;  %1100 = vperm.xlu1 %2740, %v3904_v2   ;;  %v1654_v2 = vmul.f32 %v3942_v26, %v4056_v35  ;;  %v1786_v35 = vmul.f32 %v3860_v29, %v4072_v34 }
 0x305   :  { %1949 = vrot.lane.b32.xlu0 %v1927_v19, %s2780_s21  ;;  %v4277_v37 = vpop.permute.xlu1 %2122  ;;  %v1656_v19 = vmul.f32 %v3963_v14, %v3972_v41 }
 0x307   :  { %v4283_v46 = vpop.permute.xlu0 %1599 }
 0x308   :  { %5107 = vst [vmem:[#allocation7_spill] sm:$0xff] %v4283_v46  ;;  %1673 = vrot.lane.b32.xlu1 %v1653_v39, %s2768_s17  ;;  %v1993_v39 = vmul.f32 %v4119_v62, %v4211_v42  ;;  %v2125_v46 = vmul.f32 %v4065_v48, %v4077_v8 }
 0x309   :  { %2073 = vrot.lane.b32.xlu0 %v2057_v36, %s2782_s23 }
 0x30a   :  { %v4291_v52 = vpop.permute.xlu1 %2246 }
 0x30b   :  { %v4293_v40 = vpop.permute.xlu0 %1603 }
 0x30c   :  { %1675 = vrot.lane.b32.xlu1 %v1654_v2, %s2768_s17 }
 0x30d   :  { %2077 = vrot.lane.b32.xlu0 %v2059_v18, %s2782_s23  ;;  %v1995_v18 = vmul.f32 %v4106_v1, %v4223_v49 }
 0x30f   :  { %v4301_v61 = vpop.permute.xlu0 %1539  ;;  %v4303_v36 = vpop.permute.xlu1 %2186 }
 0x310   :  { %5108 = vst [vmem:[#allocation8_spill] sm:$0xff] %v4303_v36  ;;  %1679 = vrot.lane.b32.xlu1 %v1656_v19, %s2768_s17  ;;  %v1788_v19 = vmul.f32 %v3892_v24, %v4085_v27  ;;  %v1724_v27 = vmul.f32 %v3963_v14, %v4097_v22  ;;  %v1856_v22 = vmul.f32 %v3892_v24, %v4004_v31 }
 0x311   :  { %2013 = vrot.lane.b32.xlu0 %v1993_v39, %s2781_s22  ;;  %v1722_v39 = vmul.f32 %v3942_v26, %v3990_v63  ;;  %v1854_v63 = vmul.f32 %v3860_v29, %v4112_v28  ;;  %v2195_v28 = vmul.f32 %v4082_v4, %v4268_v13  ;;  %v1790_v31 = vmul.f32 %v3942_v26, %v4127_v5 }
 0x312   :  { %v1922_v5 = vmul.f32 %v3860_v29, %v4026_v0 }
 0x313   :  { %v4311_v2 = vpop.permute.xlu1 %2190  ;;  %v4313_v41 = vpop.permute.xlu0 %1543 }
 0x314   :  { %5109 = vst [vmem:[#allocation19_spill] sm:$0xff] %v4311_v2  ;;  %5110 = vst [vmem:[#allocation11_spill] sm:$0xff] %v4313_v41  ;;  %1803 = vrot.lane.b32.xlu1 %v1786_v35, %s2778_s19  ;;  %v2127_v35 = vmul.f32 %v4082_v4, %v4235_v44 }
 0x315   :  { %2017 = vrot.lane.b32.xlu0 %v1995_v18, %s2781_s22 }
 0x317   :  { %v4327_v41 = vpop.permute.xlu0 %1667 }
 0x318   :  { %1807 = vrot.lane.b32.xlu1 %v1788_v19, %s2778_s19  ;;  %v4322_v34 = vpop.permute.xlu1 %2318  ;;  %5112 = vst [vmem:[#allocation12_spill] sm:$0xff] %v4327_v41 }
 0x319   :  { %5111 = vst [vmem:[#allocation21_spill] sm:$0xff] %v4322_v34  ;;  %2141 = vrot.lane.b32.xlu0 %v2125_v46, %s2783_s24  ;;  %v2061_v46 = vmul.f32 %v4119_v62, %v4247_v38 }
 0x31b   :  { %v4339_v19 = vpop.permute.xlu0 %1671 }
 0x31c   :  { %1743 = vrot.lane.b32.xlu1 %v1722_v39, %s2777_s18 }
 0x31d   :  { %2145 = vrot.lane.b32.xlu0 %v2127_v35, %s2783_s24  ;;  %v4333_v18 = vpop.permute.xlu1 %2254  ;;  %v2063_v35 = vmul.f32 %v4106_v1, %v4059_v17 }
 0x31f   :  { %v4353_v41 = vpop.permute.xlu0 %1607 }
 0x320   :  { %1747 = vrot.lane.b32.xlu1 %v1724_v27, %s2777_s18  ;;  %5114 = vst [vmem:[#allocation16_spill] sm:$0xff] %v4353_v41  ;;  %v1858_v41 = vmul.f32 %v3942_v26, %v4159_v43 }
 0x321   :  { %2081 = vrot.lane.b32.xlu0 %v2061_v46, %s2782_s23  ;;  %v2193_v46 = vmul.f32 %v4065_v48, %v4258_v57 }
 0x322   :  { %v4345_v39 = vpop.permute.xlu1 %2322 }
 0x323   :  { %5113 = vst [vmem:[#allocation27_spill] sm:$0xff] %v4345_v39 }
 0x324   :  { %1871 = vrot.lane.b32.xlu1 %v1854_v63, %s2779_s20 }
 0x325   :  { %2085 = vrot.lane.b32.xlu0 %v2063_v35, %s2782_s23  ;;  %v4365_v35 = vpop.permute.xlu0 %1611 }
 0x326   :  { %v4355_v27 = vpop.permute.xlu1 %2326  ;;  %5116 = vst [vmem:[#allocation18_spill] sm:$0xff] %v4365_v35 }
 0x327   :  { %5115 = vst [vmem:[#allocation29_spill] sm:$0xff] %v4355_v27 }
 0x328   :  { %1875 = vrot.lane.b32.xlu1 %v1856_v22, %s2779_s20 }
 0x329   :  { %2209 = vrot.lane.b32.xlu0 %v2193_v46, %s2784_s25  ;;  %v1792_v46 = vmul.f32 %v3963_v14, %v4137_v45  ;;  %v4379_v35 = vpop.permute.xlu0 %1735 }
 0x32a   :  { %5117 = vst [vmem:[#allocation35_spill] sm:$0xff] %v4379_v35  ;;  %v1924_v35 = vmul.f32 %v3892_v24, %v4148_v54 }
 0x32b   :  { %v4363_v63 = vpop.permute.xlu1 %1340 }
 0x32c   :  { %1115 = vperm.xlu1 %2740, %v3958_v59   ;;  %v2131_v59 = vmul.f32 %v4106_v1, %v4277_v37 }
 0x32d   :  { %2213 = vrot.lane.b32.xlu0 %v2195_v28, %s2784_s25  ;;  %v4393_v45 = vpop.permute.xlu0 %1739 }
 0x32f   :  { %v4373_v22 = vpop.permute.xlu1 %1345 }
 0x330   :  { %1811 = vrot.lane.b32.xlu1 %v1790_v31, %s2778_s19 }
 0x331   :  { %2149 = vrot.lane.b32.xlu0 %v2129_v21, %s2783_s24  ;;  %v2261_v21 = vmul.f32 %v4065_v48, %v4291_v52 }
 0x333   :  { %v4383_v28 = vpop.permute.xlu1 %1393 }
 0x334   :  { %1815 = vrot.lane.b32.xlu1 %v1792_v46, %s2778_s19  ;;  %v2263_v46 = vmul.f32 %v4082_v4, %v4130_v47  ;;  %v1860_v47 = vmul.f32 %v3963_v14, %v4014_v32 }
 0x335   :  { %2153 = vrot.lane.b32.xlu0 %v2131_v59, %s2783_s24 }
 0x337   :  { %v4391_v31 = vpop.permute.xlu1 %1397 }
 0x338   :  { %1939 = vrot.lane.b32.xlu1 %v1922_v5, %s2780_s21  ;;  %v2197_v5 = vmul.f32 %v4119_v62, %v4303_v36 }
 0x339   :  { %2277 = vrot.lane.b32.xlu0 %v2261_v21, %s2785_s26 }
 0x33b   :  { %v4401_v59 = vpop.permute.xlu1 %1461 }
 0x33c   :  { %5118 = vst [vmem:[#allocation24_spill] sm:$0xff] %v4401_v59  ;;  %v4403_v0 = vpop.permute.xlu0 %1105  ;;  %1943 = vrot.lane.b32.xlu1 %v1924_v35, %s2780_s21  ;;  %v2199_v35 = vmul.f32 %v4106_v1, %v4311_v2 }
 0x33d   :  { %5119 = vst [vmem:[#allocation37_spill] sm:$0xff] %v4403_v0  ;;  %2281 = vrot.lane.b32.xlu0 %v2263_v46, %s2785_s26 }
 0x33f   :  { %v4411_v21 = vpop.permute.xlu1 %1465 }
 0x340   :  { %1879 = vrot.lane.b32.xlu1 %v1858_v41, %s2779_s20  ;;  %v4414_v54 = vpop.permute.xlu0 %1677  ;;  %v1990_v41 = vmul.f32 %v3860_v29, %v4171_v51  ;;  %v2331_v51 = vmul.f32 %v4082_v4, %v4322_v34 }
 0x341   :  { %5120 = vst [vmem:[#allocation26_spill] sm:$0xff] %v4414_v54  ;;  %2217 = vrot.lane.b32.xlu0 %v2197_v5, %s2784_s25  ;;  %v2329_v5 = vmul.f32 %v4065_v48, %v4114_v15 }
 0x343   :  { %v4421_v46 = vpop.permute.xlu1 %1401 }
 0x344   :  { %1883 = vrot.lane.b32.xlu1 %v1860_v47, %s2779_s20  ;;  %v4433_v32 = vpop.permute.xlu0 %1801 }
 0x345   :  { %2221 = vrot.lane.b32.xlu0 %v2199_v35, %s2784_s25  ;;  %v4425_v43 = vpop.f32.mrb[0].mxu0  ;;  %5121 = vst [vmem:[#allocation15_spill] sm:$0xff] %v4433_v32  ;;  %v1992_v35 = vmul.f32 %v3892_v24, %v4179_v12  ;;  %v2265_v12 = vmul.f32 %v4119_v62, %v4333_v18 }
 0x346   :  { %v4429_v54 = vpop.f32.mrb[1].mxu0 }
 0x347   :  { %v4435_v36 = vpop.permute.xlu1 %1405 }
 0x348   :  { %2007 = vrot.lane.b32.xlu1 %v1990_v41, %s2781_s22  ;;  %v4450_v15 = vpop.permute.xlu0 %1805 }
 0x349   :  { %2345 = vrot.lane.b32.xlu0 %v2329_v5, %s2786_s27  ;;  %v4439_v47 = vpop.f32.mrb[2].mxu0  ;;  %v1926_v5 = vmul.f32 %v3942_v26, %v4035_v50  ;;  %v2267_v50 = vmul.f32 %v4106_v1, %v4145_v33 }
 0x34a   :  { %v4443_v2 = vpop.f32.mrb[3].mxu0 }
 0x34b   :  { %v4447_v9 = vpop.permute.xlu1 %1529 }
 0x34c   :  { %2011 = vrot.lane.b32.xlu1 %v1992_v35, %s2781_s22 }
 0x34d   :  { %2349 = vrot.lane.b32.xlu0 %v2331_v51, %s2786_s27  ;;  %v4453_v41 = vpop.f32.mrb[4].mxu0  ;;  %v1928_v51 = vmul.f32 %v3963_v14, %v4189_v58 }
 0x34e   :  { %5122 = vst [vmem:[#allocation9_spill] sm:$0xff] %v4453_v41  ;;  %v4457_v32 = vpop.f32.mrb[5].mxu0  ;;  %v4471_v41 = vpop.permute.xlu0 %1741 }
 0x34f   :  { %5123 = vst [vmem:[#allocation43_spill] sm:$0xff] %v4457_v32  ;;  %v1534_v59 = vpop.permute.xlu1 %1533 }
 0x350   :  { %1947 = vrot.lane.b32.xlu1 %v1926_v5, %s2780_s21  ;;  %v2058_v5 = vmul.f32 %v3860_v29, %v4200_v60  ;;  %v1994_v60 = vmul.f32 %v3942_v26, %v4211_v42  ;;  %v2126_v42 = vmul.f32 %v3860_v29, %v4077_v8 }
 0x351   :  { %2285 = vrot.lane.b32.xlu0 %v2265_v12, %s2785_s26  ;;  %v4463_v35 = vpop.f32.mrb[6].mxu0  ;;  %v2333_v12 = vmul.f32 %v4119_v62, %v4345_v39 }
 0x352   :  { %5124 = vst [vmem:[#allocation32_spill] sm:$0xff] %v4463_v35  ;;  %v4467_v34 = vpop.f32.mrb[7].mxu0  ;;  %v2060_v35 = vmul.f32 %v3892_v24, %v4049_v53 }
 0x353   :  { %5125 = vst [vmem:[#allocation45_spill] sm:$0xff] %v4467_v34  ;;  %v4473_v32 = vpop.permute.xlu1 %1469  ;;  %v4484_v34 = vpop.permute.xlu0 %1745 }
 0x354   :  { %1951 = vrot.lane.b32.xlu1 %v1928_v51, %s2780_s21  ;;  %v2335_v51 = vmul.f32 %v4106_v1, %v4355_v27 }
 0x355   :  { %2289 = vrot.lane.b32.xlu0 %v2267_v50, %s2785_s26 }
 0x357   :  { %v4481_v58 = vpop.permute.xlu1 %1473 }
 0x358   :  { %2075 = vrot.lane.b32.xlu1 %v2058_v5, %s2782_s23  ;;  %v4500_v5 = vld [vmem:[%s4882_s3] sm:$0xff] }
 0x359   :  { %2353 = vrot.lane.b32.xlu0 %v2333_v12, %s2786_s27  ;;  %5126 = vst [vmem:[#allocation34_spill] sm:$0xff] %v4500_v5  ;;  %v4502_v12 = vpop.permute.xlu0 %1869 }
 0x35a   :  { %5127 = vst [vmem:[#allocation17_spill] sm:$0xff] %v4502_v12 }
 0x35b   :  { %v4491_v50 = vpop.permute.xlu1 %1597 }
 0x35c   :  { %2079 = vrot.lane.b32.xlu1 %v2060_v35, %s2782_s23  ;;  %v1996_v35 = vmul.f32 %v3963_v14, %v4223_v49 }
 0x35d   :  { %2357 = vrot.lane.b32.xlu0 %v2335_v51, %s2786_s27  ;;  %v4509_v51 = vpop.permute.xlu0 %1873 }
 0x35e   :  { %5128 = vst [vmem:[#allocation10_spill] sm:$0xff] %v4509_v51 }
 0x35f   :  { %v1602_v53 = vpop.permute.xlu1 %1601 }
 0x360   :  { %2015 = vrot.lane.b32.xlu1 %v1994_v60, %s2781_s22  ;;  %v2128_v60 = vmul.f32 %v3892_v24, %v4235_v44  ;;  %v1410_v44 = vsel %vm111_vm0, %v4391_v31, %v4195_v55  ;;  %v1546_v31 = vsel %vm249_vm2, %v1534_v59, %v4255_v16  ;;  %v2130_v59 = vmul.f32 %v3942_v26, %v4094_v30 }
 0x361   :  { %1226 = vperm.xlu0 %2741, %v4500_v5   ;;  %v4519_v5 = vpop.permute.xlu0 %1110  ;;  %v1411_v30 = vsel %vm111_vm0, %v4421_v46, %v4227_v6 }
 0x362   :  { %5129 = vst [vmem:[#allocation51_spill] sm:$0xff] %v4519_v5 }
 0x363   :  { %v1538_v27 = vpop.permute.xlu1 %1537 }
 0x364   :  { %2019 = vrot.lane.b32.xlu1 %v1996_v35, %s2781_s22  ;;  %v2062_v35 = vmul.f32 %v3942_v26, %v4247_v38  ;;  %v2194_v38 = vmul.f32 %v3860_v29, %v4258_v57  ;;  %v1614_v57 = vsel %vm318_vm3, %v1602_v53, %v4293_v40 }
 0x365   :  { %2742 = vset.pattern.permute.xlu0 %v5101_v56  ;;  %v4527_v8 = vpop.permute.xlu0 %1809 }
 0x366   :  { %5130 = vst [vmem:[#allocation40_spill] sm:$0xff] %v4527_v8 }
 0x367   :  { %v4514_v39 = vpop.permute.xlu1 %1541 }
 0x368   :  { %2143 = vrot.lane.b32.xlu1 %v2126_v42, %s2783_s24  ;;  %v2064_v42 = vmul.f32 %v3963_v14, %v4059_v17 }
 0x369   :  { %v4542_v5 = vpop.permute.xlu0 %1813 }
 0x36b   :  { %v4521_v49 = vpop.permute.xlu1 %1665 }
 0x36c   :  { %2147 = vrot.lane.b32.xlu1 %v2128_v60, %s2783_s24  ;;  %v1355_v60 = vmul.f32 %v4082_v4, %v4363_v63  ;;  %v2196_v4 = vmul.f32 %v3892_v24, %v4268_v13  ;;  %v1200_v13 = vadd.f32 %v4439_v47, %v4403_v0  ;;  %v1357_v47 = vmul.f32 %v4119_v62, %v4373_v22 }
 0x36d   :  { %v1353_v62 = vmul.f32 %v4065_v48, %v4156_v7  ;;  %v1359_v48 = vmul.f32 %v4106_v1, %v4173_v11 }
 0x36e   :  { %v1423_v8 = vadd.f32 %v1410_v44, %v1355_v60  ;;  %v4558_v60 = vpop.permute.xlu0 %1937 }
 0x36f   :  { %v1670_v56 = vpop.permute.xlu1 %1669 }
 0x370   :  { %2083 = vrot.lane.b32.xlu1 %v2062_v35, %s2782_s23  ;;  %v1478_v35 = vsel %vm180_vm1, %v4411_v21, %v4217_v25  ;;  %v1682_v21 = vsel %vm387_vm4, %v1670_v56, %v4339_v19  ;;  %v1202_v56 = vadd.f32 %v4443_v2, %v4403_v0  ;;  %v1479_v2 = vsel %vm180_vm1, %v4473_v32, %v4265_v10  ;;  %v5134_v0 = vld [vmem:[#allocation2_spill] sm:$0xff] }
 0x371   :  { %v1425_v32 = vadd.f32 %v1411_v30, %v1357_v47 }
 0x373   :  { %v1606_v51 = vpop.permute.xlu1 %1605 }
 0x374   :  { %2087 = vrot.lane.b32.xlu1 %v2064_v42, %s2782_s23  ;;  %v1491_v42 = vadd.f32 %v1478_v35, %v1423_v8 }
 0x376   :  { %v1559_v12 = vadd.f32 %v1546_v31, %v1491_v42  ;;  %v4578_v31 = vpop.permute.xlu0 %1941  ;;  %v1218_v42 = vmax.f32 %v1200_v13, 0.0  ;;  %v1493_v13 = vadd.f32 %v1479_v2, %v1425_v32  ;;  %v2264_v2 = vmul.f32 %v3892_v24, %v5134_v0  ;;  %v5135_v32 = vld [vmem:[#allocation5_spill] sm:$0xff]  ;;  %v5137_v0 = vld [vmem:[#allocation7_spill] sm:$0xff] }
 0x377   :  { %v4544_v17 = vpop.permute.xlu1 %1609 }
 0x378   :  { %2211 = vrot.lane.b32.xlu1 %v2194_v38, %s2784_s25  ;;  %v1627_v44 = vadd.f32 %v1614_v57, %v1559_v12  ;;  %v2132_v12 = vmul.f32 %v3963_v14, %v4277_v37  ;;  %v1219_v57 = vmax.f32 %v1202_v56, 0.0  ;;  %v5132_v56 = vld [vmem:[#allocation6_spill] sm:$0xff] }
 0x37a   :  { %v1695_v8 = vadd.f32 %v1682_v21, %v1627_v44  ;;  %v2262_v21 = vmul.f32 %v3860_v29, %v4291_v52  ;;  %v1409_v44 = vsel %vm111_vm0, %v4383_v28, %v4182_v3  ;;  %v1358_v52 = vmul.f32 %v3942_v26, %v4373_v22 }
 0x37b   :  { %v4553_v33 = vpop.permute.xlu1 %1733  ;;  %v1421_v47 = vadd.f32 %v1409_v44, %v1353_v62 }
 0x37c   :  { %2215 = vrot.lane.b32.xlu1 %v2196_v4, %s2784_s25 }
 0x37f   :  { %v1738_v38 = vpop.permute.xlu1 %1737 }
 0x380   :  { %v1750_v53 = vsel %vm456_vm5, %v1738_v38, %v4393_v45  ;;  %2151 = vrot.lane.b32.xlu1 %v2130_v59, %s2783_s24  ;;  %v1412_v59 = vsel %vm111_vm0, %v4435_v36, %v4237_v20  ;;  %v5131_v38 = vld [vmem:[#allocation24_spill] sm:$0xff]  ;;  %v1480_v36 = vsel %vm180_vm1, %v4481_v58, %v5132_v56  ;;  %v5136_v58 = vld [vmem:[#allocation11_spill] sm:$0xff] }
 0x381   :  { %v4569_v35 = vadd.f32 %v1750_v53, %v1695_v8  ;;  %v1477_v28 = vsel %vm180_vm1, %v5131_v38, %v4207_v23  ;;  %v1545_v38 = vsel %vm249_vm2, %v4447_v9, %v5135_v32  ;;  %v5138_v9 = vld [vmem:[#allocation18_spill] sm:$0xff] }
 0x383   :  { %v4580_v4 = vpop.permute.xlu1 %1100 }
 0x384   :  { %2155 = vrot.lane.b32.xlu1 %v2132_v12, %s2783_s24  ;;  %v1196_v37 = vadd.f32 %v4429_v54, %v4580_v4  ;;  %v1194_v46 = vadd.f32 %v4425_v43, %v4580_v4  ;;  %v1547_v54 = vsel %vm249_vm2, %v1538_v27, %v4301_v61  ;;  %v5133_v12 = vld [vmem:[#allocation16_spill] sm:$0xff] }
 0x385   :  { %v1615_v27 = vsel %vm318_vm3, %v1606_v51, %v5133_v12  ;;  %v1561_v22 = vadd.f32 %v1547_v54, %v1493_v13  ;;  %v1548_v51 = vsel %vm249_vm2, %v4514_v39, %v5136_v58  ;;  %v1613_v54 = vsel %vm318_vm3, %v4491_v50, %v5137_v0 }
 0x386   :  { %v1217_v8 = vmax.f32 %v1196_v37, 0.0  ;;  %v1216_v43 = vmax.f32 %v1194_v46, 0.0  ;;  %v1427_v37 = vadd.f32 %v1412_v59, %v1359_v48  ;;  %v4615_v46 = vpop.permute.xlu0 %1877  ;;  %v1426_v59 = vadd.f32 %v4227_v6, %v1358_v52 }
 0x387   :  { %v1674_v53 = vpop.permute.xlu1 %1673  ;;  %v1354_v50 = vmul.f32 %v3860_v29, %v4156_v7  ;;  %v1360_v7 = vmul.f32 %v3963_v14, %v4173_v11  ;;  %v2751_v11 = vld [vmem:[%s4880_s0 + $0x48] sm:$0xff] }
 0x388   :  { %2279 = vrot.lane.b32.xlu1 %v2262_v21, %s2785_s26  ;;  %v2600_v30 = vpack.c.bf16 %v1219_v57, %v1217_v8  ;;  %v2602_v1 = vpack.c.bf16 %v1218_v42, %v1216_v43  ;;  %v1356_v42 = vmul.f32 %v3892_v24, %v4363_v63  ;;  %v1489_v57 = vadd.f32 %v1477_v28, %v1421_v47  ;;  %v5139_v28 = vld [vmem:[#allocation8_spill] sm:$0xff]  ;;  %v5141_v47 = vld [vmem:[#allocation35_spill] sm:$0xff] }
 0x389   :  { %v1495_v62 = vadd.f32 %v1480_v36, %v1427_v37  ;;  %v1629_v21 = vadd.f32 %v1615_v27, %v1561_v22  ;;  %v1616_v8 = vsel %vm318_vm3, %v4544_v17, %v5138_v9  ;;  %v2198_v13 = vmul.f32 %v3942_v26, %v5139_v28  ;;  %v5140_v36 = vld [vmem:[#allocation12_spill] sm:$0xff]  ;;  %v5142_v22 = vld [vmem:[#allocation26_spill] sm:$0xff] }
 0x38a   :  { %2601 = vmatprep.subr.bf16.mxu1 %v2600_v30  ;;  %v1557_v63 = vadd.f32 %v1545_v38, %v1489_v57  ;;  %v1681_v6 = vsel %vm387_vm4, %v4521_v49, %v5140_v36  ;;  %v4643_v27 = vpop.permute.xlu0 %1881  ;;  %v1424_v30 = vadd.f32 %v4195_v55, %v1356_v42  ;;  %v1749_v37 = vsel %vm456_vm5, %v4553_v33, %v5141_v47  ;;  %v5143_v38 = vld [vmem:[#allocation19_spill] sm:$0xff] }
 0x38b   :  { %v1676_v44 = vpop.permute.xlu1 %1675  ;;  %2603 = vmatpush1.bf16.msra.mxu1 %v2602_v1  ;;  %v1563_v43 = vadd.f32 %v1548_v51, %v1495_v62  ;;  %v1494_v1 = vadd.f32 %v4265_v10, %v1426_v59  ;;  %v2200_v51 = vmul.f32 %v3963_v14, %v5143_v38  ;;  %v1422_v55 = vadd.f32 %v4182_v3, %v1354_v50  ;;  %v5144_v62 = vld [vmem:[#allocation15_spill] sm:$0xff] }
 0x38c   :  { %v1683_v39 = vsel %vm387_vm4, %v1674_v53, %v1676_v44  ;;  %2283 = vrot.lane.b32.xlu1 %v2264_v2, %s2785_s26  ;;  %v1625_v52 = vadd.f32 %v1613_v54, %v1557_v63  ;;  %v1492_v57 = vadd.f32 %v4217_v25, %v1424_v30  ;;  %v5149_v38 = vld [vmem:[#allocation27_spill] sm:$0xff] }
 0x38d   :  { %v1697_v48 = vadd.f32 %v1683_v39, %v1629_v21  ;;  %v1631_v17 = vadd.f32 %v1616_v8, %v1563_v43  ;;  %v1562_v33 = vadd.f32 %v4301_v61, %v1494_v1  ;;  %v5145_v8 = vld [vmem:[#allocation3_spill] sm:$0xff]  ;;  %v1428_v39 = vadd.f32 %v4237_v20, %v1360_v7  ;;  %v5148_v7 = vld [vmem:[#allocation17_spill] sm:$0xff] }
 0x38e   :  { %v1693_v49 = vadd.f32 %v1681_v6, %v1625_v52  ;;  %v4663_v59 = vpop.permute.xlu0 %2005  ;;  %v2330_v3 = vmul.f32 %v2751_v11, %v5145_v8  ;;  %v1490_v25 = vadd.f32 %v4207_v23, %v1422_v55  ;;  %v1560_v43 = vadd.f32 %v4255_v16, %v1492_v57  ;;  %v5146_v52 = vld [vmem:[#allocation21_spill] sm:$0xff]  ;;  %v5150_v57 = vld [vmem:[#allocation10_spill] sm:$0xff]  ;;  %v5152_v11 = vld [vmem:[#allocation51_spill] sm:$0xff] }
 0x38f   :  { %v1680_v53 = vpop.permute.xlu1 %1679  ;;  %v1496_v61 = vadd.f32 %v5132_v56, %v1428_v39  ;;  %v1630_v28 = vadd.f32 %v5133_v12, %v1562_v33  ;;  %v2332_v23 = vmul.f32 %v3892_v24, %v5146_v52  ;;  %v2266_v24 = vmul.f32 %v3942_v26, %v4333_v18  ;;  %v5153_v8 = vld [vmem:[#allocation9_spill] sm:$0xff] }
 0x390   :  { %v1684_v2 = vsel %vm387_vm4, %v5142_v22, %v1680_v53  ;;  %2219 = vrot.lane.b32.xlu1 %v2198_v13, %s2784_s25  ;;  %v1761_v10 = vadd.f32 %v1749_v37, %v1693_v49  ;;  %v1558_v6 = vadd.f32 %v5135_v32, %v1490_v25  ;;  %v5155_v25 = vld [vmem:[#allocation32_spill] sm:$0xff] }
 0x391   :  { %v1699_v29 = vadd.f32 %v1684_v2, %v1631_v17  ;;  %v1564_v20 = vadd.f32 %v5136_v58, %v1496_v61  ;;  %v1698_v17 = vadd.f32 %v1676_v44, %v1630_v28  ;;  %v5147_v2 = vld [vmem:[#allocation4_spill] sm:$0xff]  ;;  %v5156_v61 = vld [vmem:[#allocation45_spill] sm:$0xff] }
 0x392   :  { %v1626_v56 = vadd.f32 %v5137_v0, %v1558_v6  ;;  %v4683_v16 = vpop.permute.xlu0 %2009 }
 0x393   :  { %v1804_v42 = vpop.permute.xlu1 %1803  ;;  %v1632_v30 = vadd.f32 %v5138_v9, %v1564_v20 }
 0x394   :  { %v1817_v21 = vsel %vm525_vm6, %v5144_v62, %v1804_v42  ;;  %2223 = vrot.lane.b32.xlu1 %v2200_v51, %s2784_s25  ;;  %v1694_v58 = vadd.f32 %v5140_v36, %v1626_v56  ;;  %v2268_v36 = vmul.f32 %v3963_v14, %v5147_v2  ;;  %v2334_v51 = vmul.f32 %v3942_v26, %v5149_v38  ;;  %v5151_v62 = vld [vmem:[#allocation29_spill] sm:$0xff] }
 0x395   :  { %v1829_v54 = vadd.f32 %v1817_v21, %v1761_v10  ;;  %v1700_v44 = vadd.f32 %v1680_v53, %v1632_v30  ;;  %v2336_v21 = vmul.f32 %v3963_v14, %v5151_v62  ;;  %v4731_v14 = vld [vmem:[%s4882_s3 + $0x8] sm:$0xff] }
 0x396   :  { %v1762_v37 = vadd.f32 %v5141_v47, %v1694_v58 }
 0x397   :  { %v1808_v63 = vpop.permute.xlu1 %1807 }
 0x398   :  { %v1818_v13 = vsel %vm525_vm6, %v4450_v15, %v1808_v63  ;;  %2347 = vrot.lane.b32.xlu1 %v2330_v3, %s2786_s27  ;;  %v1628_v15 = vadd.f32 %v4293_v40, %v1560_v43  ;;  %v1830_v49 = vadd.f32 %v1804_v42, %v1762_v37  ;;  %v5154_v3 = vld [vmem:[#allocation43_spill] sm:$0xff]  ;;  %v5158_v37 = vld [vmem:[#allocation34_spill] sm:$0xff] }
 0x399   :  { %v1831_v50 = vadd.f32 %v1818_v13, %v4569_v35  ;;  %v1208_v26 = vadd.f32 %v5154_v3, %v5152_v11 }
 0x39a   :  { %v1696_v9 = vadd.f32 %v4339_v19, %v1628_v15 }
 0x39b   :  { %v1744_v12 = vpop.permute.xlu1 %1743  ;;  %v1221_v6 = vmax.f32 %v1208_v26, 0.0 }
 0x39c   :  { %v1751_v32 = vsel %vm456_vm5, %v4471_v41, %v1744_v12  ;;  %v1766_v1 = vadd.f32 %v1744_v12, %v1698_v17  ;;  %2351 = vrot.lane.b32.xlu1 %v2332_v23, %s2786_s27  ;;  %v4698_v41 = vpop.permute.xlu0 %1945  ;;  %v1764_v53 = vadd.f32 %v4393_v45, %v1696_v9  ;;  %v5157_v17 = vld [vmem:[#allocation40_spill] sm:$0xff] }
 0x39d   :  { %v1765_v35 = vadd.f32 %v1751_v32, %v1697_v48 }
 0x39e   :  { %v1832_v55 = vadd.f32 %v1808_v63, %v1764_v53 }
 0x39f   :  { %v1748_v0 = vpop.permute.xlu1 %1747 }
 0x3a0   :  { %v1752_v40 = vsel %vm456_vm5, %v4484_v34, %v1748_v0  ;;  %v1768_v22 = vadd.f32 %v1748_v0, %v1700_v44  ;;  %2287 = vrot.lane.b32.xlu1 %v2266_v24, %s2785_s26  ;;  %v4708_v10 = vpop.permute.xlu0 %1949 }
 0x3a1   :  { %v1767_v48 = vadd.f32 %v1752_v40, %v1699_v29  ;;  %v5159_v40 = vmov 0.0  }
 0x3a3   :  { %v1872_v18 = vpop.permute.xlu1 %1871 }
 0x3a4   :  { %v1885_v47 = vsel %vm594_vm7, %v5148_v7, %v1872_v18  ;;  %v1898_v19 = vadd.f32 %v1872_v18, %v1830_v49  ;;  %2291 = vrot.lane.b32.xlu1 %v2268_v36, %s2785_s26  ;;  %v4726_v28 = vpop.permute.xlu0 %2073 }
 0x3a5   :  { %v1897_v34 = vadd.f32 %v1885_v47, %v1829_v54  ;;  %v1206_v54 = vadd.f32 %v5153_v8, %v5152_v11 }
 0x3a7   :  { %v1876_v29 = vpop.permute.xlu1 %1875  ;;  %v1220_v13 = vmax.f32 %v1206_v54, 0.0 }
 0x3a8   :  { %v1886_v42 = vsel %vm594_vm7, %v5150_v57, %v1876_v29  ;;  %v1900_v33 = vadd.f32 %v1876_v29, %v1832_v55  ;;  %2355 = vrot.lane.b32.xlu1 %v2334_v51, %s2786_s27  ;;  %v4736_v32 = vpop.permute.xlu0 %2077 }
 0x3a9   :  { %v1899_v45 = vadd.f32 %v1886_v42, %v1831_v50 }
 0x3ab   :  { %v4719_v39 = vpop.permute.xlu1 %1115 }
 0x3ac   :  { %v1212_v63 = vadd.f32 %v5155_v25, %v4719_v39  ;;  %v1214_v43 = vadd.f32 %v5156_v61, %v4719_v39  ;;  %2359 = vrot.lane.b32.xlu1 %v2336_v21, %s2786_s27  ;;  %v2014_v2 = vpop.permute.xlu0 %2013 }
 0x3ae   :  { %v1223_v50 = vmax.f32 %v1214_v43, 0.0  ;;  %v1222_v20 = vmax.f32 %v1212_v63, 0.0 }
 0x3af   :  { %v1812_v52 = vpop.permute.xlu1 %1811 }
 0x3b0   :  { %v2604_v23 = vpack.c.bf16 %v1223_v50, %v1221_v6  ;;  %v1819_v56 = vsel %vm525_vm6, %v5157_v17, %v1812_v52  ;;  %v1834_v12 = vadd.f32 %v1812_v52, %v1766_v1  ;;  %1231 = vperm.xlu1 %2740, %v4731_v14   ;;  %v2606_v30 = vpack.c.bf16 %v1222_v20, %v1220_v13  ;;  %v4750_v18 = vpop.permute.xlu0 %2017 }
 0x3b1   :  { %v1833_v15 = vadd.f32 %v1819_v56, %v1765_v35 }
 0x3b2   :  { %2605 = vmatprep.subr.bf16.mxu1 %v2604_v23 }
 0x3b3   :  { %v1816_v58 = vpop.permute.xlu1 %1815  ;;  %2607 = vmatpush1.bf16.msra.mxu1 %v2606_v30 }
 0x3b4   :  { %v1820_v24 = vsel %vm525_vm6, %v4542_v5, %v1816_v58  ;;  %v1836_v44 = vadd.f32 %v1816_v58, %v1768_v22  ;;  %v2142_v51 = vpop.permute.xlu0 %2141 }
 0x3b5   :  { %v1835_v0 = vadd.f32 %v1820_v24, %v1767_v48 }
 0x3b6   :  { %2568 = vmatmul.mubr.msk.f32.vlgmr.msra.gmra.mrb[0].mxu1 %vm1118_vm15, %v5158_v37 }
 0x3b7   :  { %v1940_v9 = vpop.permute.xlu1 %1939  ;;  %1308 = vmatprep.mubr.f32.mxu1 %v5159_v40 }
 0x3b8   :  { %v1953_v1 = vsel %vm663_vm8, %v4558_v60, %v1940_v9  ;;  %v1966_v35 = vadd.f32 %v1940_v9, %v1898_v19 }
 0x3b9   :  { %v1965_v36 = vadd.f32 %v1953_v1, %v1897_v34 }
 0x3ba   :  { %2569 = vmatmul.mubr.msk.f32.gmra.mrb[2].mxu1 %vm1118_vm15, %v4731_v14 }
 0x3bb   :  { %v1944_v49 = vpop.permute.xlu1 %1943  ;;  %2445 = vmatprep.mubr.f32.mxu1 %v5159_v40 }
 0x3bc   :  { %v1954_v5 = vsel %vm663_vm8, %v4578_v31, %v1944_v49  ;;  %v1968_v22 = vadd.f32 %v1944_v49, %v1900_v33  ;;  %v2146_v33 = vpop.permute.xlu0 %2145 }
 0x3bd   :  { %v1967_v48 = vadd.f32 %v1954_v5, %v1899_v45 }
 0x3bf   :  { %v1880_v53 = vpop.permute.xlu1 %1879 }
 0x3c0   :  { %v1887_v60 = vsel %vm594_vm7, %v4615_v46, %v1880_v53  ;;  %v1902_v7 = vadd.f32 %v1880_v53, %v1834_v12  ;;  %v4762_v3 = vpop.permute.xlu0 %2081 }
 0x3c1   :  { %v1901_v47 = vadd.f32 %v1887_v60, %v1833_v15 }
 0x3c3   :  { %v1884_v19 = vpop.permute.xlu1 %1883 }
 0x3c4   :  { %v1888_v34 = vsel %vm594_vm7, %v4643_v27, %v1884_v19  ;;  %v1904_v38 = vadd.f32 %v1884_v19, %v1836_v44  ;;  %v4770_v43 = vpop.permute.xlu0 %2085 }
 0x3c5   :  { %v1903_v55 = vadd.f32 %v1888_v34, %v1835_v0 }
 0x3c7   :  { %v2008_v29 = vpop.permute.xlu1 %2007 }
 0x3c8   :  { %v2021_v31 = vsel %vm732_vm9, %v4663_v59, %v2008_v29  ;;  %v2034_v57 = vadd.f32 %v2008_v29, %v1966_v35  ;;  %v2210_v6 = vpop.permute.xlu0 %2209 }
 0x3c9   :  { %v2033_v42 = vadd.f32 %v2021_v31, %v1965_v36 }
 0x3cb   :  { %v2012_v45 = vpop.permute.xlu1 %2011 }
 0x3cc   :  { %v2022_v46 = vsel %vm732_vm9, %v4683_v16, %v2012_v45  ;;  %v2036_v62 = vadd.f32 %v2012_v45, %v1968_v22  ;;  %v2214_v23 = vpop.permute.xlu0 %2213 }
 0x3cd   :  { %v2035_v21 = vadd.f32 %v2022_v46, %v1967_v48 }
 0x3cf   :  { %v1948_v8 = vpop.permute.xlu1 %1947 }
 0x3d0   :  { %v1955_v27 = vsel %vm663_vm8, %v4698_v41, %v1948_v8  ;;  %v1970_v54 = vadd.f32 %v1948_v8, %v1902_v7 }
 0x3d1   :  { %v1969_v26 = vadd.f32 %v1955_v27, %v1901_v47 }
 0x3d3   :  { %v1952_v25 = vpop.permute.xlu1 %1951 }
 0x3d4   :  { %v1956_v59 = vsel %vm663_vm8, %v4708_v10, %v1952_v25  ;;  %v4766_v63 = vadd.f32 %v1952_v25, %v1904_v38  ;;  %v4777_v10 = vpop.permute.xlu0 %2149 }
 0x3d5   :  { %v4768_v61 = vadd.f32 %v1956_v59, %v1903_v55 }
 0x3d7   :  { %v2076_v16 = vpop.permute.xlu1 %2075 }
 0x3d8   :  { %v4779_v30 = vpop.permute.xlu0 %2153  ;;  %v2089_v53 = vsel %vm801_vm10, %v4726_v28, %v2076_v16  ;;  %v2102_v19 = vadd.f32 %v2076_v16, %v2034_v57 }
 0x3d9   :  { %v2101_v29 = vadd.f32 %v2089_v53, %v2033_v42 }
 0x3db   :  { %v2080_v13 = vpop.permute.xlu1 %2079 }
 0x3dc   :  { %v2278_v24 = vpop.permute.xlu0 %2277  ;;  %v2090_v60 = vsel %vm801_vm10, %v4736_v32, %v2080_v13  ;;  %v2104_v34 = vadd.f32 %v2080_v13, %v2036_v62 }
 0x3dd   :  { %v2103_v31 = vadd.f32 %v2090_v60, %v2035_v21 }
 0x3df   :  { %v2016_v50 = vpop.permute.xlu1 %2015 }
 0x3e0   :  { %v2023_v41 = vsel %vm732_vm9, %v2014_v2, %v2016_v50  ;;  %v4773_v20 = vadd.f32 %v2016_v50, %v1970_v54  ;;  %v2282_v0 = vpop.permute.xlu0 %2281 }
 0x3e1   :  { %v4775_v52 = vadd.f32 %v2023_v41, %v1969_v26 }
 0x3e3   :  { %v2020_v17 = vpop.permute.xlu1 %2019 }
 0x3e4   :  { %v4781_v35 = vpop.permute.xlu0 %2217  ;;  %v2024_v60 = vsel %vm732_vm9, %v4750_v18, %v2020_v17 }
 0x3e7   :  { %v2144_v56 = vpop.permute.xlu1 %2143 }
 0x3e8   :  { %v4783_v36 = vpop.permute.xlu0 %2221  ;;  %v2157_v38 = vsel %vm870_vm11, %v2142_v51, %v2144_v56  ;;  %v2170_v45 = vadd.f32 %v2144_v56, %v2102_v19 }
 0x3e9   :  { %v2169_v28 = vadd.f32 %v2157_v38, %v2101_v29 }
 0x3eb   :  { %v2148_v12 = vpop.permute.xlu1 %2147 }
 0x3ec   :  { %v2346_v22 = vpop.permute.xlu0 %2345  ;;  %v2158_v55 = vsel %vm870_vm11, %v2146_v33, %v2148_v12  ;;  %v2172_v46 = vadd.f32 %v2148_v12, %v2104_v34 }
 0x3ed   :  { %v2171_v54 = vadd.f32 %v2158_v55, %v2103_v31 }
 0x3ef   :  { %v2084_v15 = vpop.permute.xlu1 %2083 }
 0x3f0   :  { %v2350_v7 = vpop.permute.xlu0 %2349  ;;  %v2106_v34 = vadd.f32 %v2084_v15, %v4773_v20 }
 0x3f3   :  { %v2088_v58 = vpop.permute.xlu1 %2087 }
 0x3f4   :  { %v2286_v51 = vpop.permute.xlu0 %2285 }
 0x3f7   :  { %v2212_v44 = vpop.permute.xlu1 %2211 }
 0x3f8   :  { %v2225_v8 = vsel %vm939_vm12, %v2210_v6, %v2212_v44  ;;  %v2238_v32 = vadd.f32 %v2212_v44, %v2170_v45 }
 0x3f9   :  { %v2237_v59 = vadd.f32 %v2225_v8, %v2169_v28 }
 0x3fb   :  { %v2216_v9 = vpop.permute.xlu1 %2215 }
 0x3fc   :  { %v2226_v27 = vsel %vm939_vm12, %v2214_v23, %v2216_v9  ;;  %v2240_v25 = vadd.f32 %v2216_v9, %v2172_v46 }
 0x3fd   :  { %v2239_v33 = vadd.f32 %v2226_v27, %v2171_v54 }
 0x3ff   :  { %v2152_v1 = vpop.permute.xlu1 %2151 }
 0x400   :  { %v2159_v55 = vsel %vm870_vm11, %v4777_v10, %v2152_v1 }
 0x403   :  { %v2156_v2 = vpop.permute.xlu1 %2155 }
 0x404   :  { %v2160_v18 = vsel %vm870_vm11, %v4779_v30, %v2156_v2 }
 0x407   :  { %v2280_v49 = vpop.permute.xlu1 %2279 }
 0x408   :  { %v2293_v57 = vsel %vm1008_vm13, %v2278_v24, %v2280_v49  ;;  %v2306_v42 = vadd.f32 %v2280_v49, %v2238_v32  ;;  %v2290_v24 = vpop.permute.xlu0 %2289  ;;  %v2040_v49 = vadd.f32 %v2020_v17, %v4766_v63 }
 0x409   :  { %v2305_v13 = vadd.f32 %v2293_v57, %v2237_v59  ;;  %v2753_v59 = vld [vmem:[%s4881_s2 + $0x8] sm:$0xff] }
 0x40a   :  { %v2108_v38 = vadd.f32 %v2088_v58, %v2040_v49  ;;  %v5160_v49 = vld [vmem:[#allocation37_spill] sm:$0xff] }
 0x40b   :  { %v2284_v5 = vpop.permute.xlu1 %2283 }
 0x40c   :  { %v2294_v62 = vsel %vm1008_vm13, %v2282_v0, %v2284_v5  ;;  %v2308_v21 = vadd.f32 %v2284_v5, %v2240_v25  ;;  %v2091_v5 = vsel %vm801_vm10, %v4762_v3, %v2084_v15  ;;  %v2354_v29 = vpop.permute.xlu0 %2353  ;;  %v2174_v3 = vadd.f32 %v2152_v1, %v2106_v34 }
 0x40d   :  { %v2307_v6 = vadd.f32 %v2294_v62, %v2239_v33  ;;  %v2105_v63 = vadd.f32 %v2091_v5, %v4775_v52  ;;  %v2176_v31 = vadd.f32 %v2156_v2, %v2108_v38  ;;  %v2754_v33 = vld [vmem:[%s4881_s2 + $0x10] sm:$0xff] }
 0x40f   :  { %v2220_v48 = vpop.permute.xlu1 %2219  ;;  %v2173_v20 = vadd.f32 %v2159_v55, %v2105_v63 }
 0x410   :  { %v2242_v45 = vadd.f32 %v2220_v48, %v2174_v3  ;;  %v2358_v28 = vpop.permute.xlu0 %2357 }
 0x413   :  { %v2224_v47 = vpop.permute.xlu1 %2223 }
 0x414   :  { %v2244_v10 = vadd.f32 %v2224_v47, %v2176_v31 }
 0x417   :  { %v2348_v26 = vpop.permute.xlu1 %2347 }
 0x418   :  { %v2361_v16 = vsel %vm1077_vm14, %v2346_v22, %v2348_v26  ;;  %v2374_v41 = vadd.f32 %v2348_v26, %v2306_v42  ;;  %v2092_v22 = vsel %vm801_vm10, %v4770_v43, %v2088_v58  ;;  %v2227_v43 = vsel %vm939_vm12, %v4781_v35, %v2220_v48  ;;  %v2755_v42 = vld [vmem:[%s4881_s2 + $0x18] sm:$0xff] }
 0x419   :  { %v2373_v12 = vadd.f32 %v2361_v16, %v2305_v13  ;;  %v2241_v8 = vadd.f32 %v2227_v43, %v2173_v20 }
 0x41b   :  { %v2352_v50 = vpop.permute.xlu1 %2351 }
 0x41c   :  { %v2362_v23 = vsel %vm1077_vm14, %v2350_v7, %v2352_v50  ;;  %v2376_v56 = vadd.f32 %v2352_v50, %v2308_v21  ;;  %v2039_v7 = vadd.f32 %v2024_v60, %v4768_v61  ;;  %v2228_v61 = vsel %vm939_vm12, %v4783_v36, %v2224_v47  ;;  %v1227_v21 = vpop.permute.xlu0 %1226 }
 0x41d   :  { %v2375_v44 = vadd.f32 %v2362_v23, %v2307_v6 }
 0x41e   :  { %v2608_v9 = vpack.c.bf16 %v2376_v56, %v2374_v41  ;;  %v2107_v17 = vadd.f32 %v2092_v22, %v2039_v7 }
 0x41f   :  { %v2610_v53 = vpack.c.bf16 %v2375_v44, %v2373_v12  ;;  %v2288_v0 = vpop.permute.xlu1 %2287 }
 0x420   :  { %2609 = vmatprep.subr.bf16.mxu1 %v2608_v9  ;;  %v2175_v15 = vadd.f32 %v2160_v18, %v2107_v17  ;;  %v2295_v46 = vsel %vm1008_vm13, %v2286_v51, %v2288_v0  ;;  %v2310_v27 = vadd.f32 %v2288_v0, %v2242_v45  ;;  %v2752_v51 = vld [vmem:[%s4881_s2] sm:$0xff] }
 0x421   :  { %2611 = vmatpush1.bf16.msra.mxu1 %v2610_v53  ;;  %v2309_v35 = vadd.f32 %v2295_v46, %v2241_v8 }
 0x422   :  { %v2243_v52 = vadd.f32 %v2228_v61, %v2175_v15 }
 0x423   :  { %v2292_v19 = vpop.permute.xlu1 %2291 }
 0x424   :  { %v2296_v30 = vsel %vm1008_vm13, %v2290_v24, %v2292_v19  ;;  %v2312_v1 = vadd.f32 %v2292_v19, %v2244_v10 }
 0x425   :  { %v2311_v54 = vadd.f32 %v2296_v30, %v2243_v52 }
 0x427   :  { %v2356_v58 = vpop.permute.xlu1 %2355 }
 0x428   :  { %v2363_v2 = vsel %vm1077_vm14, %v2354_v29, %v2356_v58  ;;  %v2378_v36 = vadd.f32 %v2356_v58, %v2310_v27 }
 0x429   :  { %v2377_v48 = vadd.f32 %v2363_v2, %v2309_v35 }
 0x42b   :  { %v2360_v26 = vpop.permute.xlu1 %2359 }
 0x42c   :  { %v2364_v32 = vsel %vm1077_vm14, %v2358_v28, %v2360_v26  ;;  %v2380_v25 = vadd.f32 %v2360_v26, %v2312_v1 }
 0x42d   :  { %v2379_v47 = vadd.f32 %v2364_v32, %v2311_v54 }
 0x42e   :  { %v2612_v57 = vpack.c.bf16 %v2380_v25, %v2378_v36 }
 0x42f   :  { %v2614_v62 = vpack.c.bf16 %v2379_v47, %v2377_v48  ;;  %v1232_v41 = vpop.permute.xlu1 %1231 }
 0x430   :  { %2613 = vmatprep.subr.bf16.mxu1 %v2612_v57 }
 0x431   :  { %2615 = vmatpush1.bf16.msra.mxu1 %v2614_v62 }
 0x434   :  { %2582 = vmatmul.mubr.msk.f32.vlgmr.msra.gmra.mrb[4].mxu1 %vm1118_vm15, %v2752_v51 }
 0x435   :  { %2451 = vmatprep.mubr.f32.mxu1 %v5159_v40 }
 0x438   :  { %2583 = vmatmul.mubr.msk.f32.gmra.mrb[6].mxu1 %vm1118_vm15, %v2753_v59 }
 0x439   :  { %2457 = vmatprep.mubr.f32.mxu1 %v5159_v40 }
 0x43c   :  { %2584 = vmatmul.mubr.msk.f32.gmra.mrb[8].mxu1 %vm1118_vm15, %v2754_v33 }
 0x43d   :  { %2463 = vmatprep.mubr.f32.mxu1 %v5159_v40 }
 0x440   :  { %2585 = vmatmul.mubr.msk.f32.gmra.mrb[10].mxu1 %vm1118_vm15, %v2755_v42 }
 0x489   :  { %v1304_v16 = vpop.f32.mrb[0].mxu1 }
 0x48a   :  { %v1305_v13 = vadd.f32 %v1304_v16, %v1227_v21  ;;  %v1306_v6 = vpop.f32.mrb[1].mxu1 }
 0x48b   :  { %v1307_v50 = vadd.f32 %v1306_v6, %v1227_v21 }
 0x48c   :  { %1315 = vst [vmem:[%s4883_s4] sm:$0xff] %v1305_v13 }
 0x48d   :  { %1316 = vst.msk [vmem:[%s4883_s4 + $0x8] sm:$0xff] %vm1077_vm14, %v1307_v50  ;;  %v1310_v23 = vpop.f32.mrb[2].mxu1 }
 0x48e   :  { %v1311_v56 = vadd.f32 %v1310_v23, %v1232_v41  ;;  %v1312_v12 = vpop.f32.mrb[3].mxu1 }
 0x48f   :  { %v1313_v44 = vadd.f32 %v1312_v12, %v1232_v41 }
 0x490   :  { %1317 = vst [vmem:[%s4883_s4 + $0x10] sm:$0xff] %v1311_v56 }
 0x491   :  { %1318 = vst.msk [vmem:[%s4883_s4 + $0x18] sm:$0xff] %vm1077_vm14, %v1313_v44 }
 0x507   :  { %v2447_v9 = vpop.f32.mrb[4].mxu1 }
 0x508   :  { %v2449_v24 = vpop.f32.mrb[5].mxu1  ;;  %v2448_v53 = vadd.f32 %v2447_v9, %v4580_v4 }
 0x509   :  { %v2450_v0 = vadd.f32 %v2449_v24, %v4580_v4 }
 0x50a   :  { %v2470_v19 = vmax.f32 %v2448_v53, 0.0 }
 0x50b   :  { %v2453_v60 = vpop.f32.mrb[6].mxu1  ;;  %v2471_v38 = vmax.f32 %v2450_v0, 0.0 }
 0x50c   :  { %v2454_v5 = vadd.f32 %v2453_v60, %v5160_v49  ;;  %v2455_v22 = vpop.f32.mrb[7].mxu1 }
 0x50d   :  { %v2456_v7 = vadd.f32 %v2455_v22, %v5160_v49 }
 0x50e   :  { %v2472_v34 = vmax.f32 %v2454_v5, 0.0 }
 0x50f   :  { %v2473_v55 = vmax.f32 %v2456_v7, 0.0  ;;  %v2459_v18 = vpop.f32.mrb[8].mxu1 }
 0x510   :  { %v2618_v29 = vpack.c.bf16 %v2472_v34, %v2470_v19  ;;  %v2461_v63 = vpop.f32.mrb[9].mxu1  ;;  %v2460_v3 = vadd.f32 %v2459_v18, %v5152_v11 }
 0x511   :  { %v2616_v17 = vpack.c.bf16 %v2473_v55, %v2471_v38  ;;  %v2462_v31 = vadd.f32 %v2461_v63, %v5152_v11 }
 0x512   :  { %v2474_v15 = vmax.f32 %v2460_v3, 0.0 }
 0x513   :  { %v2465_v43 = vpop.f32.mrb[10].mxu1  ;;  %2617 = vmatprep.subr.bf16.mxu0 %v2616_v17  ;;  %v2475_v45 = vmax.f32 %v2462_v31, 0.0 }
 0x514   :  { %v2466_v4 = vadd.f32 %v2465_v43, %v4719_v39  ;;  %v2467_v61 = vpop.f32.mrb[11].mxu1  ;;  %2619 = vmatpush1.bf16.msra.mxu0 %v2618_v29 }
 0x515   :  { %v2468_v20 = vadd.f32 %v2467_v61, %v4719_v39 }
 0x516   :  { %v2476_v58 = vmax.f32 %v2466_v4, 0.0 }
 0x517   :  { %v2477_v10 = vmax.f32 %v2468_v20, 0.0 }
 0x518   :  { %v2622_v46 = vpack.c.bf16 %v2476_v58, %v2474_v15 }
 0x519   :  { %v2620_v30 = vpack.c.bf16 %v2477_v10, %v2475_v45 }
 0x51b   :  { %2621 = vmatprep.subr.bf16.mxu0 %v2620_v30 }
 0x51c   :  { %2623 = vmatpush1.bf16.msra.mxu0 %v2622_v46 }
 0x51f   :  { %2586 = vmatmul.mubr.msk.f32.vlgmr.msra.gmra.mrb[8].mxu0 %vm1118_vm15, %v5158_v37 }
 0x520   :  { %2548 = vmatprep.mubr.f32.mxu0 %v5159_v40 }
 0x523   :  { %2587 = vmatmul.mubr.msk.f32.gmra.mrb[10].mxu0 %vm1118_vm15, %v4731_v14 }
 0x5f2   :  { %v2544_v11 = vpop.f32.mrb[8].mxu0 }
 0x5f3   :  { %v2545_v8 = vadd.f32 %v2544_v11, %v1227_v21  ;;  %v2546_v52 = vpop.f32.mrb[9].mxu0 }
 0x5f4   :  { %v2547_v39 = vadd.f32 %v2546_v52, %v1227_v21 }
 0x5f5   :  { %2588 = vst [vmem:[%s4883_s4 + $0x20] sm:$0xff] %v2545_v8 }
 0x5f6   :  { %2589 = vst.msk [vmem:[%s4883_s4 + $0x28] sm:$0xff] %vm1077_vm14, %v2547_v39  ;;  %v2550_v27 = vpop.f32.mrb[10].mxu0 }
 0x5f7   :  { %v2551_v37 = vadd.f32 %v2550_v27, %v1232_v41  ;;  %v2552_v1 = vpop.f32.mrb[11].mxu0 }
 0x5f8   :  { %v2553_v40 = vadd.f32 %v2552_v1, %v1232_v41 }
 0x5f9   :  { %2590 = vst [vmem:[%s4883_s4 + $0x30] sm:$0xff] %v2551_v37 }
 0x5fa   :  { %2591 = vst.msk [vmem:[%s4883_s4 + $0x38] sm:$0xff] %vm1077_vm14, %v2553_v40 }

</bundles_post_ra>
